<compile_context>
chip_gen: v5e
topology: v5e:2x2
jax: 0.10.0
libtpu: 0.0.40
codegen_flags: <defaults>
</compile_context>

<pallas_src>
import jax
import jax.numpy as jnp
from jax.experimental import pallas as pl
from jax.experimental.pallas import tpu as pltpu


# ---------------------------------------------------------------------------
# Hardware introspection (best-effort; safe fallbacks)
# ---------------------------------------------------------------------------
def _device_kind():
    try:
        return jax.devices()[0].device_kind.lower()
    except Exception:
        return ""


def _is_multi_tensorcore_chip():
    # v7x has 2 TensorCores per chip; v5e/v6e have 1.
    kind = _device_kind()
    return ("v7" in kind) or ("7x" in kind)


def _has_bf16_valu():
    # v6e / v7x have bf16 VPU paths; v5e does not.
    kind = _device_kind()
    return any(t in kind for t in ("v6", "v7", "7x"))


# ---------------------------------------------------------------------------
# Kernel
# ---------------------------------------------------------------------------
def _make_mlp_kernel(bf16_epilogue):
    def _mlp_kernel(x_ref, w1_ref, b1_ref, w2_ref, b2_ref, o_ref):
        """Fused 2-layer MLP on one batch tile: o = relu(x@W1+b1) @ W2 + b2.

        bf16 MXU inputs with f32 accumulation.  The bias-add + ReLU epilogue
        runs in bf16 on v6e/v7x (bf16 VALU) and in f32 on v5e.
        """
        h = jnp.dot(x_ref[...], w1_ref[...], preferred_element_type=jnp.float32)
        if bf16_epilogue:
            # Single f32->bf16 pack, then bf16 VPU bias+ReLU feeding the MXU.
            h = jnp.maximum(h.astype(jnp.bfloat16)
                            + b1_ref[...].astype(jnp.bfloat16), 0)
        else:
            # f32 VPU epilogue (v5e has no bf16 VALU); cast once at MXU input.
            h = jnp.maximum(h + b1_ref[...], 0.0).astype(w2_ref.dtype)
        y = jnp.dot(h, w2_ref[...], preferred_element_type=jnp.float32)
        o_ref[...] = (y + b2_ref[...]).astype(o_ref.dtype)

    return _mlp_kernel


# ---------------------------------------------------------------------------
# Wrapper
# ---------------------------------------------------------------------------
def _pick_batch_tile(batch, multi_tc):
    """Single full tile on single-TC chips; 4 tiles (2 per TC) on v7x."""
    target_steps = 4 if multi_tc else 1
    tb = max(batch // target_steps, 8)
    tb = (tb // 16) * 16 if tb >= 16 else tb          # sublane-dense bf16 tile
    if tb <= 0 or batch % tb != 0:
        tb = batch                                    # ragged -> one full tile
    return tb


def mlp_forward(x, w1, b1, w2, b2, *, block_batch=None, out_dtype=jnp.float32):
    """Batch-tiled pallas_call; weights/biases stay resident in VMEM."""
    batch, in_dim = x.shape
    hidden = w1.shape[1]
    out_dim = w2.shape[1]

    if block_batch is None:
        tb = _pick_batch_tile(batch, _is_multi_tensorcore_chip())
    else:
        tb = min(block_batch, batch)
        if batch % tb != 0:
            tb = batch
    grid = (pl.cdiv(batch, tb),)

    kernel = _make_mlp_kernel(bf16_epilogue=_has_bf16_valu())

    out_bytes = batch * out_dim * jnp.dtype(out_dtype).itemsize
    cost = pl.CostEstimate(
        flops=2 * batch * (in_dim * hidden + hidden * out_dim),
        transcendentals=0,
        bytes_accessed=(x.size * x.dtype.itemsize
                        + w1.size * w1.dtype.itemsize
                        + b1.size * b1.dtype.itemsize
                        + w2.size * w2.dtype.itemsize
                        + b2.size * b2.dtype.itemsize
                        + out_bytes),
    )
    compiler_params = pltpu.CompilerParams(
        dimension_semantics=("parallel",),       # batch-parallel (v7x dual-TC)
        vmem_limit_bytes=32 * 1024 * 1024,       # explicit; v5e default is 16 MiB
    )

    def build(buffered_consts):
        def const_spec(shape):
            if buffered_consts:
                # Constant index_map -> no need for double buffering; halves
                # resident-weight VMEM (matters on v7x's 64 MiB VMEM at scale).
                return pl.BlockSpec(shape, lambda i: (0, 0),
                                    pipeline_mode=pl.Buffered(1))
            return pl.BlockSpec(shape, lambda i: (0, 0))

        return pl.pallas_call(
            kernel,
            out_shape=jax.ShapeDtypeStruct((batch, out_dim), out_dtype),
            grid=grid,
            in_specs=[
                pl.BlockSpec((tb, in_dim), lambda i: (i, 0)),  # x: batch-tiled
                const_spec((in_dim, hidden)),                  # W1: VMEM-resident
                const_spec((1, hidden)),                       # b1
                const_spec((hidden, out_dim)),                 # W2: VMEM-resident
                const_spec((1, out_dim)),                      # b2
            ],
            out_specs=pl.BlockSpec((tb, out_dim), lambda i: (i, 0)),
            compiler_params=compiler_params,
            cost_estimate=cost,
        )

    try:
        return build(True)(x, w1, b1, w2, b2)
    except Exception:
        # Fallback for jax versions that reject pipeline_mode on these specs.
        return build(False)(x, w1, b1, w2, b2)


# ---------------------------------------------------------------------------
# Modules
# ---------------------------------------------------------------------------
class InnerMLP:
    """Deterministic synthetic inner module: relu(x@W1+b1)@W2+b2 (bf16 weights)."""

    def __init__(self, in_dim, hidden_dim, out_dim, key):
        k1, k2, k3, k4 = jax.random.split(key, 4)
        bound1 = 1.0 / (in_dim ** 0.5)
        bound2 = 1.0 / (hidden_dim ** 0.5)
        # bf16 weights (native MXU dtype), f32 biases.
        self.w1 = jax.random.uniform(k1, (in_dim, hidden_dim), jnp.float32,
                                     -bound1, bound1).astype(jnp.bfloat16)
        self.b1 = jax.random.uniform(k2, (1, hidden_dim), jnp.float32,
                                     -bound1, bound1)
        self.w2 = jax.random.uniform(k3, (hidden_dim, out_dim), jnp.float32,
                                     -bound2, bound2).astype(jnp.bfloat16)
        self.b2 = jax.random.uniform(k4, (1, out_dim), jnp.float32,
                                     -bound2, bound2)

    def __call__(self, x, eval=False, out_dtype=jnp.float32):
        # `eval` accepted for interface parity; no stochastic layers here.
        return mlp_forward(x, self.w1, self.b1, self.w2, self.b2,
                           out_dtype=out_dtype)


class WrappedModel:
    """Exact semantics of the PyTorch WrappedModel: pure delegation."""

    def __init__(self, model):
        self.module = model

    def forward(self, x, eval=False, **kw):
        return self.module(x, eval, **kw)

    __call__ = forward


# ---------------------------------------------------------------------------
# Smoke test
# ---------------------------------------------------------------------------
if __name__ == "__main__":
    key = jax.random.PRNGKey(0)
    k_x, k_m = jax.random.split(key)

    # Lane-dense dims (multiples of 128); batch tiling is chosen per chip
    # generation (1 tile on v5e/v6e, 4 tiles on v7x).
    batch, in_dim, hidden_dim, out_dim = 512, 128, 256, 128
    x = jax.random.normal(k_x, (batch, in_dim), jnp.float32).astype(jnp.bfloat16)

    model = WrappedModel(InnerMLP(in_dim, hidden_dim, out_dim, k_m))
    # bf16 writeback: halves the largest HBM stream of this memory-bound kernel.
    y = model(x, eval=True, out_dtype=jnp.bfloat16)
    jax.block_until_ready(y)

    # Plain-JAX reference of the same inner module (same dtype pipeline:
    # bf16 inputs, f32 accumulation, bf16 cast before the second matmul,
    # output quantized to the kernel's bf16 writeback dtype).
    inner = model.module
    xf = x.astype(jnp.float32)
    h_ref = jnp.maximum(xf @ inner.w1.astype(jnp.float32) + inner.b1, 0.0)
    y_ref = (h_ref.astype(jnp.bfloat16).astype(jnp.float32)
             @ inner.w2.astype(jnp.float32) + inner.b2)
    y_ref_q = y_ref.astype(jnp.bfloat16).astype(jnp.float32)

    assert y.shape == (batch, out_dim)
    assert y.dtype == jnp.bfloat16
    assert jnp.allclose(y.astype(jnp.float32), y_ref_q, atol=2e-2, rtol=2e-2), (
        float(jnp.max(jnp.abs(y.astype(jnp.float32) - y_ref_q))))

    print("KERNEL_OK")
</pallas_src>

<mosaic_0001>
module attributes {stable_mosaic.version = 11 : i64} {
  func.func @_mlp_kernel(%arg0: i32, %arg1: memref<512x128xbf16, #tpu.memory_space<vmem>>, %arg2: memref<128x256xbf16, #tpu.memory_space<vmem>>, %arg3: memref<1x256xf32, #tpu.memory_space<vmem>>, %arg4: memref<256x128xbf16, #tpu.memory_space<vmem>>, %arg5: memref<1x128xf32, #tpu.memory_space<vmem>>, %arg6: memref<512x128xbf16, #tpu.memory_space<vmem>>) attributes {dimension_semantics = [#tpu.dimension_semantics<parallel>], iteration_bounds = array<i64: 1>, scalar_prefetch = 0 : i64, scratch_operands = 0 : i64, tpu.core_type = #tpu.core_type<tc>, window_params = [{transform_indices = @transform_0, window_bounds = array<i64: 512, 128>}, {pipeline_mode = #tpu.pipeline_mode<synchronous>, transform_indices = @transform_1, window_bounds = array<i64: 128, 256>}, {pipeline_mode = #tpu.pipeline_mode<synchronous>, transform_indices = @transform_2, window_bounds = array<i64: 1, 256>}, {pipeline_mode = #tpu.pipeline_mode<synchronous>, transform_indices = @transform_3, window_bounds = array<i64: 256, 128>}, {pipeline_mode = #tpu.pipeline_mode<synchronous>, transform_indices = @transform_4, window_bounds = array<i64: 1, 128>}, {transform_indices = @transform_5, window_bounds = array<i64: 512, 128>}]} {
    %c0 = arith.constant 0 : index
    %c0_0 = arith.constant 0 : index
    %0 = vector.load %arg1[%c0, %c0_0] : memref<512x128xbf16, #tpu.memory_space<vmem>>, vector<512x128xbf16>
    %c0_1 = arith.constant 0 : index
    %c0_2 = arith.constant 0 : index
    %1 = vector.load %arg2[%c0_1, %c0_2] : memref<128x256xbf16, #tpu.memory_space<vmem>>, vector<128x256xbf16>
    %cst = arith.constant dense<0.000000e+00> : vector<512x256xf32>
    %2 = tpu.matmul %0, %1, %cst {dimension_numbers = #tpu.dot_dimension_numbers<[1], [0], [0], [1], [0, 0, 1, 1], [], []>} : vector<512x128xbf16>, vector<128x256xbf16>, vector<512x256xf32> -> vector<512x256xf32>
    %c0_3 = arith.constant 0 : index
    %c0_4 = arith.constant 0 : index
    %3 = vector.load %arg3[%c0_3, %c0_4] : memref<1x256xf32, #tpu.memory_space<vmem>>, vector<1x256xf32>
    %4 = vector.broadcast %3 : vector<1x256xf32> to vector<512x256xf32>
    %5 = arith.addf %2, %4 : vector<512x256xf32>
    %cst_5 = arith.constant 0.000000e+00 : f32
    %6 = vector.broadcast %cst_5 : f32 to vector<512x256xf32>
    %7 = arith.maximumf %5, %6 : vector<512x256xf32>
    %8 = arith.truncf %7 : vector<512x256xf32> to vector<512x256xbf16>
    %c0_6 = arith.constant 0 : index
    %c0_7 = arith.constant 0 : index
    %9 = vector.load %arg4[%c0_6, %c0_7] : memref<256x128xbf16, #tpu.memory_space<vmem>>, vector<256x128xbf16>
    %cst_8 = arith.constant dense<0.000000e+00> : vector<512x128xf32>
    %10 = tpu.matmul %8, %9, %cst_8 {dimension_numbers = #tpu.dot_dimension_numbers<[1], [0], [0], [1], [0, 0, 1, 1], [], []>} : vector<512x256xbf16>, vector<256x128xbf16>, vector<512x128xf32> -> vector<512x128xf32>
    %c0_9 = arith.constant 0 : index
    %c0_10 = arith.constant 0 : index
    %11 = vector.load %arg5[%c0_9, %c0_10] : memref<1x128xf32, #tpu.memory_space<vmem>>, vector<1x128xf32>
    %12 = vector.broadcast %11 : vector<1x128xf32> to vector<512x128xf32>
    %13 = arith.addf %10, %12 : vector<512x128xf32>
    %14 = arith.truncf %13 : vector<512x128xf32> to vector<512x128xbf16>
    %c0_11 = arith.constant 0 : index
    %c0_12 = arith.constant 0 : index
    %15 = vector.load %arg6[%c0_11, %c0_12] : memref<512x128xbf16, #tpu.memory_space<vmem>>, vector<512x128xbf16>
    tpu.vector_store %arg6[%c0_11, %c0_12], %14 {strides = array<i32>} : memref<512x128xbf16, #tpu.memory_space<vmem>>, vector<512x128xbf16>,
    return
  }
  func.func @transform_0(%arg0: i32) -> (i32, i32) {
    %c0_i32 = arith.constant 0 : i32
    %c0_i32_0 = arith.constant 0 : i32
    return %arg0, %c0_i32 : i32, i32
  }
  func.func @transform_1(%arg0: i32) -> (i32, i32) {
    %c0_i32 = arith.constant 0 : i32
    %c0_i32_0 = arith.constant 0 : i32
    %c0_i32_1 = arith.constant 0 : i32
    return %c0_i32, %c0_i32_0 : i32, i32
  }
  func.func @transform_2(%arg0: i32) -> (i32, i32) {
    %c0_i32 = arith.constant 0 : i32
    %c0_i32_0 = arith.constant 0 : i32
    %c0_i32_1 = arith.constant 0 : i32
    return %c0_i32, %c0_i32_0 : i32, i32
  }
  func.func @transform_3(%arg0: i32) -> (i32, i32) {
    %c0_i32 = arith.constant 0 : i32
    %c0_i32_0 = arith.constant 0 : i32
    %c0_i32_1 = arith.constant 0 : i32
    return %c0_i32, %c0_i32_0 : i32, i32
  }
  func.func @transform_4(%arg0: i32) -> (i32, i32) {
    %c0_i32 = arith.constant 0 : i32
    %c0_i32_0 = arith.constant 0 : i32
    %c0_i32_1 = arith.constant 0 : i32
    return %c0_i32, %c0_i32_0 : i32, i32
  }
  func.func @transform_5(%arg0: i32) -> (i32, i32) {
    %c0_i32 = arith.constant 0 : i32
    %c0_i32_0 = arith.constant 0 : i32
    return %arg0, %c0_i32 : i32, i32
  }
}

module attributes {stable_mosaic.version = 11 : i64} {
  func.func @_mlp_kernel(%arg0: i32, %arg1: memref<512x128xbf16, #tpu.memory_space<vmem>>, %arg2: memref<128x256xbf16, #tpu.memory_space<vmem>>, %arg3: memref<1x256xf32, #tpu.memory_space<vmem>>, %arg4: memref<256x128xbf16, #tpu.memory_space<vmem>>, %arg5: memref<1x128xf32, #tpu.memory_space<vmem>>, %arg6: memref<512x128xbf16, #tpu.memory_space<vmem>>) attributes {dimension_semantics = [#tpu.dimension_semantics<parallel>], iteration_bounds = array<i64: 1>, scalar_prefetch = 0 : i64, scratch_operands = 0 : i64, tpu.core_type = #tpu.core_type<tc>, window_params = [{transform_indices = @transform_0, window_bounds = array<i64: 512, 128>}, {pipeline_mode = #tpu.pipeline_mode<synchronous>, transform_indices = @transform_1, window_bounds = array<i64: 128, 256>}, {pipeline_mode = #tpu.pipeline_mode<synchronous>, transform_indices = @transform_2, window_bounds = array<i64: 1, 256>}, {pipeline_mode = #tpu.pipeline_mode<synchronous>, transform_indices = @transform_3, window_bounds = array<i64: 256, 128>}, {pipeline_mode = #tpu.pipeline_mode<synchronous>, transform_indices = @transform_4, window_bounds = array<i64: 1, 128>}, {transform_indices = @transform_5, window_bounds = array<i64: 512, 128>}]} {
    %c0 = arith.constant 0 : index
    %c0_0 = arith.constant 0 : index
    %0 = vector.load %arg1[%c0, %c0_0] : memref<512x128xbf16, #tpu.memory_space<vmem>>, vector<512x128xbf16>
    %c0_1 = arith.constant 0 : index
    %c0_2 = arith.constant 0 : index
    %1 = vector.load %arg2[%c0_1, %c0_2] : memref<128x256xbf16, #tpu.memory_space<vmem>>, vector<128x256xbf16>
    %cst = arith.constant dense<0.000000e+00> : vector<512x256xf32>
    %2 = tpu.matmul %0, %1, %cst {dimension_numbers = #tpu.dot_dimension_numbers<[1], [0], [0], [1], [0, 0, 1, 1], [], []>} : vector<512x128xbf16>, vector<128x256xbf16>, vector<512x256xf32> -> vector<512x256xf32>
    %c0_3 = arith.constant 0 : index
    %c0_4 = arith.constant 0 : index
    %3 = vector.load %arg3[%c0_3, %c0_4] : memref<1x256xf32, #tpu.memory_space<vmem>>, vector<1x256xf32>
    %4 = vector.broadcast %3 : vector<1x256xf32> to vector<512x256xf32>
    %5 = arith.addf %2, %4 : vector<512x256xf32>
    %cst_5 = arith.constant 0.000000e+00 : f32
    %6 = vector.broadcast %cst_5 : f32 to vector<512x256xf32>
    %7 = arith.maximumf %5, %6 : vector<512x256xf32>
    %8 = arith.truncf %7 : vector<512x256xf32> to vector<512x256xbf16>
    %c0_6 = arith.constant 0 : index
    %c0_7 = arith.constant 0 : index
    %9 = vector.load %arg4[%c0_6, %c0_7] : memref<256x128xbf16, #tpu.memory_space<vmem>>, vector<256x128xbf16>
    %cst_8 = arith.constant dense<0.000000e+00> : vector<512x128xf32>
    %10 = tpu.matmul %8, %9, %cst_8 {dimension_numbers = #tpu.dot_dimension_numbers<[1], [0], [0], [1], [0, 0, 1, 1], [], []>} : vector<512x256xbf16>, vector<256x128xbf16>, vector<512x128xf32> -> vector<512x128xf32>
    %c0_9 = arith.constant 0 : index
    %c0_10 = arith.constant 0 : index
    %11 = vector.load %arg5[%c0_9, %c0_10] : memref<1x128xf32, #tpu.memory_space<vmem>>, vector<1x128xf32>
    %12 = vector.broadcast %11 : vector<1x128xf32> to vector<512x128xf32>
    %13 = arith.addf %10, %12 : vector<512x128xf32>
    %14 = arith.truncf %13 : vector<512x128xf32> to vector<512x128xbf16>
    %c0_11 = arith.constant 0 : index
    %c0_12 = arith.constant 0 : index
    %15 = vector.load %arg6[%c0_11, %c0_12] : memref<512x128xbf16, #tpu.memory_space<vmem>>, vector<512x128xbf16>
    tpu.vector_store %arg6[%c0_11, %c0_12], %14 {strides = array<i32>} : memref<512x128xbf16, #tpu.memory_space<vmem>>, vector<512x128xbf16>,
    return
  }
  func.func @transform_0(%arg0: i32) -> (i32, i32) {
    %c0_i32 = arith.constant 0 : i32
    %c0_i32_0 = arith.constant 0 : i32
    return %arg0, %c0_i32 : i32, i32
  }
  func.func @transform_1(%arg0: i32) -> (i32, i32) {
    %c0_i32 = arith.constant 0 : i32
    %c0_i32_0 = arith.constant 0 : i32
    %c0_i32_1 = arith.constant 0 : i32
    return %c0_i32, %c0_i32_0 : i32, i32
  }
  func.func @transform_2(%arg0: i32) -> (i32, i32) {
    %c0_i32 = arith.constant 0 : i32
    %c0_i32_0 = arith.constant 0 : i32
    %c0_i32_1 = arith.constant 0 : i32
    return %c0_i32, %c0_i32_0 : i32, i32
  }
  func.func @transform_3(%arg0: i32) -> (i32, i32) {
    %c0_i32 = arith.constant 0 : i32
    %c0_i32_0 = arith.constant 0 : i32
    %c0_i32_1 = arith.constant 0 : i32
    return %c0_i32, %c0_i32_0 : i32, i32
  }
  func.func @transform_4(%arg0: i32) -> (i32, i32) {
    %c0_i32 = arith.constant 0 : i32
    %c0_i32_0 = arith.constant 0 : i32
    %c0_i32_1 = arith.constant 0 : i32
    return %c0_i32, %c0_i32_0 : i32, i32
  }
  func.func @transform_5(%arg0: i32) -> (i32, i32) {
    %c0_i32 = arith.constant 0 : i32
    %c0_i32_0 = arith.constant 0 : i32
    return %arg0, %c0_i32 : i32, i32
  }
}

</mosaic_0001>

<bundles_post_ra>
// kernel: tpu_custom_call.1
= control target key start
LH: loop header
LB: loop body
LE: loop exit
PB: predicated region body
PF: predicated region fallthrough
CT: control target
= control target key end

     0   :  { %10 = vsyncpa [#allocation3], 0  ;;  %s2508_s0 = inlined_call_operand.hbm [shape: bf16[512,128], index: 0, kind: input, shape index: {}]   ;;  %s2509_s1 = inlined_call_operand.hbm [shape: bf16[128,256], index: 1, kind: input, shape index: {}]   ;;  %s2510_s2 = inlined_call_operand.hbm [shape: f32[1,256], index: 2, kind: input, shape index: {}]   ;;  %s2511_s3 = inlined_call_operand.hbm [shape: bf16[256,128], index: 3, kind: input, shape index: {}]   ;;  %s2512_s4 = inlined_call_operand.vmem [shape: f32[1,128], index: 4, kind: input, shape index: {}]   ;;  %s2513_s5 = inlined_call_operand.hbm [shape: bf16[512,128], index: 5, kind: output, shape index: {}]  }
   0x1   :  { %11 = vsyncpa [#allocation6], 0 }
   0x2   :  { %12 = vsyncpa [#allocation9], 0  ;;  %s31_s20 = sshll.u32 %s2509_s1, 4  ;;  %s32_s20 = int_to_ptr.hbm [resolvable:$true] %s31_s20 }
   0x3   :  { %13 = vsyncpa [#allocation4], 0  ;;  %s2239_s21 = smov [#allocation5]   ;;  %s18_s25 = sshll.u32 %s2508_s0, 4  ;;  %s19_s25 = int_to_ptr.hbm [resolvable:$true] %s18_s25 }
   0x4   :  { %s33_s22 = sshll.u32 %s2239_s21, 4  ;;  %s2240_s26 = smov 128   ;;  %s34_s22 = int_to_ptr.vmem [resolvable:$true] %s33_s22 }
   0x5   :  { %s2241_s27 = smov 8   ;;  %s2242_s28 = smov [#allocation2]  }
   0x6   :  { %39 = dma.hbm_to_vmem [thread:$0]  %s32_s20, 2048, %s34_s22, [#allocation6], %s2240_s26, %s2240_s26, %s2241_s27  }
   0x7   :  { %s20_s29 = sshll.u32 %s2242_s28, 4  ;;  %s2243_s30 = smov 64   ;;  %s21_s29 = int_to_ptr.vmem [resolvable:$true] %s20_s29 }
   0x8   :  { %s2244_s6 = smov 4   ;;  %s45_s8 = sshll.u32 %s2510_s2, 4  ;;  %s46_s8 = int_to_ptr.hbm [resolvable:$true] %s45_s8 }
   0x9   :  { %26 = dma.hbm_to_vmem [thread:$0]  %s19_s25, 4096, %s21_s29, [#allocation3], %s2243_s30, %s2243_s30, %s2244_s6  }
   0xa   :  { %s2245_s9 = smov [#allocation7]   ;;  %s55_s12 = sshll.u32 %s2511_s3, 4  ;;  %s56_s12 = int_to_ptr.hbm [resolvable:$true] %s55_s12 }
   0xb   :  { %s47_s0 = sshll.u32 %s2245_s9, 4  ;;  %s2246_s13 = smov [#allocation8]   ;;  %s48_s0 = int_to_ptr.vmem [resolvable:$true] %s47_s0 }
   0xc   :  { %50 = dma.hbm_to_vmem [thread:$0]  %s46_s8, 32, %s48_s0, [#allocation6]  }
   0xd   :  { %s57_s14 = sshll.u32 %s2246_s13, 4  ;;  %s58_s14 = int_to_ptr.vmem [resolvable:$true] %s57_s14 }
   0xe   :  { %63 = dma.hbm_to_vmem [thread:$0]  %s56_s12, 2048, %s58_s14, [#allocation9], %s2243_s30, %s2243_s30, %s2244_s6  }
   0xf   :  { %2231 = dma.done.wait [#allocation3], 4096  }
  0x10   :  { %2232 = vsyncadd [#allocation3], 4294963200 }
  0x11   :  { %2233 = dma.done.wait [#allocation6], 2080  }
  0x12   :  { %2234 = vsyncadd [#allocation6], 4294965216 }
  0x13   :  { %2235 = dma.done.wait [#allocation9], 2048  }
  0x14   :  { %2236 = vsyncadd [#allocation9], 4294965248  ;;  %v1775_v0 = vld [vmem:[#allocation5 + $0x70] sm:$0xf]  ;;  %v1892_v1 = vld [vmem:[#allocation5 + $0x74] sm:$0xf0] }
  0x15   :  { %v1891_v2 = vld [vmem:[#allocation5 + $0x74] sm:$0xf]  ;;  %v1776_v3 = vor.u32 %v1892_v1, %v1775_v0  ;;  %v1777_v4 = vld [vmem:[#allocation5 + $0x78] sm:$0xf0]  ;;  %v1767_v5 = vld [vmem:[#allocation5 + $0x60] sm:$0xf] }
  0x16   :  { %v1890_v6 = vld [vmem:[#allocation5 + $0x64] sm:$0xf0]  ;;  %v1780_v7 = vor.u32 %v1891_v2, %v1777_v4  ;;  %v1889_v8 = vld [vmem:[#allocation5 + $0x64] sm:$0xf]  ;;  %v1769_v9 = vld [vmem:[#allocation5 + $0x68] sm:$0xf0] }
  0x17   :  { %440 = vmatpush.bf16.msra.mxu0 %v1776_v3  ;;  %v1768_v10 = vor.u32 %v1890_v6, %v1767_v5  ;;  %v1772_v11 = vor.u32 %v1889_v8, %v1769_v9  ;;  %v1759_v12 = vld [vmem:[#allocation5 + $0x50] sm:$0xf]  ;;  %v1888_v13 = vld [vmem:[#allocation5 + $0x54] sm:$0xf0]  ;;  %v1887_v14 = vld [vmem:[#allocation5 + $0x54] sm:$0xf] }
  0x18   :  { %609 = vmatpush.bf16.msra.mxu1 %v1780_v7  ;;  %v1761_v15 = vld [vmem:[#allocation5 + $0x58] sm:$0xf0]  ;;  %v1760_v16 = vor.u32 %v1888_v13, %v1759_v12  ;;  %v1751_v18 = vld [vmem:[#allocation5 + $0x40] sm:$0xf]  ;;  %v1886_v19 = vld [vmem:[#allocation5 + $0x44] sm:$0xf0] }
  0x19   :  { %v1764_v17 = vor.u32 %v1887_v14, %v1761_v15  ;;  %v1885_v20 = vld [vmem:[#allocation5 + $0x44] sm:$0xf]  ;;  %v1753_v21 = vld [vmem:[#allocation5 + $0x48] sm:$0xf0]  ;;  %v1752_v22 = vor.u32 %v1886_v19, %v1751_v18  ;;  %v1743_v24 = vld [vmem:[#allocation5 + $0x30] sm:$0xf] }
  0x1a   :  { %v1756_v23 = vor.u32 %v1885_v20, %v1753_v21  ;;  %v1884_v25 = vld [vmem:[#allocation5 + $0x34] sm:$0xf0]  ;;  %v1883_v26 = vld [vmem:[#allocation5 + $0x34] sm:$0xf]  ;;  %v1745_v27 = vld [vmem:[#allocation5 + $0x38] sm:$0xf0] }
  0x1b   :  { %441 = vmatpush.bf16.msra.mxu0 %v1768_v10  ;;  %v1744_v28 = vor.u32 %v1884_v25, %v1743_v24  ;;  %v1748_v29 = vor.u32 %v1883_v26, %v1745_v27  ;;  %v1735_v30 = vld [vmem:[#allocation5 + $0x20] sm:$0xf]  ;;  %v1882_v31 = vld [vmem:[#allocation5 + $0x24] sm:$0xf0]  ;;  %v1881_v32 = vld [vmem:[#allocation5 + $0x24] sm:$0xf] }
  0x1c   :  { %610 = vmatpush.bf16.msra.mxu1 %v1772_v11  ;;  %v1737_v33 = vld [vmem:[#allocation5 + $0x28] sm:$0xf0]  ;;  %v1736_v34 = vor.u32 %v1882_v31, %v1735_v30  ;;  %v1727_v36 = vld [vmem:[#allocation5 + $0x10] sm:$0xf]  ;;  %v1880_v37 = vld [vmem:[#allocation5 + $0x14] sm:$0xf0] }
  0x1d   :  { %v1740_v35 = vor.u32 %v1881_v32, %v1737_v33  ;;  %v1879_v38 = vld [vmem:[#allocation5 + $0x14] sm:$0xf]  ;;  %v1729_v39 = vld [vmem:[#allocation5 + $0x18] sm:$0xf0]  ;;  %v1728_v40 = vor.u32 %v1880_v37, %v1727_v36  ;;  %v1719_v42 = vld [vmem:[#allocation5] sm:$0xf] }
  0x1e   :  { %v1732_v41 = vor.u32 %v1879_v38, %v1729_v39  ;;  %v1878_v43 = vld [vmem:[#allocation5 + $0x4] sm:$0xf0]  ;;  %v1877_v44 = vld [vmem:[#allocation5 + $0x4] sm:$0xf]  ;;  %v1721_v45 = vld [vmem:[#allocation5 + $0x8] sm:$0xf0] }
  0x1f   :  { %442 = vmatpush.bf16.msra.mxu0 %v1760_v16  ;;  %v1720_v46 = vor.u32 %v1878_v43, %v1719_v42  ;;  %v1724_v47 = vor.u32 %v1877_v44, %v1721_v45  ;;  %v1845_v48 = vld [vmem:[#allocation2] sm:$0xff]  ;;  %v1846_v49 = vld [vmem:[#allocation2 + $0x8] sm:$0xff]  ;;  %v1847_v50 = vld [vmem:[#allocation2 + $0x10] sm:$0xff]  ;;  %s1574_s20 = sshll.u32 %s2513_s5, 4  ;;  %s1575_s20 = int_to_ptr.hbm [resolvable:$true] %s1574_s20 }
  0x20   :  { %611 = vmatpush.bf16.msra.mxu1 %v1764_v17  ;;  %v1848_v51 = vld [vmem:[#allocation2 + $0x18] sm:$0xff]  ;;  %v1849_v52 = vld [vmem:[#allocation2 + $0x20] sm:$0xff]  ;;  %v1850_v55 = vld [vmem:[#allocation2 + $0x28] sm:$0xff] }
  0x21   :  { %v1900_v53 = vld [vmem:[#allocation8 + $0x38] sm:$0xff]  ;;  %v1899_v56 = vld [vmem:[#allocation8 + $0x30] sm:$0xff]  ;;  %v1898_v58 = vld [vmem:[#allocation8 + $0x28] sm:$0xff] }
  0x22   :  { %v1908_v54 = vld [vmem:[#allocation8 + $0x78] sm:$0xff]  ;;  %1102 = vmatpush.bf16.msra.mxu2 %v1900_v53  ;;  %v1907_v57 = vld [vmem:[#allocation8 + $0x70] sm:$0xff]  ;;  %v1906_v59 = vld [vmem:[#allocation8 + $0x68] sm:$0xff] }
  0x23   :  { %443 = vmatpush.bf16.msra.mxu0 %v1752_v22  ;;  %1271 = vmatpush.bf16.msra.mxu3 %v1908_v54  ;;  %v1897_v60 = vld [vmem:[#allocation8 + $0x20] sm:$0xff]  ;;  %v1851_v62 = vld [vmem:[#allocation2 + $0x30] sm:$0xff]  ;;  %v1896_v63 = vld [vmem:[#allocation8 + $0x18] sm:$0xff] }
  0x24   :  { %612 = vmatpush.bf16.msra.mxu1 %v1756_v23  ;;  %v1905_v61 = vld [vmem:[#allocation8 + $0x60] sm:$0xff]  ;;  %v1904_v0 = vld [vmem:[#allocation8 + $0x58] sm:$0xff]  ;;  %v1895_v1 = vld [vmem:[#allocation8 + $0x10] sm:$0xff] }
  0x25   :  { %v1903_v2 = vld [vmem:[#allocation8 + $0x50] sm:$0xff]  ;;  %v1894_v3 = vld [vmem:[#allocation8 + $0x8] sm:$0xff]  ;;  %v1893_v5 = vld [vmem:[#allocation8] sm:$0xff] }
  0x26   :  { %1103 = vmatpush.bf16.msra.mxu2 %v1899_v56  ;;  %v1902_v4 = vld [vmem:[#allocation8 + $0x48] sm:$0xff]  ;;  %v1901_v6 = vld [vmem:[#allocation8 + $0x40] sm:$0xff]  ;;  %v1852_v7 = vld [vmem:[#allocation2 + $0x38] sm:$0xff] }
  0x27   :  { %444 = vmatpush.bf16.msra.mxu0 %v1744_v28  ;;  %1272 = vmatpush.bf16.msra.mxu3 %v1907_v57  ;;  %v1853_v8 = vld [vmem:[#allocation2 + $0x40] sm:$0xff]  ;;  %v1854_v26 = vld [vmem:[#allocation2 + $0x48] sm:$0xff]  ;;  %v1856_v56 = vld [vmem:[#allocation2 + $0x58] sm:$0xff] }
  0x28   :  { %613 = vmatpush.bf16.msra.mxu1 %v1748_v29  ;;  %v162_v9 = vld [vmem:[#allocation7] sm:$0x3] }
  0x29   :  { %v2296_v12 = vperm.slane %v162_v9, 0  ;;  %v2298_v13 = vperm.slane %v162_v9, 1 }
  0x2a   :  { %1104 = vmatpush.bf16.msra.mxu2 %v1898_v58 }
  0x2b   :  { %445 = vmatpush.bf16.msra.mxu0 %v1736_v34  ;;  %1273 = vmatpush.bf16.msra.mxu3 %v1906_v59 }
  0x2c   :  { %614 = vmatpush.bf16.msra.mxu1 %v1740_v35 }
  0x2e   :  { %1105 = vmatpush.bf16.msra.mxu2 %v1897_v60 }
  0x2f   :  { %446 = vmatpush.bf16.msra.mxu0 %v1728_v40  ;;  %1274 = vmatpush.bf16.msra.mxu3 %v1905_v61 }
  0x30   :  { %615 = vmatpush.bf16.msra.mxu1 %v1732_v41  ;;  %v1855_v41 = vld [vmem:[#allocation2 + $0x50] sm:$0xff] }
  0x32   :  { %1106 = vmatpush.bf16.msra.mxu2 %v1896_v63 }
  0x33   :  { %447 = vmatpush.bf16.msra.mxu0 %v1720_v46  ;;  %1275 = vmatpush.bf16.msra.mxu3 %v1904_v0 }
  0x34   :  { %616 = vmatpush.bf16.msra.mxu1 %v1724_v47 }
  0x36   :  { %448 = vmatmul.bf16.vlgmr.msra.gmra.mxu0 %v1845_v48  ;;  %1107 = vmatpush.bf16.msra.mxu2 %v1895_v1 }
  0x37   :  { %617 = vmatmul.bf16.vlgmr.msra.gmra.mxu1 %v1845_v48  ;;  %1276 = vmatpush.bf16.msra.mxu3 %v1903_v2 }
  0x3a   :  { %1108 = vmatpush.bf16.msra.mxu2 %v1894_v3 }
  0x3b   :  { %1277 = vmatpush.bf16.msra.mxu3 %v1902_v4 }
  0x3e   :  { %1109 = vmatpush.bf16.msra.mxu2 %v1893_v5 }
  0x3f   :  { %1278 = vmatpush.bf16.msra.mxu3 %v1901_v6 }
  0x46   :  { %453 = vmatmul.bf16.gmra.mxu0 %v1846_v49 }
  0x47   :  { %622 = vmatmul.bf16.gmra.mxu1 %v1846_v49 }
  0x56   :  { %458 = vmatmul.bf16.gmra.mxu0 %v1847_v50 }
  0x57   :  { %627 = vmatmul.bf16.gmra.mxu1 %v1847_v50 }
  0x66   :  { %463 = vmatmul.bf16.gmra.mxu0 %v1848_v51 }
  0x67   :  { %632 = vmatmul.bf16.gmra.mxu1 %v1848_v51 }
  0x76   :  { %468 = vmatmul.bf16.gmra.mxu0 %v1849_v52 }
  0x77   :  { %637 = vmatmul.bf16.gmra.mxu1 %v1849_v52 }
  0x86   :  { %473 = vmatmul.bf16.gmra.mxu0 %v1850_v55 }
  0x87   :  { %642 = vmatmul.bf16.gmra.mxu1 %v1850_v55 }
  0x96   :  { %478 = vmatmul.bf16.gmra.mxu0 %v1851_v62 }
  0x97   :  { %647 = vmatmul.bf16.gmra.mxu1 %v1851_v62 }
  0xa6   :  { %483 = vmatmul.bf16.gmra.mxu0 %v1852_v7 }
  0xa7   :  { %652 = vmatmul.bf16.gmra.mxu1 %v1852_v7  ;;  %v1857_v7 = vld [vmem:[#allocation2 + $0x60] sm:$0xff] }
  0xb3   :  { %v449_v10 = vpop.f32.mrf.mxu0 }
  0xb4   :  { %v618_v11 = vpop.f32.mrf.mxu1  ;;  %v450_v14 = vadd.f32 %v449_v10, %v2296_v12 }
  0xb5   :  { %v619_v15 = vadd.f32 %v618_v11, %v2298_v13 }
  0xb6   :  { %488 = vmatmul.bf16.gmra.mxu0 %v1853_v8  ;;  %v778_v20 = vmax.f32 %v450_v14, 0.0 }
  0xb7   :  { %657 = vmatmul.bf16.gmra.mxu1 %v1853_v8  ;;  %v779_v22 = vmax.f32 %v619_v15, 0.0 }
  0xbb   :  { %v451_v16 = vpop.f32.mrf.mxu0 }
  0xbc   :  { %v452_v17 = vadd.f32 %v451_v16, %v2296_v12  ;;  %v620_v18 = vpop.f32.mrf.mxu1 }
  0xbd   :  { %v621_v19 = vadd.f32 %v620_v18, %v2298_v13 }
  0xbe   :  { %v780_v21 = vmax.f32 %v452_v17, 0.0 }
  0xbf   :  { %v781_v23 = vmax.f32 %v621_v19, 0.0 }
  0xc0   :  { %v906_v24 = vpack.c.bf16 %v780_v21, %v778_v20 }
  0xc1   :  { %v907_v25 = vpack.c.bf16 %v781_v23, %v779_v22 }
  0xc2   :  { %1110 = vmatmul.bf16.vlgmr.msra.gmra.mxu2 %v906_v24  ;;  %v1858_v24 = vld [vmem:[#allocation2 + $0x68] sm:$0xff] }
  0xc3   :  { %1279 = vmatmul.bf16.vlgmr.msra.gmra.mxu3 %v907_v25  ;;  %v454_v27 = vpop.f32.mrf.mxu0 }
  0xc4   :  { %v623_v28 = vpop.f32.mrf.mxu1  ;;  %v455_v29 = vadd.f32 %v454_v27, %v2296_v12 }
  0xc5   :  { %v624_v30 = vadd.f32 %v623_v28, %v2298_v13 }
  0xc6   :  { %493 = vmatmul.bf16.gmra.mxu0 %v1854_v26  ;;  %v782_v35 = vmax.f32 %v455_v29, 0.0 }
  0xc7   :  { %662 = vmatmul.bf16.gmra.mxu1 %v1854_v26  ;;  %v783_v37 = vmax.f32 %v624_v30, 0.0 }
  0xcb   :  { %v456_v31 = vpop.f32.mrf.mxu0 }
  0xcc   :  { %v457_v32 = vadd.f32 %v456_v31, %v2296_v12  ;;  %v625_v33 = vpop.f32.mrf.mxu1 }
  0xcd   :  { %v626_v34 = vadd.f32 %v625_v33, %v2298_v13 }
  0xce   :  { %v784_v36 = vmax.f32 %v457_v32, 0.0 }
  0xcf   :  { %v785_v38 = vmax.f32 %v626_v34, 0.0 }
  0xd0   :  { %v908_v39 = vpack.c.bf16 %v784_v36, %v782_v35 }
  0xd1   :  { %v909_v40 = vpack.c.bf16 %v785_v38, %v783_v37 }
  0xd2   :  { %1115 = vmatmul.bf16.gmra.mxu2 %v908_v39  ;;  %v1859_v39 = vld [vmem:[#allocation2 + $0x70] sm:$0xff] }
  0xd3   :  { %1284 = vmatmul.bf16.gmra.mxu3 %v909_v40  ;;  %v459_v42 = vpop.f32.mrf.mxu0 }
  0xd4   :  { %v628_v43 = vpop.f32.mrf.mxu1  ;;  %v460_v44 = vadd.f32 %v459_v42, %v2296_v12 }
  0xd5   :  { %v629_v45 = vadd.f32 %v628_v43, %v2298_v13 }
  0xd6   :  { %498 = vmatmul.bf16.gmra.mxu0 %v1855_v41  ;;  %v786_v50 = vmax.f32 %v460_v44, 0.0 }
  0xd7   :  { %667 = vmatmul.bf16.gmra.mxu1 %v1855_v41  ;;  %v787_v52 = vmax.f32 %v629_v45, 0.0 }
  0xdb   :  { %v461_v46 = vpop.f32.mrf.mxu0 }
  0xdc   :  { %v462_v47 = vadd.f32 %v461_v46, %v2296_v12  ;;  %v630_v48 = vpop.f32.mrf.mxu1 }
  0xdd   :  { %v631_v49 = vadd.f32 %v630_v48, %v2298_v13 }
  0xde   :  { %v788_v51 = vmax.f32 %v462_v47, 0.0 }
  0xdf   :  { %v789_v53 = vmax.f32 %v631_v49, 0.0 }
  0xe0   :  { %v910_v54 = vpack.c.bf16 %v788_v51, %v786_v50 }
  0xe1   :  { %v911_v55 = vpack.c.bf16 %v789_v53, %v787_v52 }
  0xe2   :  { %1120 = vmatmul.bf16.gmra.mxu2 %v910_v54  ;;  %v1860_v54 = vld [vmem:[#allocation2 + $0x78] sm:$0xff] }
  0xe3   :  { %1289 = vmatmul.bf16.gmra.mxu3 %v911_v55  ;;  %v464_v57 = vpop.f32.mrf.mxu0 }
  0xe4   :  { %v633_v58 = vpop.f32.mrf.mxu1  ;;  %v465_v59 = vadd.f32 %v464_v57, %v2296_v12 }
  0xe5   :  { %v634_v60 = vadd.f32 %v633_v58, %v2298_v13 }
  0xe6   :  { %503 = vmatmul.bf16.gmra.mxu0 %v1856_v56  ;;  %v790_v1 = vmax.f32 %v465_v59, 0.0 }
  0xe7   :  { %672 = vmatmul.bf16.gmra.mxu1 %v1856_v56  ;;  %v791_v3 = vmax.f32 %v634_v60, 0.0 }
  0xeb   :  { %v466_v61 = vpop.f32.mrf.mxu0 }
  0xec   :  { %v467_v62 = vadd.f32 %v466_v61, %v2296_v12  ;;  %v635_v63 = vpop.f32.mrf.mxu1 }
  0xed   :  { %v636_v0 = vadd.f32 %v635_v63, %v2298_v13 }
  0xee   :  { %v792_v2 = vmax.f32 %v467_v62, 0.0 }
  0xef   :  { %v793_v4 = vmax.f32 %v636_v0, 0.0 }
  0xf0   :  { %v912_v5 = vpack.c.bf16 %v792_v2, %v790_v1 }
  0xf1   :  { %v913_v6 = vpack.c.bf16 %v793_v4, %v791_v3 }
  0xf2   :  { %1125 = vmatmul.bf16.gmra.mxu2 %v912_v5  ;;  %v1861_v5 = vld [vmem:[#allocation2 + $0x80] sm:$0xff] }
  0xf3   :  { %1294 = vmatmul.bf16.gmra.mxu3 %v913_v6  ;;  %v469_v8 = vpop.f32.mrf.mxu0 }
  0xf4   :  { %v638_v9 = vpop.f32.mrf.mxu1  ;;  %v470_v10 = vadd.f32 %v469_v8, %v2296_v12 }
  0xf5   :  { %v639_v11 = vadd.f32 %v638_v9, %v2298_v13 }
  0xf6   :  { %508 = vmatmul.bf16.gmra.mxu0 %v1857_v7  ;;  %v794_v18 = vmax.f32 %v470_v10, 0.0 }
  0xf7   :  { %677 = vmatmul.bf16.gmra.mxu1 %v1857_v7  ;;  %v795_v20 = vmax.f32 %v639_v11, 0.0 }
  0xfb   :  { %v471_v14 = vpop.f32.mrf.mxu0 }
  0xfc   :  { %v472_v15 = vadd.f32 %v471_v14, %v2296_v12  ;;  %v640_v16 = vpop.f32.mrf.mxu1 }
  0xfd   :  { %v641_v17 = vadd.f32 %v640_v16, %v2298_v13 }
  0xfe   :  { %v796_v19 = vmax.f32 %v472_v15, 0.0 }
  0xff   :  { %v797_v21 = vmax.f32 %v641_v17, 0.0 }
 0x100   :  { %v914_v22 = vpack.c.bf16 %v796_v19, %v794_v18 }
 0x101   :  { %v915_v23 = vpack.c.bf16 %v797_v21, %v795_v20 }
 0x102   :  { %1130 = vmatmul.bf16.gmra.mxu2 %v914_v22  ;;  %v1862_v22 = vld [vmem:[#allocation2 + $0x88] sm:$0xff] }
 0x103   :  { %1299 = vmatmul.bf16.gmra.mxu3 %v915_v23  ;;  %v474_v25 = vpop.f32.mrf.mxu0 }
 0x104   :  { %v643_v26 = vpop.f32.mrf.mxu1  ;;  %v475_v27 = vadd.f32 %v474_v25, %v2296_v12 }
 0x105   :  { %v644_v28 = vadd.f32 %v643_v26, %v2298_v13 }
 0x106   :  { %513 = vmatmul.bf16.gmra.mxu0 %v1858_v24  ;;  %v798_v33 = vmax.f32 %v475_v27, 0.0  ;;  %v2339_v27 = vld [vmem:[%s2512_s4] ss:$0 sm:$0xff] }
 0x107   :  { %682 = vmatmul.bf16.gmra.mxu1 %v1858_v24  ;;  %v799_v35 = vmax.f32 %v644_v28, 0.0 }
 0x10b   :  { %v476_v29 = vpop.f32.mrf.mxu0 }
 0x10c   :  { %v477_v30 = vadd.f32 %v476_v29, %v2296_v12  ;;  %v645_v31 = vpop.f32.mrf.mxu1 }
 0x10d   :  { %v646_v32 = vadd.f32 %v645_v31, %v2298_v13 }
 0x10e   :  { %v800_v34 = vmax.f32 %v477_v30, 0.0 }
 0x10f   :  { %v801_v36 = vmax.f32 %v646_v32, 0.0 }
 0x110   :  { %v916_v37 = vpack.c.bf16 %v800_v34, %v798_v33 }
 0x111   :  { %v917_v38 = vpack.c.bf16 %v801_v36, %v799_v35 }
 0x112   :  { %1135 = vmatmul.bf16.gmra.mxu2 %v916_v37 }
 0x113   :  { %1304 = vmatmul.bf16.gmra.mxu3 %v917_v38  ;;  %v479_v40 = vpop.f32.mrf.mxu0 }
 0x114   :  { %v648_v41 = vpop.f32.mrf.mxu1  ;;  %v480_v42 = vadd.f32 %v479_v40, %v2296_v12 }
 0x115   :  { %v649_v43 = vadd.f32 %v648_v41, %v2298_v13 }
 0x116   :  { %518 = vmatmul.bf16.gmra.mxu0 %v1859_v39  ;;  %v802_v48 = vmax.f32 %v480_v42, 0.0 }
 0x117   :  { %687 = vmatmul.bf16.gmra.mxu1 %v1859_v39  ;;  %v803_v50 = vmax.f32 %v649_v43, 0.0 }
 0x11b   :  { %v481_v44 = vpop.f32.mrf.mxu0 }
 0x11c   :  { %v482_v45 = vadd.f32 %v481_v44, %v2296_v12  ;;  %v650_v46 = vpop.f32.mrf.mxu1 }
 0x11d   :  { %v651_v47 = vadd.f32 %v650_v46, %v2298_v13 }
 0x11e   :  { %v804_v49 = vmax.f32 %v482_v45, 0.0 }
 0x11f   :  { %v805_v51 = vmax.f32 %v651_v47, 0.0  ;;  %v1863_v47 = vld [vmem:[#allocation2 + $0x90] sm:$0xff] }
 0x120   :  { %v918_v52 = vpack.c.bf16 %v804_v49, %v802_v48 }
 0x121   :  { %v919_v53 = vpack.c.bf16 %v805_v51, %v803_v50 }
 0x122   :  { %1140 = vmatmul.bf16.gmra.mxu2 %v918_v52 }
 0x123   :  { %1309 = vmatmul.bf16.gmra.mxu3 %v919_v53  ;;  %v484_v55 = vpop.f32.mrf.mxu0 }
 0x124   :  { %v653_v56 = vpop.f32.mrf.mxu1  ;;  %v485_v57 = vadd.f32 %v484_v55, %v2296_v12 }
 0x125   :  { %v654_v58 = vadd.f32 %v653_v56, %v2298_v13 }
 0x126   :  { %523 = vmatmul.bf16.gmra.mxu0 %v1860_v54  ;;  %v806_v63 = vmax.f32 %v485_v57, 0.0 }
 0x127   :  { %692 = vmatmul.bf16.gmra.mxu1 %v1860_v54  ;;  %v807_v1 = vmax.f32 %v654_v58, 0.0 }
 0x12b   :  { %v486_v59 = vpop.f32.mrf.mxu0 }
 0x12c   :  { %v487_v60 = vadd.f32 %v486_v59, %v2296_v12  ;;  %v655_v61 = vpop.f32.mrf.mxu1 }
 0x12d   :  { %v656_v62 = vadd.f32 %v655_v61, %v2298_v13 }
 0x12e   :  { %v808_v0 = vmax.f32 %v487_v60, 0.0 }
 0x12f   :  { %v809_v2 = vmax.f32 %v656_v62, 0.0 }
 0x130   :  { %v920_v3 = vpack.c.bf16 %v808_v0, %v806_v63 }
 0x131   :  { %v921_v4 = vpack.c.bf16 %v809_v2, %v807_v1 }
 0x132   :  { %1145 = vmatmul.bf16.gmra.mxu2 %v920_v3 }
 0x133   :  { %1314 = vmatmul.bf16.gmra.mxu3 %v921_v4  ;;  %v489_v6 = vpop.f32.mrf.mxu0 }
 0x134   :  { %v658_v7 = vpop.f32.mrf.mxu1  ;;  %v490_v8 = vadd.f32 %v489_v6, %v2296_v12 }
 0x135   :  { %v659_v9 = vadd.f32 %v658_v7, %v2298_v13  ;;  %v1864_v7 = vld [vmem:[#allocation2 + $0x98] sm:$0xff] }
 0x136   :  { %528 = vmatmul.bf16.gmra.mxu0 %v1861_v5  ;;  %v810_v16 = vmax.f32 %v490_v8, 0.0 }
 0x137   :  { %697 = vmatmul.bf16.gmra.mxu1 %v1861_v5  ;;  %v811_v18 = vmax.f32 %v659_v9, 0.0 }
 0x13b   :  { %v491_v10 = vpop.f32.mrf.mxu0 }
 0x13c   :  { %v492_v11 = vadd.f32 %v491_v10, %v2296_v12  ;;  %v660_v14 = vpop.f32.mrf.mxu1 }
 0x13d   :  { %v661_v15 = vadd.f32 %v660_v14, %v2298_v13 }
 0x13e   :  { %v812_v17 = vmax.f32 %v492_v11, 0.0 }
 0x13f   :  { %v813_v19 = vmax.f32 %v661_v15, 0.0 }
 0x140   :  { %v922_v20 = vpack.c.bf16 %v812_v17, %v810_v16 }
 0x141   :  { %v923_v21 = vpack.c.bf16 %v813_v19, %v811_v18 }
 0x142   :  { %1150 = vmatmul.bf16.gmra.mxu2 %v922_v20 }
 0x143   :  { %1319 = vmatmul.bf16.gmra.mxu3 %v923_v21  ;;  %v494_v23 = vpop.f32.mrf.mxu0 }
 0x144   :  { %v663_v24 = vpop.f32.mrf.mxu1  ;;  %v495_v28 = vadd.f32 %v494_v23, %v2296_v12 }
 0x145   :  { %v1111_v25 = vpop.f32.mrf.mxu2  ;;  %v664_v29 = vadd.f32 %v663_v24, %v2298_v13 }
 0x146   :  { %v1280_v26 = vpop.f32.mrf.mxu3  ;;  %533 = vmatmul.bf16.gmra.mxu0 %v1862_v22  ;;  %v1112_v31 = vadd.f32 %v2339_v27, %v1111_v25  ;;  %v814_v36 = vmax.f32 %v495_v28, 0.0 }
 0x147   :  { %702 = vmatmul.bf16.gmra.mxu1 %v1862_v22  ;;  %v815_v40 = vmax.f32 %v664_v29, 0.0 }
 0x148   :  { %v1281_v42 = vadd.f32 %v1280_v26, %v1112_v31 }
 0x14b   :  { %v496_v30 = vpop.f32.mrf.mxu0 }
 0x14c   :  { %v497_v32 = vadd.f32 %v496_v30, %v2296_v12  ;;  %v665_v33 = vpop.f32.mrf.mxu1 }
 0x14d   :  { %v666_v34 = vadd.f32 %v665_v33, %v2298_v13  ;;  %v1113_v35 = vpop.f32.mrf.mxu2 }
 0x14e   :  { %v816_v37 = vmax.f32 %v497_v32, 0.0  ;;  %v1114_v38 = vadd.f32 %v2339_v27, %v1113_v35  ;;  %v1282_v39 = vpop.f32.mrf.mxu3 }
 0x14f   :  { %v817_v41 = vmax.f32 %v666_v34, 0.0  ;;  %v1865_v34 = vld [vmem:[#allocation2 + $0xa0] sm:$0xff] }
 0x150   :  { %v1283_v43 = vadd.f32 %v1282_v39, %v1114_v38  ;;  %v924_v44 = vpack.c.bf16 %v816_v37, %v814_v36 }
 0x151   :  { %v925_v45 = vpack.c.bf16 %v817_v41, %v815_v40 }
 0x152   :  { %v1912_v46 = vpack.c.bf16 %v1283_v43, %v1281_v42  ;;  %1155 = vmatmul.bf16.gmra.mxu2 %v924_v44 }
 0x153   :  { %1324 = vmatmul.bf16.gmra.mxu3 %v925_v45  ;;  %v499_v48 = vpop.f32.mrf.mxu0 }
 0x154   :  { %1913 = vst [vmem:[#allocation10] sm:$0xff] %v1912_v46   ;;  %v668_v49 = vpop.f32.mrf.mxu1  ;;  %v500_v52 = vadd.f32 %v499_v48, %v2296_v12 }
 0x155   :  { %v1116_v50 = vpop.f32.mrf.mxu2  ;;  %v669_v53 = vadd.f32 %v668_v49, %v2298_v13 }
 0x156   :  { %v1285_v51 = vpop.f32.mrf.mxu3  ;;  %538 = vmatmul.bf16.gmra.mxu0 %v1863_v47  ;;  %v1117_v55 = vadd.f32 %v2339_v27, %v1116_v50  ;;  %v818_v60 = vmax.f32 %v500_v52, 0.0 }
 0x157   :  { %707 = vmatmul.bf16.gmra.mxu1 %v1863_v47  ;;  %v819_v0 = vmax.f32 %v669_v53, 0.0 }
 0x158   :  { %v1286_v2 = vadd.f32 %v1285_v51, %v1117_v55 }
 0x15b   :  { %v501_v54 = vpop.f32.mrf.mxu0 }
 0x15c   :  { %v502_v56 = vadd.f32 %v501_v54, %v2296_v12  ;;  %v670_v57 = vpop.f32.mrf.mxu1 }
 0x15d   :  { %v671_v58 = vadd.f32 %v670_v57, %v2298_v13  ;;  %v1118_v59 = vpop.f32.mrf.mxu2 }
 0x15e   :  { %v820_v61 = vmax.f32 %v502_v56, 0.0  ;;  %v1119_v62 = vadd.f32 %v2339_v27, %v1118_v59  ;;  %v1287_v63 = vpop.f32.mrf.mxu3 }
 0x15f   :  { %v821_v1 = vmax.f32 %v671_v58, 0.0  ;;  %v1866_v58 = vld [vmem:[#allocation2 + $0xa8] sm:$0xff] }
 0x160   :  { %v1288_v3 = vadd.f32 %v1287_v63, %v1119_v62  ;;  %v926_v4 = vpack.c.bf16 %v820_v61, %v818_v60 }
 0x161   :  { %v927_v5 = vpack.c.bf16 %v821_v1, %v819_v0 }
 0x162   :  { %v1917_v6 = vpack.c.bf16 %v1288_v3, %v1286_v2  ;;  %1160 = vmatmul.bf16.gmra.mxu2 %v926_v4 }
 0x163   :  { %1329 = vmatmul.bf16.gmra.mxu3 %v927_v5  ;;  %v504_v8 = vpop.f32.mrf.mxu0 }
 0x164   :  { %2069 = vst [vmem:[#allocation10 + $0x8] sm:$0xff] %v1917_v6   ;;  %v673_v9 = vpop.f32.mrf.mxu1  ;;  %v505_v14 = vadd.f32 %v504_v8, %v2296_v12 }
 0x165   :  { %v1121_v10 = vpop.f32.mrf.mxu2  ;;  %v674_v15 = vadd.f32 %v673_v9, %v2298_v13 }
 0x166   :  { %v1290_v11 = vpop.f32.mrf.mxu3  ;;  %543 = vmatmul.bf16.gmra.mxu0 %v1864_v7  ;;  %v1122_v17 = vadd.f32 %v2339_v27, %v1121_v10  ;;  %v822_v22 = vmax.f32 %v505_v14, 0.0 }
 0x167   :  { %712 = vmatmul.bf16.gmra.mxu1 %v1864_v7  ;;  %v823_v26 = vmax.f32 %v674_v15, 0.0 }
 0x168   :  { %v1291_v29 = vadd.f32 %v1290_v11, %v1122_v17 }
 0x16b   :  { %v506_v16 = vpop.f32.mrf.mxu0 }
 0x16c   :  { %v507_v18 = vadd.f32 %v506_v16, %v2296_v12  ;;  %v675_v19 = vpop.f32.mrf.mxu1 }
 0x16d   :  { %v676_v20 = vadd.f32 %v675_v19, %v2298_v13  ;;  %v1123_v21 = vpop.f32.mrf.mxu2 }
 0x16e   :  { %v824_v23 = vmax.f32 %v507_v18, 0.0  ;;  %v1124_v24 = vadd.f32 %v2339_v27, %v1123_v21  ;;  %v1292_v25 = vpop.f32.mrf.mxu3 }
 0x16f   :  { %v825_v28 = vmax.f32 %v676_v20, 0.0  ;;  %v1867_v20 = vld [vmem:[#allocation2 + $0xb0] sm:$0xff] }
 0x170   :  { %v1293_v30 = vadd.f32 %v1292_v25, %v1124_v24  ;;  %v928_v31 = vpack.c.bf16 %v824_v23, %v822_v22 }
 0x171   :  { %v929_v32 = vpack.c.bf16 %v825_v28, %v823_v26 }
 0x172   :  { %v1922_v33 = vpack.c.bf16 %v1293_v30, %v1291_v29  ;;  %1165 = vmatmul.bf16.gmra.mxu2 %v928_v31 }
 0x173   :  { %1334 = vmatmul.bf16.gmra.mxu3 %v929_v32  ;;  %v509_v35 = vpop.f32.mrf.mxu0 }
 0x174   :  { %2070 = vst [vmem:[#allocation10 + $0x10] sm:$0xff] %v1922_v33   ;;  %v678_v36 = vpop.f32.mrf.mxu1  ;;  %v510_v39 = vadd.f32 %v509_v35, %v2296_v12 }
 0x175   :  { %v1126_v37 = vpop.f32.mrf.mxu2  ;;  %v679_v40 = vadd.f32 %v678_v36, %v2298_v13 }
 0x176   :  { %v1295_v38 = vpop.f32.mrf.mxu3  ;;  %548 = vmatmul.bf16.gmra.mxu0 %v1865_v34  ;;  %v1127_v42 = vadd.f32 %v2339_v27, %v1126_v37  ;;  %v826_v47 = vmax.f32 %v510_v39, 0.0 }
 0x177   :  { %717 = vmatmul.bf16.gmra.mxu1 %v1865_v34  ;;  %v827_v51 = vmax.f32 %v679_v40, 0.0 }
 0x178   :  { %v1296_v53 = vadd.f32 %v1295_v38, %v1127_v42 }
 0x17b   :  { %v511_v41 = vpop.f32.mrf.mxu0 }
 0x17c   :  { %v512_v43 = vadd.f32 %v511_v41, %v2296_v12  ;;  %v680_v44 = vpop.f32.mrf.mxu1 }
 0x17d   :  { %v681_v45 = vadd.f32 %v680_v44, %v2298_v13  ;;  %v1128_v46 = vpop.f32.mrf.mxu2 }
 0x17e   :  { %v828_v48 = vmax.f32 %v512_v43, 0.0  ;;  %v1129_v49 = vadd.f32 %v2339_v27, %v1128_v46  ;;  %v1297_v50 = vpop.f32.mrf.mxu3 }
 0x17f   :  { %v829_v52 = vmax.f32 %v681_v45, 0.0  ;;  %v1868_v45 = vld [vmem:[#allocation2 + $0xb8] sm:$0xff] }
 0x180   :  { %v1298_v54 = vadd.f32 %v1297_v50, %v1129_v49  ;;  %v930_v55 = vpack.c.bf16 %v828_v48, %v826_v47 }
 0x181   :  { %v931_v56 = vpack.c.bf16 %v829_v52, %v827_v51 }
 0x182   :  { %v1927_v57 = vpack.c.bf16 %v1298_v54, %v1296_v53  ;;  %1170 = vmatmul.bf16.gmra.mxu2 %v930_v55 }
 0x183   :  { %1339 = vmatmul.bf16.gmra.mxu3 %v931_v56  ;;  %v514_v59 = vpop.f32.mrf.mxu0 }
 0x184   :  { %2071 = vst [vmem:[#allocation10 + $0x18] sm:$0xff] %v1927_v57   ;;  %v683_v60 = vpop.f32.mrf.mxu1  ;;  %v515_v63 = vadd.f32 %v514_v59, %v2296_v12 }
 0x185   :  { %v1131_v61 = vpop.f32.mrf.mxu2  ;;  %v684_v0 = vadd.f32 %v683_v60, %v2298_v13 }
 0x186   :  { %v1300_v62 = vpop.f32.mrf.mxu3  ;;  %553 = vmatmul.bf16.gmra.mxu0 %v1866_v58  ;;  %v1132_v2 = vadd.f32 %v2339_v27, %v1131_v61  ;;  %v830_v7 = vmax.f32 %v515_v63, 0.0 }
 0x187   :  { %722 = vmatmul.bf16.gmra.mxu1 %v1866_v58  ;;  %v831_v11 = vmax.f32 %v684_v0, 0.0 }
 0x188   :  { %v1301_v15 = vadd.f32 %v1300_v62, %v1132_v2 }
 0x18b   :  { %v516_v1 = vpop.f32.mrf.mxu0 }
 0x18c   :  { %v517_v3 = vadd.f32 %v516_v1, %v2296_v12  ;;  %v685_v4 = vpop.f32.mrf.mxu1 }
 0x18d   :  { %v686_v5 = vadd.f32 %v685_v4, %v2298_v13  ;;  %v1133_v6 = vpop.f32.mrf.mxu2 }
 0x18e   :  { %v832_v8 = vmax.f32 %v517_v3, 0.0  ;;  %v1134_v9 = vadd.f32 %v2339_v27, %v1133_v6  ;;  %v1302_v10 = vpop.f32.mrf.mxu3 }
 0x18f   :  { %v833_v14 = vmax.f32 %v686_v5, 0.0  ;;  %v1869_v5 = vld [vmem:[#allocation2 + $0xc0] sm:$0xff] }
 0x190   :  { %v1303_v16 = vadd.f32 %v1302_v10, %v1134_v9  ;;  %v932_v17 = vpack.c.bf16 %v832_v8, %v830_v7 }
 0x191   :  { %v933_v18 = vpack.c.bf16 %v833_v14, %v831_v11 }
 0x192   :  { %v1932_v19 = vpack.c.bf16 %v1303_v16, %v1301_v15  ;;  %1175 = vmatmul.bf16.gmra.mxu2 %v932_v17 }
 0x193   :  { %1344 = vmatmul.bf16.gmra.mxu3 %v933_v18  ;;  %v519_v21 = vpop.f32.mrf.mxu0 }
 0x194   :  { %2072 = vst [vmem:[#allocation10 + $0x20] sm:$0xff] %v1932_v19   ;;  %v688_v22 = vpop.f32.mrf.mxu1  ;;  %v520_v25 = vadd.f32 %v519_v21, %v2296_v12 }
 0x195   :  { %v1136_v23 = vpop.f32.mrf.mxu2  ;;  %v689_v26 = vadd.f32 %v688_v22, %v2298_v13 }
 0x196   :  { %v1305_v24 = vpop.f32.mrf.mxu3  ;;  %558 = vmatmul.bf16.gmra.mxu0 %v1867_v20  ;;  %v1137_v29 = vadd.f32 %v2339_v27, %v1136_v23  ;;  %v834_v34 = vmax.f32 %v520_v25, 0.0 }
 0x197   :  { %727 = vmatmul.bf16.gmra.mxu1 %v1867_v20  ;;  %v835_v38 = vmax.f32 %v689_v26, 0.0 }
 0x198   :  { %v1306_v40 = vadd.f32 %v1305_v24, %v1137_v29 }
 0x19b   :  { %v521_v28 = vpop.f32.mrf.mxu0 }
 0x19c   :  { %v522_v30 = vadd.f32 %v521_v28, %v2296_v12  ;;  %v690_v31 = vpop.f32.mrf.mxu1 }
 0x19d   :  { %v691_v32 = vadd.f32 %v690_v31, %v2298_v13  ;;  %v1138_v33 = vpop.f32.mrf.mxu2 }
 0x19e   :  { %v836_v35 = vmax.f32 %v522_v30, 0.0  ;;  %v1139_v36 = vadd.f32 %v2339_v27, %v1138_v33  ;;  %v1307_v37 = vpop.f32.mrf.mxu3 }
 0x19f   :  { %v837_v39 = vmax.f32 %v691_v32, 0.0  ;;  %v1870_v32 = vld [vmem:[#allocation2 + $0xc8] sm:$0xff] }
 0x1a0   :  { %v1308_v41 = vadd.f32 %v1307_v37, %v1139_v36  ;;  %v934_v42 = vpack.c.bf16 %v836_v35, %v834_v34 }
 0x1a1   :  { %v935_v43 = vpack.c.bf16 %v837_v39, %v835_v38 }
 0x1a2   :  { %v1937_v44 = vpack.c.bf16 %v1308_v41, %v1306_v40  ;;  %1180 = vmatmul.bf16.gmra.mxu2 %v934_v42 }
 0x1a3   :  { %1349 = vmatmul.bf16.gmra.mxu3 %v935_v43  ;;  %v524_v46 = vpop.f32.mrf.mxu0 }
 0x1a4   :  { %2073 = vst [vmem:[#allocation10 + $0x28] sm:$0xff] %v1937_v44   ;;  %v693_v47 = vpop.f32.mrf.mxu1  ;;  %v525_v50 = vadd.f32 %v524_v46, %v2296_v12 }
 0x1a5   :  { %v1141_v48 = vpop.f32.mrf.mxu2  ;;  %v694_v51 = vadd.f32 %v693_v47, %v2298_v13 }
 0x1a6   :  { %v1310_v49 = vpop.f32.mrf.mxu3  ;;  %563 = vmatmul.bf16.gmra.mxu0 %v1868_v45  ;;  %v1142_v53 = vadd.f32 %v2339_v27, %v1141_v48  ;;  %v838_v58 = vmax.f32 %v525_v50, 0.0 }
 0x1a7   :  { %732 = vmatmul.bf16.gmra.mxu1 %v1868_v45  ;;  %v839_v62 = vmax.f32 %v694_v51, 0.0 }
 0x1a8   :  { %v1311_v0 = vadd.f32 %v1310_v49, %v1142_v53 }
 0x1ab   :  { %v526_v52 = vpop.f32.mrf.mxu0 }
 0x1ac   :  { %v527_v54 = vadd.f32 %v526_v52, %v2296_v12  ;;  %v695_v55 = vpop.f32.mrf.mxu1 }
 0x1ad   :  { %v696_v56 = vadd.f32 %v695_v55, %v2298_v13  ;;  %v1143_v57 = vpop.f32.mrf.mxu2 }
 0x1ae   :  { %v840_v59 = vmax.f32 %v527_v54, 0.0  ;;  %v1144_v60 = vadd.f32 %v2339_v27, %v1143_v57  ;;  %v1312_v61 = vpop.f32.mrf.mxu3 }
 0x1af   :  { %v841_v63 = vmax.f32 %v696_v56, 0.0  ;;  %v1871_v56 = vld [vmem:[#allocation2 + $0xd0] sm:$0xff] }
 0x1b0   :  { %v1313_v1 = vadd.f32 %v1312_v61, %v1144_v60  ;;  %v936_v2 = vpack.c.bf16 %v840_v59, %v838_v58 }
 0x1b1   :  { %v937_v3 = vpack.c.bf16 %v841_v63, %v839_v62 }
 0x1b2   :  { %v1942_v4 = vpack.c.bf16 %v1313_v1, %v1311_v0  ;;  %1185 = vmatmul.bf16.gmra.mxu2 %v936_v2 }
 0x1b3   :  { %1354 = vmatmul.bf16.gmra.mxu3 %v937_v3  ;;  %v529_v6 = vpop.f32.mrf.mxu0 }
 0x1b4   :  { %2074 = vst [vmem:[#allocation10 + $0x30] sm:$0xff] %v1942_v4   ;;  %v698_v7 = vpop.f32.mrf.mxu1  ;;  %v530_v10 = vadd.f32 %v529_v6, %v2296_v12 }
 0x1b5   :  { %v1146_v8 = vpop.f32.mrf.mxu2  ;;  %v699_v11 = vadd.f32 %v698_v7, %v2298_v13 }
 0x1b6   :  { %v1315_v9 = vpop.f32.mrf.mxu3  ;;  %568 = vmatmul.bf16.gmra.mxu0 %v1869_v5  ;;  %v1147_v15 = vadd.f32 %v2339_v27, %v1146_v8  ;;  %v842_v20 = vmax.f32 %v530_v10, 0.0 }
 0x1b7   :  { %737 = vmatmul.bf16.gmra.mxu1 %v1869_v5  ;;  %v843_v24 = vmax.f32 %v699_v11, 0.0 }
 0x1b8   :  { %v1316_v26 = vadd.f32 %v1315_v9, %v1147_v15 }
 0x1bb   :  { %v531_v14 = vpop.f32.mrf.mxu0 }
 0x1bc   :  { %v532_v16 = vadd.f32 %v531_v14, %v2296_v12  ;;  %v700_v17 = vpop.f32.mrf.mxu1 }
 0x1bd   :  { %v701_v18 = vadd.f32 %v700_v17, %v2298_v13  ;;  %v1148_v19 = vpop.f32.mrf.mxu2 }
 0x1be   :  { %v844_v21 = vmax.f32 %v532_v16, 0.0  ;;  %v1149_v22 = vadd.f32 %v2339_v27, %v1148_v19  ;;  %v1317_v23 = vpop.f32.mrf.mxu3 }
 0x1bf   :  { %v845_v25 = vmax.f32 %v701_v18, 0.0  ;;  %v1872_v18 = vld [vmem:[#allocation2 + $0xd8] sm:$0xff] }
 0x1c0   :  { %v1318_v28 = vadd.f32 %v1317_v23, %v1149_v22  ;;  %v938_v29 = vpack.c.bf16 %v844_v21, %v842_v20 }
 0x1c1   :  { %v939_v30 = vpack.c.bf16 %v845_v25, %v843_v24 }
 0x1c2   :  { %v1947_v31 = vpack.c.bf16 %v1318_v28, %v1316_v26  ;;  %1190 = vmatmul.bf16.gmra.mxu2 %v938_v29 }
 0x1c3   :  { %1359 = vmatmul.bf16.gmra.mxu3 %v939_v30  ;;  %v534_v33 = vpop.f32.mrf.mxu0 }
 0x1c4   :  { %2075 = vst [vmem:[#allocation10 + $0x38] sm:$0xff] %v1947_v31   ;;  %v703_v34 = vpop.f32.mrf.mxu1  ;;  %v535_v37 = vadd.f32 %v534_v33, %v2296_v12 }
 0x1c5   :  { %v1151_v35 = vpop.f32.mrf.mxu2  ;;  %v704_v38 = vadd.f32 %v703_v34, %v2298_v13 }
 0x1c6   :  { %v1320_v36 = vpop.f32.mrf.mxu3  ;;  %573 = vmatmul.bf16.gmra.mxu0 %v1870_v32  ;;  %v1152_v40 = vadd.f32 %v2339_v27, %v1151_v35  ;;  %v846_v45 = vmax.f32 %v535_v37, 0.0 }
 0x1c7   :  { %742 = vmatmul.bf16.gmra.mxu1 %v1870_v32  ;;  %v847_v49 = vmax.f32 %v704_v38, 0.0 }
 0x1c8   :  { %v1321_v51 = vadd.f32 %v1320_v36, %v1152_v40 }
 0x1cb   :  { %v536_v39 = vpop.f32.mrf.mxu0 }
 0x1cc   :  { %v537_v41 = vadd.f32 %v536_v39, %v2296_v12  ;;  %v705_v42 = vpop.f32.mrf.mxu1 }
 0x1cd   :  { %v706_v43 = vadd.f32 %v705_v42, %v2298_v13  ;;  %v1153_v44 = vpop.f32.mrf.mxu2 }
 0x1ce   :  { %v848_v46 = vmax.f32 %v537_v41, 0.0  ;;  %v1154_v47 = vadd.f32 %v2339_v27, %v1153_v44  ;;  %v1322_v48 = vpop.f32.mrf.mxu3 }
 0x1cf   :  { %v849_v50 = vmax.f32 %v706_v43, 0.0  ;;  %v1873_v43 = vld [vmem:[#allocation2 + $0xe0] sm:$0xff] }
 0x1d0   :  { %v1323_v52 = vadd.f32 %v1322_v48, %v1154_v47  ;;  %v940_v53 = vpack.c.bf16 %v848_v46, %v846_v45 }
 0x1d1   :  { %v941_v54 = vpack.c.bf16 %v849_v50, %v847_v49 }
 0x1d2   :  { %v1952_v55 = vpack.c.bf16 %v1323_v52, %v1321_v51  ;;  %1195 = vmatmul.bf16.gmra.mxu2 %v940_v53 }
 0x1d3   :  { %1364 = vmatmul.bf16.gmra.mxu3 %v941_v54  ;;  %v539_v57 = vpop.f32.mrf.mxu0 }
 0x1d4   :  { %2076 = vst [vmem:[#allocation10 + $0x40] sm:$0xff] %v1952_v55   ;;  %v708_v58 = vpop.f32.mrf.mxu1  ;;  %v540_v61 = vadd.f32 %v539_v57, %v2296_v12 }
 0x1d5   :  { %v1156_v59 = vpop.f32.mrf.mxu2  ;;  %v709_v62 = vadd.f32 %v708_v58, %v2298_v13 }
 0x1d6   :  { %v1325_v60 = vpop.f32.mrf.mxu3  ;;  %578 = vmatmul.bf16.gmra.mxu0 %v1871_v56  ;;  %v1157_v0 = vadd.f32 %v2339_v27, %v1156_v59  ;;  %v850_v5 = vmax.f32 %v540_v61, 0.0 }
 0x1d7   :  { %747 = vmatmul.bf16.gmra.mxu1 %v1871_v56  ;;  %v851_v9 = vmax.f32 %v709_v62, 0.0 }
 0x1d8   :  { %v1326_v11 = vadd.f32 %v1325_v60, %v1157_v0 }
 0x1db   :  { %v541_v63 = vpop.f32.mrf.mxu0 }
 0x1dc   :  { %v542_v1 = vadd.f32 %v541_v63, %v2296_v12  ;;  %v710_v2 = vpop.f32.mrf.mxu1 }
 0x1dd   :  { %v711_v3 = vadd.f32 %v710_v2, %v2298_v13  ;;  %v1158_v4 = vpop.f32.mrf.mxu2 }
 0x1de   :  { %v852_v6 = vmax.f32 %v542_v1, 0.0  ;;  %v1159_v7 = vadd.f32 %v2339_v27, %v1158_v4  ;;  %v1327_v8 = vpop.f32.mrf.mxu3 }
 0x1df   :  { %v853_v10 = vmax.f32 %v711_v3, 0.0  ;;  %v1874_v3 = vld [vmem:[#allocation2 + $0xe8] sm:$0xff] }
 0x1e0   :  { %v1328_v14 = vadd.f32 %v1327_v8, %v1159_v7  ;;  %v942_v15 = vpack.c.bf16 %v852_v6, %v850_v5 }
 0x1e1   :  { %v943_v16 = vpack.c.bf16 %v853_v10, %v851_v9 }
 0x1e2   :  { %v1957_v17 = vpack.c.bf16 %v1328_v14, %v1326_v11  ;;  %1200 = vmatmul.bf16.gmra.mxu2 %v942_v15 }
 0x1e3   :  { %1369 = vmatmul.bf16.gmra.mxu3 %v943_v16  ;;  %v544_v19 = vpop.f32.mrf.mxu0 }
 0x1e4   :  { %2077 = vst [vmem:[#allocation10 + $0x48] sm:$0xff] %v1957_v17   ;;  %v713_v20 = vpop.f32.mrf.mxu1  ;;  %v545_v23 = vadd.f32 %v544_v19, %v2296_v12 }
 0x1e5   :  { %v1161_v21 = vpop.f32.mrf.mxu2  ;;  %v714_v24 = vadd.f32 %v713_v20, %v2298_v13 }
 0x1e6   :  { %v1330_v22 = vpop.f32.mrf.mxu3  ;;  %583 = vmatmul.bf16.gmra.mxu0 %v1872_v18  ;;  %v1162_v26 = vadd.f32 %v2339_v27, %v1161_v21  ;;  %v854_v32 = vmax.f32 %v545_v23, 0.0 }
 0x1e7   :  { %752 = vmatmul.bf16.gmra.mxu1 %v1872_v18  ;;  %v855_v36 = vmax.f32 %v714_v24, 0.0 }
 0x1e8   :  { %v1331_v38 = vadd.f32 %v1330_v22, %v1162_v26 }
 0x1eb   :  { %v546_v25 = vpop.f32.mrf.mxu0 }
 0x1ec   :  { %v547_v28 = vadd.f32 %v546_v25, %v2296_v12  ;;  %v715_v29 = vpop.f32.mrf.mxu1 }
 0x1ed   :  { %v716_v30 = vadd.f32 %v715_v29, %v2298_v13  ;;  %v1163_v31 = vpop.f32.mrf.mxu2 }
 0x1ee   :  { %v856_v33 = vmax.f32 %v547_v28, 0.0  ;;  %v1164_v34 = vadd.f32 %v2339_v27, %v1163_v31  ;;  %v1332_v35 = vpop.f32.mrf.mxu3 }
 0x1ef   :  { %v857_v37 = vmax.f32 %v716_v30, 0.0  ;;  %v1875_v30 = vld [vmem:[#allocation2 + $0xf0] sm:$0xff] }
 0x1f0   :  { %v1333_v39 = vadd.f32 %v1332_v35, %v1164_v34  ;;  %v944_v40 = vpack.c.bf16 %v856_v33, %v854_v32 }
 0x1f1   :  { %v945_v41 = vpack.c.bf16 %v857_v37, %v855_v36 }
 0x1f2   :  { %v1962_v42 = vpack.c.bf16 %v1333_v39, %v1331_v38  ;;  %1205 = vmatmul.bf16.gmra.mxu2 %v944_v40 }
 0x1f3   :  { %1374 = vmatmul.bf16.gmra.mxu3 %v945_v41  ;;  %v549_v44 = vpop.f32.mrf.mxu0 }
 0x1f4   :  { %2078 = vst [vmem:[#allocation10 + $0x50] sm:$0xff] %v1962_v42   ;;  %v718_v45 = vpop.f32.mrf.mxu1  ;;  %v550_v48 = vadd.f32 %v549_v44, %v2296_v12 }
 0x1f5   :  { %v1166_v46 = vpop.f32.mrf.mxu2  ;;  %v719_v49 = vadd.f32 %v718_v45, %v2298_v13 }
 0x1f6   :  { %v1335_v47 = vpop.f32.mrf.mxu3  ;;  %588 = vmatmul.bf16.gmra.mxu0 %v1873_v43  ;;  %v1167_v51 = vadd.f32 %v2339_v27, %v1166_v46  ;;  %v858_v56 = vmax.f32 %v550_v48, 0.0 }
 0x1f7   :  { %757 = vmatmul.bf16.gmra.mxu1 %v1873_v43  ;;  %v859_v60 = vmax.f32 %v719_v49, 0.0 }
 0x1f8   :  { %v1336_v62 = vadd.f32 %v1335_v47, %v1167_v51 }
 0x1fb   :  { %v551_v50 = vpop.f32.mrf.mxu0 }
 0x1fc   :  { %v552_v52 = vadd.f32 %v551_v50, %v2296_v12  ;;  %v720_v53 = vpop.f32.mrf.mxu1 }
 0x1fd   :  { %v721_v54 = vadd.f32 %v720_v53, %v2298_v13  ;;  %v1168_v55 = vpop.f32.mrf.mxu2 }
 0x1fe   :  { %v860_v57 = vmax.f32 %v552_v52, 0.0  ;;  %v1169_v58 = vadd.f32 %v2339_v27, %v1168_v55  ;;  %v1337_v59 = vpop.f32.mrf.mxu3 }
 0x1ff   :  { %v861_v61 = vmax.f32 %v721_v54, 0.0  ;;  %v1876_v54 = vld [vmem:[#allocation2 + $0xf8] sm:$0xff] }
 0x200   :  { %v946_v63 = vpack.c.bf16 %v860_v57, %v858_v56  ;;  %v1338_v0 = vadd.f32 %v1337_v59, %v1169_v58 }
 0x201   :  { %v947_v1 = vpack.c.bf16 %v861_v61, %v859_v60 }
 0x202   :  { %v1967_v2 = vpack.c.bf16 %v1338_v0, %v1336_v62  ;;  %1210 = vmatmul.bf16.gmra.mxu2 %v946_v63 }
 0x203   :  { %1379 = vmatmul.bf16.gmra.mxu3 %v947_v1  ;;  %v554_v4 = vpop.f32.mrf.mxu0 }
 0x204   :  { %2079 = vst [vmem:[#allocation10 + $0x58] sm:$0xff] %v1967_v2   ;;  %v723_v5 = vpop.f32.mrf.mxu1  ;;  %v555_v8 = vadd.f32 %v554_v4, %v2296_v12 }
 0x205   :  { %v1171_v6 = vpop.f32.mrf.mxu2  ;;  %v724_v9 = vadd.f32 %v723_v5, %v2298_v13 }
 0x206   :  { %v1340_v7 = vpop.f32.mrf.mxu3  ;;  %593 = vmatmul.bf16.gmra.mxu0 %v1874_v3  ;;  %v1172_v11 = vadd.f32 %v2339_v27, %v1171_v6  ;;  %v862_v18 = vmax.f32 %v555_v8, 0.0 }
 0x207   :  { %762 = vmatmul.bf16.gmra.mxu1 %v1874_v3  ;;  %v863_v22 = vmax.f32 %v724_v9, 0.0 }
 0x208   :  { %v1341_v24 = vadd.f32 %v1340_v7, %v1172_v11 }
 0x20b   :  { %v556_v10 = vpop.f32.mrf.mxu0 }
 0x20c   :  { %v557_v14 = vadd.f32 %v556_v10, %v2296_v12  ;;  %v725_v15 = vpop.f32.mrf.mxu1 }
 0x20d   :  { %v726_v16 = vadd.f32 %v725_v15, %v2298_v13  ;;  %v1173_v17 = vpop.f32.mrf.mxu2 }
 0x20e   :  { %v864_v19 = vmax.f32 %v557_v14, 0.0  ;;  %v1174_v20 = vadd.f32 %v2339_v27, %v1173_v17  ;;  %v1342_v21 = vpop.f32.mrf.mxu3 }
 0x20f   :  { %v865_v23 = vmax.f32 %v726_v16, 0.0 }
 0x210   :  { %v948_v25 = vpack.c.bf16 %v864_v19, %v862_v18  ;;  %v1343_v26 = vadd.f32 %v1342_v21, %v1174_v20 }
 0x211   :  { %v949_v28 = vpack.c.bf16 %v865_v23, %v863_v22 }
 0x212   :  { %v1972_v29 = vpack.c.bf16 %v1343_v26, %v1341_v24  ;;  %1215 = vmatmul.bf16.gmra.mxu2 %v948_v25 }
 0x213   :  { %1384 = vmatmul.bf16.gmra.mxu3 %v949_v28  ;;  %v559_v31 = vpop.f32.mrf.mxu0 }
 0x214   :  { %2080 = vst [vmem:[#allocation10 + $0x60] sm:$0xff] %v1972_v29   ;;  %v728_v32 = vpop.f32.mrf.mxu1  ;;  %v560_v35 = vadd.f32 %v559_v31, %v2296_v12 }
 0x215   :  { %v1176_v33 = vpop.f32.mrf.mxu2  ;;  %v729_v36 = vadd.f32 %v728_v32, %v2298_v13 }
 0x216   :  { %v1345_v34 = vpop.f32.mrf.mxu3  ;;  %598 = vmatmul.bf16.gmra.mxu0 %v1875_v30  ;;  %v1177_v38 = vadd.f32 %v2339_v27, %v1176_v33  ;;  %v866_v43 = vmax.f32 %v560_v35, 0.0 }
 0x217   :  { %767 = vmatmul.bf16.gmra.mxu1 %v1875_v30  ;;  %v867_v47 = vmax.f32 %v729_v36, 0.0 }
 0x218   :  { %v1346_v49 = vadd.f32 %v1345_v34, %v1177_v38 }
 0x21b   :  { %v561_v37 = vpop.f32.mrf.mxu0 }
 0x21c   :  { %v562_v39 = vadd.f32 %v561_v37, %v2296_v12  ;;  %v730_v40 = vpop.f32.mrf.mxu1 }
 0x21d   :  { %v731_v41 = vadd.f32 %v730_v40, %v2298_v13  ;;  %v1178_v42 = vpop.f32.mrf.mxu2 }
 0x21e   :  { %v868_v44 = vmax.f32 %v562_v39, 0.0  ;;  %v1179_v45 = vadd.f32 %v2339_v27, %v1178_v42  ;;  %v1347_v46 = vpop.f32.mrf.mxu3 }
 0x21f   :  { %v869_v48 = vmax.f32 %v731_v41, 0.0 }
 0x220   :  { %v950_v50 = vpack.c.bf16 %v868_v44, %v866_v43  ;;  %v1348_v51 = vadd.f32 %v1347_v46, %v1179_v45 }
 0x221   :  { %v951_v52 = vpack.c.bf16 %v869_v48, %v867_v47 }
 0x222   :  { %v1977_v53 = vpack.c.bf16 %v1348_v51, %v1346_v49  ;;  %1220 = vmatmul.bf16.gmra.mxu2 %v950_v50 }
 0x223   :  { %1389 = vmatmul.bf16.gmra.mxu3 %v951_v52  ;;  %v564_v55 = vpop.f32.mrf.mxu0 }
 0x224   :  { %2081 = vst [vmem:[#allocation10 + $0x68] sm:$0xff] %v1977_v53   ;;  %v733_v56 = vpop.f32.mrf.mxu1  ;;  %v565_v59 = vadd.f32 %v564_v55, %v2296_v12 }
 0x225   :  { %v1181_v57 = vpop.f32.mrf.mxu2  ;;  %v734_v60 = vadd.f32 %v733_v56, %v2298_v13 }
 0x226   :  { %v1350_v58 = vpop.f32.mrf.mxu3  ;;  %603 = vmatmul.bf16.gmra.mxu0 %v1876_v54  ;;  %v1182_v62 = vadd.f32 %v2339_v27, %v1181_v57  ;;  %v870_v3 = vmax.f32 %v565_v59, 0.0 }
 0x227   :  { %772 = vmatmul.bf16.gmra.mxu1 %v1876_v54  ;;  %v871_v7 = vmax.f32 %v734_v60, 0.0 }
 0x228   :  { %v1351_v9 = vadd.f32 %v1350_v58, %v1182_v62 }
 0x22b   :  { %v566_v61 = vpop.f32.mrf.mxu0 }
 0x22c   :  { %v567_v63 = vadd.f32 %v566_v61, %v2296_v12  ;;  %v735_v0 = vpop.f32.mrf.mxu1 }
 0x22d   :  { %v736_v1 = vadd.f32 %v735_v0, %v2298_v13  ;;  %v1183_v2 = vpop.f32.mrf.mxu2 }
 0x22e   :  { %v872_v4 = vmax.f32 %v567_v63, 0.0  ;;  %v1184_v5 = vadd.f32 %v2339_v27, %v1183_v2  ;;  %v1352_v6 = vpop.f32.mrf.mxu3 }
 0x22f   :  { %v873_v8 = vmax.f32 %v736_v1, 0.0 }
 0x230   :  { %v952_v10 = vpack.c.bf16 %v872_v4, %v870_v3  ;;  %v1353_v11 = vadd.f32 %v1352_v6, %v1184_v5 }
 0x231   :  { %v953_v14 = vpack.c.bf16 %v873_v8, %v871_v7 }
 0x232   :  { %v1982_v15 = vpack.c.bf16 %v1353_v11, %v1351_v9  ;;  %1225 = vmatmul.bf16.gmra.mxu2 %v952_v10 }
 0x233   :  { %1394 = vmatmul.bf16.gmra.mxu3 %v953_v14  ;;  %v569_v16 = vpop.f32.mrf.mxu0 }
 0x234   :  { %2082 = vst [vmem:[#allocation10 + $0x70] sm:$0xff] %v1982_v15   ;;  %v738_v17 = vpop.f32.mrf.mxu1  ;;  %v570_v20 = vadd.f32 %v569_v16, %v2296_v12 }
 0x235   :  { %v1186_v18 = vpop.f32.mrf.mxu2  ;;  %v739_v21 = vadd.f32 %v738_v17, %v2298_v13 }
 0x236   :  { %v1355_v19 = vpop.f32.mrf.mxu3  ;;  %v1187_v23 = vadd.f32 %v2339_v27, %v1186_v18  ;;  %v874_v29 = vmax.f32 %v570_v20, 0.0 }
 0x237   :  { %v875_v33 = vmax.f32 %v739_v21, 0.0 }
 0x238   :  { %v1356_v35 = vadd.f32 %v1355_v19, %v1187_v23 }
 0x23b   :  { %v571_v22 = vpop.f32.mrf.mxu0 }
 0x23c   :  { %v572_v24 = vadd.f32 %v571_v22, %v2296_v12  ;;  %v740_v25 = vpop.f32.mrf.mxu1 }
 0x23d   :  { %v741_v26 = vadd.f32 %v740_v25, %v2298_v13  ;;  %v1188_v28 = vpop.f32.mrf.mxu2 }
 0x23e   :  { %v876_v30 = vmax.f32 %v572_v24, 0.0  ;;  %v1189_v31 = vadd.f32 %v2339_v27, %v1188_v28  ;;  %v1357_v32 = vpop.f32.mrf.mxu3 }
 0x23f   :  { %v877_v34 = vmax.f32 %v741_v26, 0.0 }
 0x240   :  { %v954_v36 = vpack.c.bf16 %v876_v30, %v874_v29  ;;  %v1358_v37 = vadd.f32 %v1357_v32, %v1189_v31  ;;  %v2454_v31 = vld [vmem:[%s2512_s4] ss:$0 sm:$0xff]  ;;  %s2247_s4 = smov [#allocation10]  }
 0x241   :  { %v955_v38 = vpack.c.bf16 %v877_v34, %v875_v33  ;;  %s1572_s17 = sshll.u32 %s2247_s4, 4  ;;  %s1573_s17 = int_to_ptr.vmem [resolvable:$true] %s1572_s17 }
 0x242   :  { %v1987_v39 = vpack.c.bf16 %v1358_v37, %v1356_v35  ;;  %1230 = vmatmul.bf16.gmra.mxu2 %v954_v36 }
 0x243   :  { %1399 = vmatmul.bf16.gmra.mxu3 %v955_v38  ;;  %v574_v40 = vpop.f32.mrf.mxu0 }
 0x244   :  { %2083 = vst [vmem:[#allocation10 + $0x78] sm:$0xff] %v1987_v39   ;;  %v743_v41 = vpop.f32.mrf.mxu1  ;;  %v575_v44 = vadd.f32 %v574_v40, %v2296_v12 }
 0x245   :  { %v1191_v42 = vpop.f32.mrf.mxu2  ;;  %v744_v45 = vadd.f32 %v743_v41, %v2298_v13 }
 0x246   :  { %v1360_v43 = vpop.f32.mrf.mxu3  ;;  %v1192_v47 = vadd.f32 %v2339_v27, %v1191_v42  ;;  %v878_v52 = vmax.f32 %v575_v44, 0.0 }
 0x247   :  { %v879_v56 = vmax.f32 %v744_v45, 0.0 }
 0x248   :  { %v1361_v58 = vadd.f32 %v1360_v43, %v1192_v47 }
 0x24b   :  { %v576_v46 = vpop.f32.mrf.mxu0 }
 0x24c   :  { %v577_v48 = vadd.f32 %v576_v46, %v2296_v12  ;;  %v745_v49 = vpop.f32.mrf.mxu1 }
 0x24d   :  { %v746_v50 = vadd.f32 %v745_v49, %v2298_v13  ;;  %v1193_v51 = vpop.f32.mrf.mxu2 }
 0x24e   :  { %v880_v53 = vmax.f32 %v577_v48, 0.0  ;;  %v1194_v54 = vadd.f32 %v2339_v27, %v1193_v51  ;;  %v1362_v55 = vpop.f32.mrf.mxu3 }
 0x24f   :  { %v881_v57 = vmax.f32 %v746_v50, 0.0 }
 0x250   :  { %v956_v59 = vpack.c.bf16 %v880_v53, %v878_v52  ;;  %v1363_v60 = vadd.f32 %v1362_v55, %v1194_v54 }
 0x251   :  { %v957_v61 = vpack.c.bf16 %v881_v57, %v879_v56 }
 0x252   :  { %v1992_v62 = vpack.c.bf16 %v1363_v60, %v1361_v58  ;;  %1235 = vmatmul.bf16.gmra.mxu2 %v956_v59 }
 0x253   :  { %1404 = vmatmul.bf16.gmra.mxu3 %v957_v61  ;;  %v579_v63 = vpop.f32.mrf.mxu0 }
 0x254   :  { %2084 = vst [vmem:[#allocation10 + $0x80] sm:$0xff] %v1992_v62   ;;  %v748_v0 = vpop.f32.mrf.mxu1  ;;  %v580_v3 = vadd.f32 %v579_v63, %v2296_v12 }
 0x255   :  { %v1196_v1 = vpop.f32.mrf.mxu2  ;;  %v749_v4 = vadd.f32 %v748_v0, %v2298_v13 }
 0x256   :  { %v1365_v2 = vpop.f32.mrf.mxu3  ;;  %v1197_v6 = vadd.f32 %v2339_v27, %v1196_v1  ;;  %v882_v11 = vmax.f32 %v580_v3, 0.0 }
 0x257   :  { %v883_v17 = vmax.f32 %v749_v4, 0.0 }
 0x258   :  { %v1366_v19 = vadd.f32 %v1365_v2, %v1197_v6 }
 0x25b   :  { %v581_v5 = vpop.f32.mrf.mxu0 }
 0x25c   :  { %v582_v7 = vadd.f32 %v581_v5, %v2296_v12  ;;  %v750_v8 = vpop.f32.mrf.mxu1 }
 0x25d   :  { %v751_v9 = vadd.f32 %v750_v8, %v2298_v13  ;;  %v1198_v10 = vpop.f32.mrf.mxu2 }
 0x25e   :  { %v884_v14 = vmax.f32 %v582_v7, 0.0  ;;  %v1199_v15 = vadd.f32 %v2339_v27, %v1198_v10  ;;  %v1367_v16 = vpop.f32.mrf.mxu3 }
 0x25f   :  { %v885_v18 = vmax.f32 %v751_v9, 0.0 }
 0x260   :  { %v958_v20 = vpack.c.bf16 %v884_v14, %v882_v11  ;;  %v1368_v21 = vadd.f32 %v1367_v16, %v1199_v15 }
 0x261   :  { %v959_v22 = vpack.c.bf16 %v885_v18, %v883_v17 }
 0x262   :  { %v1997_v23 = vpack.c.bf16 %v1368_v21, %v1366_v19  ;;  %1240 = vmatmul.bf16.gmra.mxu2 %v958_v20 }
 0x263   :  { %1409 = vmatmul.bf16.gmra.mxu3 %v959_v22  ;;  %v584_v24 = vpop.f32.mrf.mxu0 }
 0x264   :  { %2085 = vst [vmem:[#allocation10 + $0x88] sm:$0xff] %v1997_v23   ;;  %v753_v25 = vpop.f32.mrf.mxu1  ;;  %v585_v29 = vadd.f32 %v584_v24, %v2296_v12 }
 0x265   :  { %v1201_v26 = vpop.f32.mrf.mxu2  ;;  %v754_v30 = vadd.f32 %v753_v25, %v2298_v13 }
 0x266   :  { %v1370_v28 = vpop.f32.mrf.mxu3  ;;  %v1202_v32 = vadd.f32 %v2454_v31, %v1201_v26  ;;  %v886_v37 = vmax.f32 %v585_v29, 0.0 }
 0x267   :  { %v887_v41 = vmax.f32 %v754_v30, 0.0 }
 0x268   :  { %v1371_v43 = vadd.f32 %v1370_v28, %v1202_v32 }
 0x26b   :  { %v586_v27 = vpop.f32.mrf.mxu0 }
 0x26c   :  { %v587_v33 = vadd.f32 %v586_v27, %v2296_v12  ;;  %v755_v34 = vpop.f32.mrf.mxu1 }
 0x26d   :  { %v756_v35 = vadd.f32 %v755_v34, %v2298_v13  ;;  %v1203_v36 = vpop.f32.mrf.mxu2 }
 0x26e   :  { %v888_v38 = vmax.f32 %v587_v33, 0.0  ;;  %v1204_v39 = vadd.f32 %v2454_v31, %v1203_v36  ;;  %v1372_v40 = vpop.f32.mrf.mxu3 }
 0x26f   :  { %v889_v42 = vmax.f32 %v756_v35, 0.0 }
 0x270   :  { %v960_v44 = vpack.c.bf16 %v888_v38, %v886_v37  ;;  %v1373_v45 = vadd.f32 %v1372_v40, %v1204_v39 }
 0x271   :  { %v961_v46 = vpack.c.bf16 %v889_v42, %v887_v41 }
 0x272   :  { %v2002_v47 = vpack.c.bf16 %v1373_v45, %v1371_v43  ;;  %1245 = vmatmul.bf16.gmra.mxu2 %v960_v44 }
 0x273   :  { %1414 = vmatmul.bf16.gmra.mxu3 %v961_v46  ;;  %v589_v48 = vpop.f32.mrf.mxu0 }
 0x274   :  { %2086 = vst [vmem:[#allocation10 + $0x90] sm:$0xff] %v2002_v47   ;;  %v758_v49 = vpop.f32.mrf.mxu1  ;;  %v590_v52 = vadd.f32 %v589_v48, %v2296_v12 }
 0x275   :  { %v1206_v50 = vpop.f32.mrf.mxu2  ;;  %v759_v53 = vadd.f32 %v758_v49, %v2298_v13 }
 0x276   :  { %v1375_v51 = vpop.f32.mrf.mxu3  ;;  %v1207_v55 = vadd.f32 %v2454_v31, %v1206_v50  ;;  %v890_v60 = vmax.f32 %v590_v52, 0.0 }
 0x277   :  { %v891_v0 = vmax.f32 %v759_v53, 0.0 }
 0x278   :  { %v1376_v2 = vadd.f32 %v1375_v51, %v1207_v55 }
 0x27b   :  { %v591_v54 = vpop.f32.mrf.mxu0 }
 0x27c   :  { %v592_v56 = vadd.f32 %v591_v54, %v2296_v12  ;;  %v760_v57 = vpop.f32.mrf.mxu1 }
 0x27d   :  { %v761_v58 = vadd.f32 %v760_v57, %v2298_v13  ;;  %v1208_v59 = vpop.f32.mrf.mxu2 }
 0x27e   :  { %v892_v61 = vmax.f32 %v592_v56, 0.0  ;;  %v1209_v62 = vadd.f32 %v2454_v31, %v1208_v59  ;;  %v1377_v63 = vpop.f32.mrf.mxu3 }
 0x27f   :  { %v893_v1 = vmax.f32 %v761_v58, 0.0 }
 0x280   :  { %v962_v3 = vpack.c.bf16 %v892_v61, %v890_v60  ;;  %v1378_v4 = vadd.f32 %v1377_v63, %v1209_v62 }
 0x281   :  { %v963_v5 = vpack.c.bf16 %v893_v1, %v891_v0 }
 0x282   :  { %v2007_v6 = vpack.c.bf16 %v1378_v4, %v1376_v2  ;;  %1250 = vmatmul.bf16.gmra.mxu2 %v962_v3 }
 0x283   :  { %1419 = vmatmul.bf16.gmra.mxu3 %v963_v5  ;;  %v594_v7 = vpop.f32.mrf.mxu0 }
 0x284   :  { %2087 = vst [vmem:[#allocation10 + $0x98] sm:$0xff] %v2007_v6   ;;  %v763_v8 = vpop.f32.mrf.mxu1  ;;  %v595_v11 = vadd.f32 %v594_v7, %v2296_v12 }
 0x285   :  { %v1211_v9 = vpop.f32.mrf.mxu2  ;;  %v764_v14 = vadd.f32 %v763_v8, %v2298_v13 }
 0x286   :  { %v1380_v10 = vpop.f32.mrf.mxu3  ;;  %v1212_v16 = vadd.f32 %v2454_v31, %v1211_v9  ;;  %v894_v21 = vmax.f32 %v595_v11, 0.0 }
 0x287   :  { %v895_v25 = vmax.f32 %v764_v14, 0.0 }
 0x288   :  { %v1381_v28 = vadd.f32 %v1380_v10, %v1212_v16 }
 0x28b   :  { %v596_v15 = vpop.f32.mrf.mxu0 }
 0x28c   :  { %v597_v17 = vadd.f32 %v596_v15, %v2296_v12  ;;  %v765_v18 = vpop.f32.mrf.mxu1 }
 0x28d   :  { %v766_v19 = vadd.f32 %v765_v18, %v2298_v13  ;;  %v1213_v20 = vpop.f32.mrf.mxu2 }
 0x28e   :  { %v896_v22 = vmax.f32 %v597_v17, 0.0  ;;  %v1214_v23 = vadd.f32 %v2454_v31, %v1213_v20  ;;  %v1382_v24 = vpop.f32.mrf.mxu3 }
 0x28f   :  { %v897_v26 = vmax.f32 %v766_v19, 0.0 }
 0x290   :  { %v964_v29 = vpack.c.bf16 %v896_v22, %v894_v21  ;;  %v1383_v30 = vadd.f32 %v1382_v24, %v1214_v23 }
 0x291   :  { %v965_v27 = vpack.c.bf16 %v897_v26, %v895_v25 }
 0x292   :  { %v2012_v32 = vpack.c.bf16 %v1383_v30, %v1381_v28  ;;  %1255 = vmatmul.bf16.gmra.mxu2 %v964_v29 }
 0x293   :  { %1424 = vmatmul.bf16.gmra.mxu3 %v965_v27  ;;  %v599_v33 = vpop.f32.mrf.mxu0 }
 0x294   :  { %2088 = vst [vmem:[#allocation10 + $0xa0] sm:$0xff] %v2012_v32   ;;  %v768_v34 = vpop.f32.mrf.mxu1  ;;  %v600_v37 = vadd.f32 %v599_v33, %v2296_v12 }
 0x295   :  { %v1216_v35 = vpop.f32.mrf.mxu2  ;;  %v769_v38 = vadd.f32 %v768_v34, %v2298_v13 }
 0x296   :  { %v1385_v36 = vpop.f32.mrf.mxu3  ;;  %v1217_v40 = vadd.f32 %v2454_v31, %v1216_v35  ;;  %v898_v45 = vmax.f32 %v600_v37, 0.0 }
 0x297   :  { %v899_v49 = vmax.f32 %v769_v38, 0.0 }
 0x298   :  { %v1386_v51 = vadd.f32 %v1385_v36, %v1217_v40 }
 0x29b   :  { %v601_v39 = vpop.f32.mrf.mxu0 }
 0x29c   :  { %v602_v41 = vadd.f32 %v601_v39, %v2296_v12  ;;  %v770_v42 = vpop.f32.mrf.mxu1 }
 0x29d   :  { %v771_v43 = vadd.f32 %v770_v42, %v2298_v13  ;;  %v1218_v44 = vpop.f32.mrf.mxu2 }
 0x29e   :  { %v900_v46 = vmax.f32 %v602_v41, 0.0  ;;  %v1219_v47 = vadd.f32 %v2454_v31, %v1218_v44  ;;  %v1387_v48 = vpop.f32.mrf.mxu3 }
 0x29f   :  { %v901_v50 = vmax.f32 %v771_v43, 0.0 }
 0x2a0   :  { %v966_v52 = vpack.c.bf16 %v900_v46, %v898_v45  ;;  %v1388_v53 = vadd.f32 %v1387_v48, %v1219_v47 }
 0x2a1   :  { %v967_v54 = vpack.c.bf16 %v901_v50, %v899_v49 }
 0x2a2   :  { %v2017_v55 = vpack.c.bf16 %v1388_v53, %v1386_v51  ;;  %1260 = vmatmul.bf16.gmra.mxu2 %v966_v52 }
 0x2a3   :  { %1429 = vmatmul.bf16.gmra.mxu3 %v967_v54  ;;  %v604_v56 = vpop.f32.mrf.mxu0 }
 0x2a4   :  { %2089 = vst [vmem:[#allocation10 + $0xa8] sm:$0xff] %v2017_v55   ;;  %v773_v57 = vpop.f32.mrf.mxu1  ;;  %v605_v60 = vadd.f32 %v604_v56, %v2296_v12 }
 0x2a5   :  { %v1221_v58 = vpop.f32.mrf.mxu2  ;;  %v774_v61 = vadd.f32 %v773_v57, %v2298_v13 }
 0x2a6   :  { %v1390_v59 = vpop.f32.mrf.mxu3  ;;  %v1222_v63 = vadd.f32 %v2454_v31, %v1221_v58  ;;  %v902_v4 = vmax.f32 %v605_v60, 0.0 }
 0x2a7   :  { %v903_v8 = vmax.f32 %v774_v61, 0.0 }
 0x2a8   :  { %v1391_v10 = vadd.f32 %v1390_v59, %v1222_v63 }
 0x2ab   :  { %v606_v62 = vpop.f32.mrf.mxu0 }
 0x2ac   :  { %v607_v0 = vadd.f32 %v606_v62, %v2296_v12  ;;  %v775_v1 = vpop.f32.mrf.mxu1 }
 0x2ad   :  { %v776_v2 = vadd.f32 %v775_v1, %v2298_v13  ;;  %v1223_v3 = vpop.f32.mrf.mxu2 }
 0x2ae   :  { %v904_v5 = vmax.f32 %v607_v0, 0.0  ;;  %v1224_v6 = vadd.f32 %v2454_v31, %v1223_v3  ;;  %v1392_v7 = vpop.f32.mrf.mxu3 }
 0x2af   :  { %v905_v9 = vmax.f32 %v776_v2, 0.0 }
 0x2b0   :  { %v968_v11 = vpack.c.bf16 %v904_v5, %v902_v4  ;;  %v1393_v14 = vadd.f32 %v1392_v7, %v1224_v6 }
 0x2b1   :  { %v969_v15 = vpack.c.bf16 %v905_v9, %v903_v8 }
 0x2b2   :  { %v2022_v16 = vpack.c.bf16 %v1393_v14, %v1391_v10  ;;  %1265 = vmatmul.bf16.gmra.mxu2 %v968_v11 }
 0x2b3   :  { %1434 = vmatmul.bf16.gmra.mxu3 %v969_v15 }
 0x2b4   :  { %2090 = vst [vmem:[#allocation10 + $0xb0] sm:$0xff] %v2022_v16  }
 0x2b5   :  { %v1226_v12 = vpop.f32.mrf.mxu2 }
 0x2b6   :  { %v1395_v17 = vpop.f32.mrf.mxu3  ;;  %v1227_v13 = vadd.f32 %v2454_v31, %v1226_v12 }
 0x2b8   :  { %v1396_v21 = vadd.f32 %v1395_v17, %v1227_v13 }
 0x2bd   :  { %v1228_v18 = vpop.f32.mrf.mxu2 }
 0x2be   :  { %v1229_v19 = vadd.f32 %v2454_v31, %v1228_v18  ;;  %v1397_v20 = vpop.f32.mrf.mxu3 }
 0x2c0   :  { %v1398_v22 = vadd.f32 %v1397_v20, %v1229_v19 }
 0x2c2   :  { %v2027_v23 = vpack.c.bf16 %v1398_v22, %v1396_v21 }
 0x2c4   :  { %2091 = vst [vmem:[#allocation10 + $0xb8] sm:$0xff] %v2027_v23  }
 0x2c5   :  { %v1231_v24 = vpop.f32.mrf.mxu2 }
 0x2c6   :  { %v1400_v25 = vpop.f32.mrf.mxu3  ;;  %v1232_v26 = vadd.f32 %v2454_v31, %v1231_v24 }
 0x2c8   :  { %v1401_v27 = vadd.f32 %v1400_v25, %v1232_v26 }
 0x2cd   :  { %v1233_v28 = vpop.f32.mrf.mxu2 }
 0x2ce   :  { %v1234_v29 = vadd.f32 %v2454_v31, %v1233_v28  ;;  %v1402_v30 = vpop.f32.mrf.mxu3 }
 0x2d0   :  { %v1403_v32 = vadd.f32 %v1402_v30, %v1234_v29 }
 0x2d2   :  { %v2032_v33 = vpack.c.bf16 %v1403_v32, %v1401_v27 }
 0x2d4   :  { %2092 = vst [vmem:[#allocation10 + $0xc0] sm:$0xff] %v2032_v33  }
 0x2d5   :  { %v1236_v34 = vpop.f32.mrf.mxu2 }
 0x2d6   :  { %v1405_v35 = vpop.f32.mrf.mxu3  ;;  %v1237_v36 = vadd.f32 %v2454_v31, %v1236_v34 }
 0x2d8   :  { %v1406_v40 = vadd.f32 %v1405_v35, %v1237_v36 }
 0x2dd   :  { %v1238_v37 = vpop.f32.mrf.mxu2 }
 0x2de   :  { %v1239_v38 = vadd.f32 %v2454_v31, %v1238_v37  ;;  %v1407_v39 = vpop.f32.mrf.mxu3 }
 0x2e0   :  { %v1408_v41 = vadd.f32 %v1407_v39, %v1239_v38 }
 0x2e2   :  { %v2037_v42 = vpack.c.bf16 %v1408_v41, %v1406_v40 }
 0x2e4   :  { %2093 = vst [vmem:[#allocation10 + $0xc8] sm:$0xff] %v2037_v42  }
 0x2e5   :  { %v1241_v43 = vpop.f32.mrf.mxu2 }
 0x2e6   :  { %v1410_v44 = vpop.f32.mrf.mxu3  ;;  %v1242_v45 = vadd.f32 %v2454_v31, %v1241_v43 }
 0x2e8   :  { %v1411_v49 = vadd.f32 %v1410_v44, %v1242_v45 }
 0x2ed   :  { %v1243_v46 = vpop.f32.mrf.mxu2 }
 0x2ee   :  { %v1244_v47 = vadd.f32 %v2454_v31, %v1243_v46  ;;  %v1412_v48 = vpop.f32.mrf.mxu3 }
 0x2f0   :  { %v1413_v50 = vadd.f32 %v1412_v48, %v1244_v47 }
 0x2f2   :  { %v2042_v51 = vpack.c.bf16 %v1413_v50, %v1411_v49 }
 0x2f4   :  { %2094 = vst [vmem:[#allocation10 + $0xd0] sm:$0xff] %v2042_v51  }
 0x2f5   :  { %v1246_v52 = vpop.f32.mrf.mxu2 }
 0x2f6   :  { %v1415_v53 = vpop.f32.mrf.mxu3  ;;  %v1247_v54 = vadd.f32 %v2454_v31, %v1246_v52 }
 0x2f8   :  { %v1416_v58 = vadd.f32 %v1415_v53, %v1247_v54 }
 0x2fd   :  { %v1248_v55 = vpop.f32.mrf.mxu2 }
 0x2fe   :  { %v1249_v56 = vadd.f32 %v2454_v31, %v1248_v55  ;;  %v1417_v57 = vpop.f32.mrf.mxu3 }
 0x300   :  { %v1418_v59 = vadd.f32 %v1417_v57, %v1249_v56 }
 0x302   :  { %v2047_v60 = vpack.c.bf16 %v1418_v59, %v1416_v58 }
 0x304   :  { %2095 = vst [vmem:[#allocation10 + $0xd8] sm:$0xff] %v2047_v60  }
 0x305   :  { %v1251_v61 = vpop.f32.mrf.mxu2 }
 0x306   :  { %v1420_v62 = vpop.f32.mrf.mxu3  ;;  %v1252_v63 = vadd.f32 %v2454_v31, %v1251_v61 }
 0x308   :  { %v1421_v3 = vadd.f32 %v1420_v62, %v1252_v63 }
 0x30d   :  { %v1253_v0 = vpop.f32.mrf.mxu2 }
 0x30e   :  { %v1254_v1 = vadd.f32 %v2454_v31, %v1253_v0  ;;  %v1422_v2 = vpop.f32.mrf.mxu3 }
 0x310   :  { %v1423_v4 = vadd.f32 %v1422_v2, %v1254_v1 }
 0x312   :  { %v2052_v5 = vpack.c.bf16 %v1423_v4, %v1421_v3 }
 0x314   :  { %2096 = vst [vmem:[#allocation10 + $0xe0] sm:$0xff] %v2052_v5  }
 0x315   :  { %v1256_v6 = vpop.f32.mrf.mxu2 }
 0x316   :  { %v1425_v7 = vpop.f32.mrf.mxu3  ;;  %v1257_v8 = vadd.f32 %v2454_v31, %v1256_v6 }
 0x318   :  { %v1426_v14 = vadd.f32 %v1425_v7, %v1257_v8 }
 0x31d   :  { %v1258_v9 = vpop.f32.mrf.mxu2 }
 0x31e   :  { %v1259_v10 = vadd.f32 %v2454_v31, %v1258_v9  ;;  %v1427_v11 = vpop.f32.mrf.mxu3 }
 0x320   :  { %v1428_v15 = vadd.f32 %v1427_v11, %v1259_v10 }
 0x322   :  { %v2057_v16 = vpack.c.bf16 %v1428_v15, %v1426_v14 }
 0x324   :  { %2097 = vst [vmem:[#allocation10 + $0xe8] sm:$0xff] %v2057_v16  }
 0x325   :  { %v1261_v12 = vpop.f32.mrf.mxu2 }
 0x326   :  { %v1430_v17 = vpop.f32.mrf.mxu3  ;;  %v1262_v13 = vadd.f32 %v2454_v31, %v1261_v12 }
 0x328   :  { %v1431_v21 = vadd.f32 %v1430_v17, %v1262_v13 }
 0x32d   :  { %v1263_v18 = vpop.f32.mrf.mxu2 }
 0x32e   :  { %v1264_v19 = vadd.f32 %v2454_v31, %v1263_v18  ;;  %v1432_v20 = vpop.f32.mrf.mxu3 }
 0x330   :  { %v1433_v22 = vadd.f32 %v1432_v20, %v1264_v19 }
 0x332   :  { %v2062_v23 = vpack.c.bf16 %v1433_v22, %v1431_v21 }
 0x334   :  { %2098 = vst [vmem:[#allocation10 + $0xf0] sm:$0xff] %v2062_v23  }
 0x335   :  { %v1266_v24 = vpop.f32.mrf.mxu2 }
 0x336   :  { %v1435_v25 = vpop.f32.mrf.mxu3  ;;  %v1267_v26 = vadd.f32 %v2454_v31, %v1266_v24 }
 0x338   :  { %v1436_v27 = vadd.f32 %v1435_v25, %v1267_v26 }
 0x33d   :  { %v1268_v28 = vpop.f32.mrf.mxu2 }
 0x33e   :  { %v1269_v29 = vadd.f32 %v2454_v31, %v1268_v28  ;;  %v1437_v30 = vpop.f32.mrf.mxu3 }
 0x340   :  { %v1438_v32 = vadd.f32 %v1437_v30, %v1269_v29 }
 0x342   :  { %v2067_v33 = vpack.c.bf16 %v1438_v32, %v1436_v27 }
 0x344   :  { %2099 = vst [vmem:[#allocation10 + $0xf8] sm:$0xff] %v2067_v33  }
 0x345   :  { %1580 = dma.vmem_to_hbm [thread:$0]  %s1573_s17, 4096, %s1575_s20, [#allocation4], %s2243_s30, %s2243_s30, %s2244_s6  }
 0x346   :  { %2237 = dma.done.wait [#allocation4], 4096  }
 0x347   :  { %2238 = vsyncadd [#allocation4], 4294963200 }
 0x348   :  { %1585 = vsyncpa [#allocation3], 1 }
 0x349   :  { %1586 = vsyncpa [#allocation6], 1 }
 0x34a   :  { %1587 = vsyncpa [#allocation9], 1 }
 0x34b   :  { %1588 = vsyncpa [#allocation4], 1 }

// kernel: tpu_custom_call.1
= control target key start
LH: loop header
LB: loop body
LE: loop exit
PB: predicated region body
PF: predicated region fallthrough
CT: control target
= control target key end

     0   :  { %10 = vsyncpa [#allocation3], 0  ;;  %s2508_s0 = inlined_call_operand.hbm [shape: bf16[512,128], index: 0, kind: input, shape index: {}]   ;;  %s2509_s1 = inlined_call_operand.hbm [shape: bf16[128,256], index: 1, kind: input, shape index: {}]   ;;  %s2510_s2 = inlined_call_operand.hbm [shape: f32[1,256], index: 2, kind: input, shape index: {}]   ;;  %s2511_s3 = inlined_call_operand.hbm [shape: bf16[256,128], index: 3, kind: input, shape index: {}]   ;;  %s2512_s4 = inlined_call_operand.vmem [shape: f32[1,128], index: 4, kind: input, shape index: {}]   ;;  %s2513_s5 = inlined_call_operand.hbm [shape: bf16[512,128], index: 5, kind: output, shape index: {}]  }
   0x1   :  { %11 = vsyncpa [#allocation6], 0 }
   0x2   :  { %12 = vsyncpa [#allocation9], 0  ;;  %s31_s20 = sshll.u32 %s2509_s1, 4  ;;  %s32_s20 = int_to_ptr.hbm [resolvable:$true] %s31_s20 }
   0x3   :  { %13 = vsyncpa [#allocation4], 0  ;;  %s2239_s21 = smov [#allocation5]   ;;  %s18_s25 = sshll.u32 %s2508_s0, 4  ;;  %s19_s25 = int_to_ptr.hbm [resolvable:$true] %s18_s25 }
   0x4   :  { %s33_s22 = sshll.u32 %s2239_s21, 4  ;;  %s2240_s26 = smov 128   ;;  %s34_s22 = int_to_ptr.vmem [resolvable:$true] %s33_s22 }
   0x5   :  { %s2241_s27 = smov 8   ;;  %s2242_s28 = smov [#allocation2]  }
   0x6   :  { %39 = dma.hbm_to_vmem [thread:$0]  %s32_s20, 2048, %s34_s22, [#allocation6], %s2240_s26, %s2240_s26, %s2241_s27  }
   0x7   :  { %s20_s29 = sshll.u32 %s2242_s28, 4  ;;  %s2243_s30 = smov 64   ;;  %s21_s29 = int_to_ptr.vmem [resolvable:$true] %s20_s29 }
   0x8   :  { %s2244_s6 = smov 4   ;;  %s45_s8 = sshll.u32 %s2510_s2, 4  ;;  %s46_s8 = int_to_ptr.hbm [resolvable:$true] %s45_s8 }
   0x9   :  { %26 = dma.hbm_to_vmem [thread:$0]  %s19_s25, 4096, %s21_s29, [#allocation3], %s2243_s30, %s2243_s30, %s2244_s6  }
   0xa   :  { %s2245_s9 = smov [#allocation7]   ;;  %s55_s12 = sshll.u32 %s2511_s3, 4  ;;  %s56_s12 = int_to_ptr.hbm [resolvable:$true] %s55_s12 }
   0xb   :  { %s47_s0 = sshll.u32 %s2245_s9, 4  ;;  %s2246_s13 = smov [#allocation8]   ;;  %s48_s0 = int_to_ptr.vmem [resolvable:$true] %s47_s0 }
   0xc   :  { %50 = dma.hbm_to_vmem [thread:$0]  %s46_s8, 32, %s48_s0, [#allocation6]  }
   0xd   :  { %s57_s14 = sshll.u32 %s2246_s13, 4  ;;  %s58_s14 = int_to_ptr.vmem [resolvable:$true] %s57_s14 }
   0xe   :  { %63 = dma.hbm_to_vmem [thread:$0]  %s56_s12, 2048, %s58_s14, [#allocation9], %s2243_s30, %s2243_s30, %s2244_s6  }
   0xf   :  { %2231 = dma.done.wait [#allocation3], 4096  }
  0x10   :  { %2232 = vsyncadd [#allocation3], 4294963200 }
  0x11   :  { %2233 = dma.done.wait [#allocation6], 2080  }
  0x12   :  { %2234 = vsyncadd [#allocation6], 4294965216 }
  0x13   :  { %2235 = dma.done.wait [#allocation9], 2048  }
  0x14   :  { %2236 = vsyncadd [#allocation9], 4294965248  ;;  %v1775_v0 = vld [vmem:[#allocation5 + $0x70] sm:$0xf]  ;;  %v1892_v1 = vld [vmem:[#allocation5 + $0x74] sm:$0xf0] }
  0x15   :  { %v1891_v2 = vld [vmem:[#allocation5 + $0x74] sm:$0xf]  ;;  %v1776_v3 = vor.u32 %v1892_v1, %v1775_v0  ;;  %v1777_v4 = vld [vmem:[#allocation5 + $0x78] sm:$0xf0]  ;;  %v1767_v5 = vld [vmem:[#allocation5 + $0x60] sm:$0xf] }
  0x16   :  { %v1890_v6 = vld [vmem:[#allocation5 + $0x64] sm:$0xf0]  ;;  %v1780_v7 = vor.u32 %v1891_v2, %v1777_v4  ;;  %v1889_v8 = vld [vmem:[#allocation5 + $0x64] sm:$0xf]  ;;  %v1769_v9 = vld [vmem:[#allocation5 + $0x68] sm:$0xf0] }
  0x17   :  { %440 = vmatpush.bf16.msra.mxu0 %v1776_v3  ;;  %v1768_v10 = vor.u32 %v1890_v6, %v1767_v5  ;;  %v1772_v11 = vor.u32 %v1889_v8, %v1769_v9  ;;  %v1759_v12 = vld [vmem:[#allocation5 + $0x50] sm:$0xf]  ;;  %v1888_v13 = vld [vmem:[#allocation5 + $0x54] sm:$0xf0]  ;;  %v1887_v14 = vld [vmem:[#allocation5 + $0x54] sm:$0xf] }
  0x18   :  { %609 = vmatpush.bf16.msra.mxu1 %v1780_v7  ;;  %v1761_v15 = vld [vmem:[#allocation5 + $0x58] sm:$0xf0]  ;;  %v1760_v16 = vor.u32 %v1888_v13, %v1759_v12  ;;  %v1751_v18 = vld [vmem:[#allocation5 + $0x40] sm:$0xf]  ;;  %v1886_v19 = vld [vmem:[#allocation5 + $0x44] sm:$0xf0] }
  0x19   :  { %v1764_v17 = vor.u32 %v1887_v14, %v1761_v15  ;;  %v1885_v20 = vld [vmem:[#allocation5 + $0x44] sm:$0xf]  ;;  %v1753_v21 = vld [vmem:[#allocation5 + $0x48] sm:$0xf0]  ;;  %v1752_v22 = vor.u32 %v1886_v19, %v1751_v18  ;;  %v1743_v24 = vld [vmem:[#allocation5 + $0x30] sm:$0xf] }
  0x1a   :  { %v1756_v23 = vor.u32 %v1885_v20, %v1753_v21  ;;  %v1884_v25 = vld [vmem:[#allocation5 + $0x34] sm:$0xf0]  ;;  %v1883_v26 = vld [vmem:[#allocation5 + $0x34] sm:$0xf]  ;;  %v1745_v27 = vld [vmem:[#allocation5 + $0x38] sm:$0xf0] }
  0x1b   :  { %441 = vmatpush.bf16.msra.mxu0 %v1768_v10  ;;  %v1744_v28 = vor.u32 %v1884_v25, %v1743_v24  ;;  %v1748_v29 = vor.u32 %v1883_v26, %v1745_v27  ;;  %v1735_v30 = vld [vmem:[#allocation5 + $0x20] sm:$0xf]  ;;  %v1882_v31 = vld [vmem:[#allocation5 + $0x24] sm:$0xf0]  ;;  %v1881_v32 = vld [vmem:[#allocation5 + $0x24] sm:$0xf] }
  0x1c   :  { %610 = vmatpush.bf16.msra.mxu1 %v1772_v11  ;;  %v1737_v33 = vld [vmem:[#allocation5 + $0x28] sm:$0xf0]  ;;  %v1736_v34 = vor.u32 %v1882_v31, %v1735_v30  ;;  %v1727_v36 = vld [vmem:[#allocation5 + $0x10] sm:$0xf]  ;;  %v1880_v37 = vld [vmem:[#allocation5 + $0x14] sm:$0xf0] }
  0x1d   :  { %v1740_v35 = vor.u32 %v1881_v32, %v1737_v33  ;;  %v1879_v38 = vld [vmem:[#allocation5 + $0x14] sm:$0xf]  ;;  %v1729_v39 = vld [vmem:[#allocation5 + $0x18] sm:$0xf0]  ;;  %v1728_v40 = vor.u32 %v1880_v37, %v1727_v36  ;;  %v1719_v42 = vld [vmem:[#allocation5] sm:$0xf] }
  0x1e   :  { %v1732_v41 = vor.u32 %v1879_v38, %v1729_v39  ;;  %v1878_v43 = vld [vmem:[#allocation5 + $0x4] sm:$0xf0]  ;;  %v1877_v44 = vld [vmem:[#allocation5 + $0x4] sm:$0xf]  ;;  %v1721_v45 = vld [vmem:[#allocation5 + $0x8] sm:$0xf0] }
  0x1f   :  { %442 = vmatpush.bf16.msra.mxu0 %v1760_v16  ;;  %v1720_v46 = vor.u32 %v1878_v43, %v1719_v42  ;;  %v1724_v47 = vor.u32 %v1877_v44, %v1721_v45  ;;  %v1845_v48 = vld [vmem:[#allocation2] sm:$0xff]  ;;  %v1846_v49 = vld [vmem:[#allocation2 + $0x8] sm:$0xff]  ;;  %v1847_v50 = vld [vmem:[#allocation2 + $0x10] sm:$0xff]  ;;  %s1574_s20 = sshll.u32 %s2513_s5, 4  ;;  %s1575_s20 = int_to_ptr.hbm [resolvable:$true] %s1574_s20 }
  0x20   :  { %611 = vmatpush.bf16.msra.mxu1 %v1764_v17  ;;  %v1848_v51 = vld [vmem:[#allocation2 + $0x18] sm:$0xff]  ;;  %v1849_v52 = vld [vmem:[#allocation2 + $0x20] sm:$0xff]  ;;  %v1850_v55 = vld [vmem:[#allocation2 + $0x28] sm:$0xff] }
  0x21   :  { %v1900_v53 = vld [vmem:[#allocation8 + $0x38] sm:$0xff]  ;;  %v1899_v56 = vld [vmem:[#allocation8 + $0x30] sm:$0xff]  ;;  %v1898_v58 = vld [vmem:[#allocation8 + $0x28] sm:$0xff] }
  0x22   :  { %v1908_v54 = vld [vmem:[#allocation8 + $0x78] sm:$0xff]  ;;  %1102 = vmatpush.bf16.msra.mxu2 %v1900_v53  ;;  %v1907_v57 = vld [vmem:[#allocation8 + $0x70] sm:$0xff]  ;;  %v1906_v59 = vld [vmem:[#allocation8 + $0x68] sm:$0xff] }
  0x23   :  { %443 = vmatpush.bf16.msra.mxu0 %v1752_v22  ;;  %1271 = vmatpush.bf16.msra.mxu3 %v1908_v54  ;;  %v1897_v60 = vld [vmem:[#allocation8 + $0x20] sm:$0xff]  ;;  %v1851_v62 = vld [vmem:[#allocation2 + $0x30] sm:$0xff]  ;;  %v1896_v63 = vld [vmem:[#allocation8 + $0x18] sm:$0xff] }
  0x24   :  { %612 = vmatpush.bf16.msra.mxu1 %v1756_v23  ;;  %v1905_v61 = vld [vmem:[#allocation8 + $0x60] sm:$0xff]  ;;  %v1904_v0 = vld [vmem:[#allocation8 + $0x58] sm:$0xff]  ;;  %v1895_v1 = vld [vmem:[#allocation8 + $0x10] sm:$0xff] }
  0x25   :  { %v1903_v2 = vld [vmem:[#allocation8 + $0x50] sm:$0xff]  ;;  %v1894_v3 = vld [vmem:[#allocation8 + $0x8] sm:$0xff]  ;;  %v1893_v5 = vld [vmem:[#allocation8] sm:$0xff] }
  0x26   :  { %1103 = vmatpush.bf16.msra.mxu2 %v1899_v56  ;;  %v1902_v4 = vld [vmem:[#allocation8 + $0x48] sm:$0xff]  ;;  %v1901_v6 = vld [vmem:[#allocation8 + $0x40] sm:$0xff]  ;;  %v1852_v7 = vld [vmem:[#allocation2 + $0x38] sm:$0xff] }
  0x27   :  { %444 = vmatpush.bf16.msra.mxu0 %v1744_v28  ;;  %1272 = vmatpush.bf16.msra.mxu3 %v1907_v57  ;;  %v1853_v8 = vld [vmem:[#allocation2 + $0x40] sm:$0xff]  ;;  %v1854_v26 = vld [vmem:[#allocation2 + $0x48] sm:$0xff]  ;;  %v1856_v56 = vld [vmem:[#allocation2 + $0x58] sm:$0xff] }
  0x28   :  { %613 = vmatpush.bf16.msra.mxu1 %v1748_v29  ;;  %v162_v9 = vld [vmem:[#allocation7] sm:$0x3] }
  0x29   :  { %v2296_v12 = vperm.slane %v162_v9, 0  ;;  %v2298_v13 = vperm.slane %v162_v9, 1 }
  0x2a   :  { %1104 = vmatpush.bf16.msra.mxu2 %v1898_v58 }
  0x2b   :  { %445 = vmatpush.bf16.msra.mxu0 %v1736_v34  ;;  %1273 = vmatpush.bf16.msra.mxu3 %v1906_v59 }
  0x2c   :  { %614 = vmatpush.bf16.msra.mxu1 %v1740_v35 }
  0x2e   :  { %1105 = vmatpush.bf16.msra.mxu2 %v1897_v60 }
  0x2f   :  { %446 = vmatpush.bf16.msra.mxu0 %v1728_v40  ;;  %1274 = vmatpush.bf16.msra.mxu3 %v1905_v61 }
  0x30   :  { %615 = vmatpush.bf16.msra.mxu1 %v1732_v41  ;;  %v1855_v41 = vld [vmem:[#allocation2 + $0x50] sm:$0xff] }
  0x32   :  { %1106 = vmatpush.bf16.msra.mxu2 %v1896_v63 }
  0x33   :  { %447 = vmatpush.bf16.msra.mxu0 %v1720_v46  ;;  %1275 = vmatpush.bf16.msra.mxu3 %v1904_v0 }
  0x34   :  { %616 = vmatpush.bf16.msra.mxu1 %v1724_v47 }
  0x36   :  { %448 = vmatmul.bf16.vlgmr.msra.gmra.mxu0 %v1845_v48  ;;  %1107 = vmatpush.bf16.msra.mxu2 %v1895_v1 }
  0x37   :  { %617 = vmatmul.bf16.vlgmr.msra.gmra.mxu1 %v1845_v48  ;;  %1276 = vmatpush.bf16.msra.mxu3 %v1903_v2 }
  0x3a   :  { %1108 = vmatpush.bf16.msra.mxu2 %v1894_v3 }
  0x3b   :  { %1277 = vmatpush.bf16.msra.mxu3 %v1902_v4 }
  0x3e   :  { %1109 = vmatpush.bf16.msra.mxu2 %v1893_v5 }
  0x3f   :  { %1278 = vmatpush.bf16.msra.mxu3 %v1901_v6 }
  0x46   :  { %453 = vmatmul.bf16.gmra.mxu0 %v1846_v49 }
  0x47   :  { %622 = vmatmul.bf16.gmra.mxu1 %v1846_v49 }
  0x56   :  { %458 = vmatmul.bf16.gmra.mxu0 %v1847_v50 }
  0x57   :  { %627 = vmatmul.bf16.gmra.mxu1 %v1847_v50 }
  0x66   :  { %463 = vmatmul.bf16.gmra.mxu0 %v1848_v51 }
  0x67   :  { %632 = vmatmul.bf16.gmra.mxu1 %v1848_v51 }
  0x76   :  { %468 = vmatmul.bf16.gmra.mxu0 %v1849_v52 }
  0x77   :  { %637 = vmatmul.bf16.gmra.mxu1 %v1849_v52 }
  0x86   :  { %473 = vmatmul.bf16.gmra.mxu0 %v1850_v55 }
  0x87   :  { %642 = vmatmul.bf16.gmra.mxu1 %v1850_v55 }
  0x96   :  { %478 = vmatmul.bf16.gmra.mxu0 %v1851_v62 }
  0x97   :  { %647 = vmatmul.bf16.gmra.mxu1 %v1851_v62 }
  0xa6   :  { %483 = vmatmul.bf16.gmra.mxu0 %v1852_v7 }
  0xa7   :  { %652 = vmatmul.bf16.gmra.mxu1 %v1852_v7  ;;  %v1857_v7 = vld [vmem:[#allocation2 + $0x60] sm:$0xff] }
  0xb3   :  { %v449_v10 = vpop.f32.mrf.mxu0 }
  0xb4   :  { %v618_v11 = vpop.f32.mrf.mxu1  ;;  %v450_v14 = vadd.f32 %v449_v10, %v2296_v12 }
  0xb5   :  { %v619_v15 = vadd.f32 %v618_v11, %v2298_v13 }
  0xb6   :  { %488 = vmatmul.bf16.gmra.mxu0 %v1853_v8  ;;  %v778_v20 = vmax.f32 %v450_v14, 0.0 }
  0xb7   :  { %657 = vmatmul.bf16.gmra.mxu1 %v1853_v8  ;;  %v779_v22 = vmax.f32 %v619_v15, 0.0 }
  0xbb   :  { %v451_v16 = vpop.f32.mrf.mxu0 }
  0xbc   :  { %v452_v17 = vadd.f32 %v451_v16, %v2296_v12  ;;  %v620_v18 = vpop.f32.mrf.mxu1 }
  0xbd   :  { %v621_v19 = vadd.f32 %v620_v18, %v2298_v13 }
  0xbe   :  { %v780_v21 = vmax.f32 %v452_v17, 0.0 }
  0xbf   :  { %v781_v23 = vmax.f32 %v621_v19, 0.0 }
  0xc0   :  { %v906_v24 = vpack.c.bf16 %v780_v21, %v778_v20 }
  0xc1   :  { %v907_v25 = vpack.c.bf16 %v781_v23, %v779_v22 }
  0xc2   :  { %1110 = vmatmul.bf16.vlgmr.msra.gmra.mxu2 %v906_v24  ;;  %v1858_v24 = vld [vmem:[#allocation2 + $0x68] sm:$0xff] }
  0xc3   :  { %1279 = vmatmul.bf16.vlgmr.msra.gmra.mxu3 %v907_v25  ;;  %v454_v27 = vpop.f32.mrf.mxu0 }
  0xc4   :  { %v623_v28 = vpop.f32.mrf.mxu1  ;;  %v455_v29 = vadd.f32 %v454_v27, %v2296_v12 }
  0xc5   :  { %v624_v30 = vadd.f32 %v623_v28, %v2298_v13 }
  0xc6   :  { %493 = vmatmul.bf16.gmra.mxu0 %v1854_v26  ;;  %v782_v35 = vmax.f32 %v455_v29, 0.0 }
  0xc7   :  { %662 = vmatmul.bf16.gmra.mxu1 %v1854_v26  ;;  %v783_v37 = vmax.f32 %v624_v30, 0.0 }
  0xcb   :  { %v456_v31 = vpop.f32.mrf.mxu0 }
  0xcc   :  { %v457_v32 = vadd.f32 %v456_v31, %v2296_v12  ;;  %v625_v33 = vpop.f32.mrf.mxu1 }
  0xcd   :  { %v626_v34 = vadd.f32 %v625_v33, %v2298_v13 }
  0xce   :  { %v784_v36 = vmax.f32 %v457_v32, 0.0 }
  0xcf   :  { %v785_v38 = vmax.f32 %v626_v34, 0.0 }
  0xd0   :  { %v908_v39 = vpack.c.bf16 %v784_v36, %v782_v35 }
  0xd1   :  { %v909_v40 = vpack.c.bf16 %v785_v38, %v783_v37 }
  0xd2   :  { %1115 = vmatmul.bf16.gmra.mxu2 %v908_v39  ;;  %v1859_v39 = vld [vmem:[#allocation2 + $0x70] sm:$0xff] }
  0xd3   :  { %1284 = vmatmul.bf16.gmra.mxu3 %v909_v40  ;;  %v459_v42 = vpop.f32.mrf.mxu0 }
  0xd4   :  { %v628_v43 = vpop.f32.mrf.mxu1  ;;  %v460_v44 = vadd.f32 %v459_v42, %v2296_v12 }
  0xd5   :  { %v629_v45 = vadd.f32 %v628_v43, %v2298_v13 }
  0xd6   :  { %498 = vmatmul.bf16.gmra.mxu0 %v1855_v41  ;;  %v786_v50 = vmax.f32 %v460_v44, 0.0 }
  0xd7   :  { %667 = vmatmul.bf16.gmra.mxu1 %v1855_v41  ;;  %v787_v52 = vmax.f32 %v629_v45, 0.0 }
  0xdb   :  { %v461_v46 = vpop.f32.mrf.mxu0 }
  0xdc   :  { %v462_v47 = vadd.f32 %v461_v46, %v2296_v12  ;;  %v630_v48 = vpop.f32.mrf.mxu1 }
  0xdd   :  { %v631_v49 = vadd.f32 %v630_v48, %v2298_v13 }
  0xde   :  { %v788_v51 = vmax.f32 %v462_v47, 0.0 }
  0xdf   :  { %v789_v53 = vmax.f32 %v631_v49, 0.0 }
  0xe0   :  { %v910_v54 = vpack.c.bf16 %v788_v51, %v786_v50 }
  0xe1   :  { %v911_v55 = vpack.c.bf16 %v789_v53, %v787_v52 }
  0xe2   :  { %1120 = vmatmul.bf16.gmra.mxu2 %v910_v54  ;;  %v1860_v54 = vld [vmem:[#allocation2 + $0x78] sm:$0xff] }
  0xe3   :  { %1289 = vmatmul.bf16.gmra.mxu3 %v911_v55  ;;  %v464_v57 = vpop.f32.mrf.mxu0 }
  0xe4   :  { %v633_v58 = vpop.f32.mrf.mxu1  ;;  %v465_v59 = vadd.f32 %v464_v57, %v2296_v12 }
  0xe5   :  { %v634_v60 = vadd.f32 %v633_v58, %v2298_v13 }
  0xe6   :  { %503 = vmatmul.bf16.gmra.mxu0 %v1856_v56  ;;  %v790_v1 = vmax.f32 %v465_v59, 0.0 }
  0xe7   :  { %672 = vmatmul.bf16.gmra.mxu1 %v1856_v56  ;;  %v791_v3 = vmax.f32 %v634_v60, 0.0 }
  0xeb   :  { %v466_v61 = vpop.f32.mrf.mxu0 }
  0xec   :  { %v467_v62 = vadd.f32 %v466_v61, %v2296_v12  ;;  %v635_v63 = vpop.f32.mrf.mxu1 }
  0xed   :  { %v636_v0 = vadd.f32 %v635_v63, %v2298_v13 }
  0xee   :  { %v792_v2 = vmax.f32 %v467_v62, 0.0 }
  0xef   :  { %v793_v4 = vmax.f32 %v636_v0, 0.0 }
  0xf0   :  { %v912_v5 = vpack.c.bf16 %v792_v2, %v790_v1 }
  0xf1   :  { %v913_v6 = vpack.c.bf16 %v793_v4, %v791_v3 }
  0xf2   :  { %1125 = vmatmul.bf16.gmra.mxu2 %v912_v5  ;;  %v1861_v5 = vld [vmem:[#allocation2 + $0x80] sm:$0xff] }
  0xf3   :  { %1294 = vmatmul.bf16.gmra.mxu3 %v913_v6  ;;  %v469_v8 = vpop.f32.mrf.mxu0 }
  0xf4   :  { %v638_v9 = vpop.f32.mrf.mxu1  ;;  %v470_v10 = vadd.f32 %v469_v8, %v2296_v12 }
  0xf5   :  { %v639_v11 = vadd.f32 %v638_v9, %v2298_v13 }
  0xf6   :  { %508 = vmatmul.bf16.gmra.mxu0 %v1857_v7  ;;  %v794_v18 = vmax.f32 %v470_v10, 0.0 }
  0xf7   :  { %677 = vmatmul.bf16.gmra.mxu1 %v1857_v7  ;;  %v795_v20 = vmax.f32 %v639_v11, 0.0 }
  0xfb   :  { %v471_v14 = vpop.f32.mrf.mxu0 }
  0xfc   :  { %v472_v15 = vadd.f32 %v471_v14, %v2296_v12  ;;  %v640_v16 = vpop.f32.mrf.mxu1 }
  0xfd   :  { %v641_v17 = vadd.f32 %v640_v16, %v2298_v13 }
  0xfe   :  { %v796_v19 = vmax.f32 %v472_v15, 0.0 }
  0xff   :  { %v797_v21 = vmax.f32 %v641_v17, 0.0 }
 0x100   :  { %v914_v22 = vpack.c.bf16 %v796_v19, %v794_v18 }
 0x101   :  { %v915_v23 = vpack.c.bf16 %v797_v21, %v795_v20 }
 0x102   :  { %1130 = vmatmul.bf16.gmra.mxu2 %v914_v22  ;;  %v1862_v22 = vld [vmem:[#allocation2 + $0x88] sm:$0xff] }
 0x103   :  { %1299 = vmatmul.bf16.gmra.mxu3 %v915_v23  ;;  %v474_v25 = vpop.f32.mrf.mxu0 }
 0x104   :  { %v643_v26 = vpop.f32.mrf.mxu1  ;;  %v475_v27 = vadd.f32 %v474_v25, %v2296_v12 }
 0x105   :  { %v644_v28 = vadd.f32 %v643_v26, %v2298_v13 }
 0x106   :  { %513 = vmatmul.bf16.gmra.mxu0 %v1858_v24  ;;  %v798_v33 = vmax.f32 %v475_v27, 0.0  ;;  %v2339_v27 = vld [vmem:[%s2512_s4] ss:$0 sm:$0xff] }
 0x107   :  { %682 = vmatmul.bf16.gmra.mxu1 %v1858_v24  ;;  %v799_v35 = vmax.f32 %v644_v28, 0.0 }
 0x10b   :  { %v476_v29 = vpop.f32.mrf.mxu0 }
 0x10c   :  { %v477_v30 = vadd.f32 %v476_v29, %v2296_v12  ;;  %v645_v31 = vpop.f32.mrf.mxu1 }
 0x10d   :  { %v646_v32 = vadd.f32 %v645_v31, %v2298_v13 }
 0x10e   :  { %v800_v34 = vmax.f32 %v477_v30, 0.0 }
 0x10f   :  { %v801_v36 = vmax.f32 %v646_v32, 0.0 }
 0x110   :  { %v916_v37 = vpack.c.bf16 %v800_v34, %v798_v33 }
 0x111   :  { %v917_v38 = vpack.c.bf16 %v801_v36, %v799_v35 }
 0x112   :  { %1135 = vmatmul.bf16.gmra.mxu2 %v916_v37 }
 0x113   :  { %1304 = vmatmul.bf16.gmra.mxu3 %v917_v38  ;;  %v479_v40 = vpop.f32.mrf.mxu0 }
 0x114   :  { %v648_v41 = vpop.f32.mrf.mxu1  ;;  %v480_v42 = vadd.f32 %v479_v40, %v2296_v12 }
 0x115   :  { %v649_v43 = vadd.f32 %v648_v41, %v2298_v13 }
 0x116   :  { %518 = vmatmul.bf16.gmra.mxu0 %v1859_v39  ;;  %v802_v48 = vmax.f32 %v480_v42, 0.0 }
 0x117   :  { %687 = vmatmul.bf16.gmra.mxu1 %v1859_v39  ;;  %v803_v50 = vmax.f32 %v649_v43, 0.0 }
 0x11b   :  { %v481_v44 = vpop.f32.mrf.mxu0 }
 0x11c   :  { %v482_v45 = vadd.f32 %v481_v44, %v2296_v12  ;;  %v650_v46 = vpop.f32.mrf.mxu1 }
 0x11d   :  { %v651_v47 = vadd.f32 %v650_v46, %v2298_v13 }
 0x11e   :  { %v804_v49 = vmax.f32 %v482_v45, 0.0 }
 0x11f   :  { %v805_v51 = vmax.f32 %v651_v47, 0.0  ;;  %v1863_v47 = vld [vmem:[#allocation2 + $0x90] sm:$0xff] }
 0x120   :  { %v918_v52 = vpack.c.bf16 %v804_v49, %v802_v48 }
 0x121   :  { %v919_v53 = vpack.c.bf16 %v805_v51, %v803_v50 }
 0x122   :  { %1140 = vmatmul.bf16.gmra.mxu2 %v918_v52 }
 0x123   :  { %1309 = vmatmul.bf16.gmra.mxu3 %v919_v53  ;;  %v484_v55 = vpop.f32.mrf.mxu0 }
 0x124   :  { %v653_v56 = vpop.f32.mrf.mxu1  ;;  %v485_v57 = vadd.f32 %v484_v55, %v2296_v12 }
 0x125   :  { %v654_v58 = vadd.f32 %v653_v56, %v2298_v13 }
 0x126   :  { %523 = vmatmul.bf16.gmra.mxu0 %v1860_v54  ;;  %v806_v63 = vmax.f32 %v485_v57, 0.0 }
 0x127   :  { %692 = vmatmul.bf16.gmra.mxu1 %v1860_v54  ;;  %v807_v1 = vmax.f32 %v654_v58, 0.0 }
 0x12b   :  { %v486_v59 = vpop.f32.mrf.mxu0 }
 0x12c   :  { %v487_v60 = vadd.f32 %v486_v59, %v2296_v12  ;;  %v655_v61 = vpop.f32.mrf.mxu1 }
 0x12d   :  { %v656_v62 = vadd.f32 %v655_v61, %v2298_v13 }
 0x12e   :  { %v808_v0 = vmax.f32 %v487_v60, 0.0 }
 0x12f   :  { %v809_v2 = vmax.f32 %v656_v62, 0.0 }
 0x130   :  { %v920_v3 = vpack.c.bf16 %v808_v0, %v806_v63 }
 0x131   :  { %v921_v4 = vpack.c.bf16 %v809_v2, %v807_v1 }
 0x132   :  { %1145 = vmatmul.bf16.gmra.mxu2 %v920_v3 }
 0x133   :  { %1314 = vmatmul.bf16.gmra.mxu3 %v921_v4  ;;  %v489_v6 = vpop.f32.mrf.mxu0 }
 0x134   :  { %v658_v7 = vpop.f32.mrf.mxu1  ;;  %v490_v8 = vadd.f32 %v489_v6, %v2296_v12 }
 0x135   :  { %v659_v9 = vadd.f32 %v658_v7, %v2298_v13  ;;  %v1864_v7 = vld [vmem:[#allocation2 + $0x98] sm:$0xff] }
 0x136   :  { %528 = vmatmul.bf16.gmra.mxu0 %v1861_v5  ;;  %v810_v16 = vmax.f32 %v490_v8, 0.0 }
 0x137   :  { %697 = vmatmul.bf16.gmra.mxu1 %v1861_v5  ;;  %v811_v18 = vmax.f32 %v659_v9, 0.0 }
 0x13b   :  { %v491_v10 = vpop.f32.mrf.mxu0 }
 0x13c   :  { %v492_v11 = vadd.f32 %v491_v10, %v2296_v12  ;;  %v660_v14 = vpop.f32.mrf.mxu1 }
 0x13d   :  { %v661_v15 = vadd.f32 %v660_v14, %v2298_v13 }
 0x13e   :  { %v812_v17 = vmax.f32 %v492_v11, 0.0 }
 0x13f   :  { %v813_v19 = vmax.f32 %v661_v15, 0.0 }
 0x140   :  { %v922_v20 = vpack.c.bf16 %v812_v17, %v810_v16 }
 0x141   :  { %v923_v21 = vpack.c.bf16 %v813_v19, %v811_v18 }
 0x142   :  { %1150 = vmatmul.bf16.gmra.mxu2 %v922_v20 }
 0x143   :  { %1319 = vmatmul.bf16.gmra.mxu3 %v923_v21  ;;  %v494_v23 = vpop.f32.mrf.mxu0 }
 0x144   :  { %v663_v24 = vpop.f32.mrf.mxu1  ;;  %v495_v28 = vadd.f32 %v494_v23, %v2296_v12 }
 0x145   :  { %v1111_v25 = vpop.f32.mrf.mxu2  ;;  %v664_v29 = vadd.f32 %v663_v24, %v2298_v13 }
 0x146   :  { %v1280_v26 = vpop.f32.mrf.mxu3  ;;  %533 = vmatmul.bf16.gmra.mxu0 %v1862_v22  ;;  %v1112_v31 = vadd.f32 %v2339_v27, %v1111_v25  ;;  %v814_v36 = vmax.f32 %v495_v28, 0.0 }
 0x147   :  { %702 = vmatmul.bf16.gmra.mxu1 %v1862_v22  ;;  %v815_v40 = vmax.f32 %v664_v29, 0.0 }
 0x148   :  { %v1281_v42 = vadd.f32 %v1280_v26, %v1112_v31 }
 0x14b   :  { %v496_v30 = vpop.f32.mrf.mxu0 }
 0x14c   :  { %v497_v32 = vadd.f32 %v496_v30, %v2296_v12  ;;  %v665_v33 = vpop.f32.mrf.mxu1 }
 0x14d   :  { %v666_v34 = vadd.f32 %v665_v33, %v2298_v13  ;;  %v1113_v35 = vpop.f32.mrf.mxu2 }
 0x14e   :  { %v816_v37 = vmax.f32 %v497_v32, 0.0  ;;  %v1114_v38 = vadd.f32 %v2339_v27, %v1113_v35  ;;  %v1282_v39 = vpop.f32.mrf.mxu3 }
 0x14f   :  { %v817_v41 = vmax.f32 %v666_v34, 0.0  ;;  %v1865_v34 = vld [vmem:[#allocation2 + $0xa0] sm:$0xff] }
 0x150   :  { %v1283_v43 = vadd.f32 %v1282_v39, %v1114_v38  ;;  %v924_v44 = vpack.c.bf16 %v816_v37, %v814_v36 }
 0x151   :  { %v925_v45 = vpack.c.bf16 %v817_v41, %v815_v40 }
 0x152   :  { %v1912_v46 = vpack.c.bf16 %v1283_v43, %v1281_v42  ;;  %1155 = vmatmul.bf16.gmra.mxu2 %v924_v44 }
 0x153   :  { %1324 = vmatmul.bf16.gmra.mxu3 %v925_v45  ;;  %v499_v48 = vpop.f32.mrf.mxu0 }
 0x154   :  { %1913 = vst [vmem:[#allocation10] sm:$0xff] %v1912_v46   ;;  %v668_v49 = vpop.f32.mrf.mxu1  ;;  %v500_v52 = vadd.f32 %v499_v48, %v2296_v12 }
 0x155   :  { %v1116_v50 = vpop.f32.mrf.mxu2  ;;  %v669_v53 = vadd.f32 %v668_v49, %v2298_v13 }
 0x156   :  { %v1285_v51 = vpop.f32.mrf.mxu3  ;;  %538 = vmatmul.bf16.gmra.mxu0 %v1863_v47  ;;  %v1117_v55 = vadd.f32 %v2339_v27, %v1116_v50  ;;  %v818_v60 = vmax.f32 %v500_v52, 0.0 }
 0x157   :  { %707 = vmatmul.bf16.gmra.mxu1 %v1863_v47  ;;  %v819_v0 = vmax.f32 %v669_v53, 0.0 }
 0x158   :  { %v1286_v2 = vadd.f32 %v1285_v51, %v1117_v55 }
 0x15b   :  { %v501_v54 = vpop.f32.mrf.mxu0 }
 0x15c   :  { %v502_v56 = vadd.f32 %v501_v54, %v2296_v12  ;;  %v670_v57 = vpop.f32.mrf.mxu1 }
 0x15d   :  { %v671_v58 = vadd.f32 %v670_v57, %v2298_v13  ;;  %v1118_v59 = vpop.f32.mrf.mxu2 }
 0x15e   :  { %v820_v61 = vmax.f32 %v502_v56, 0.0  ;;  %v1119_v62 = vadd.f32 %v2339_v27, %v1118_v59  ;;  %v1287_v63 = vpop.f32.mrf.mxu3 }
 0x15f   :  { %v821_v1 = vmax.f32 %v671_v58, 0.0  ;;  %v1866_v58 = vld [vmem:[#allocation2 + $0xa8] sm:$0xff] }
 0x160   :  { %v1288_v3 = vadd.f32 %v1287_v63, %v1119_v62  ;;  %v926_v4 = vpack.c.bf16 %v820_v61, %v818_v60 }
 0x161   :  { %v927_v5 = vpack.c.bf16 %v821_v1, %v819_v0 }
 0x162   :  { %v1917_v6 = vpack.c.bf16 %v1288_v3, %v1286_v2  ;;  %1160 = vmatmul.bf16.gmra.mxu2 %v926_v4 }
 0x163   :  { %1329 = vmatmul.bf16.gmra.mxu3 %v927_v5  ;;  %v504_v8 = vpop.f32.mrf.mxu0 }
 0x164   :  { %2069 = vst [vmem:[#allocation10 + $0x8] sm:$0xff] %v1917_v6   ;;  %v673_v9 = vpop.f32.mrf.mxu1  ;;  %v505_v14 = vadd.f32 %v504_v8, %v2296_v12 }
 0x165   :  { %v1121_v10 = vpop.f32.mrf.mxu2  ;;  %v674_v15 = vadd.f32 %v673_v9, %v2298_v13 }
 0x166   :  { %v1290_v11 = vpop.f32.mrf.mxu3  ;;  %543 = vmatmul.bf16.gmra.mxu0 %v1864_v7  ;;  %v1122_v17 = vadd.f32 %v2339_v27, %v1121_v10  ;;  %v822_v22 = vmax.f32 %v505_v14, 0.0 }
 0x167   :  { %712 = vmatmul.bf16.gmra.mxu1 %v1864_v7  ;;  %v823_v26 = vmax.f32 %v674_v15, 0.0 }
 0x168   :  { %v1291_v29 = vadd.f32 %v1290_v11, %v1122_v17 }
 0x16b   :  { %v506_v16 = vpop.f32.mrf.mxu0 }
 0x16c   :  { %v507_v18 = vadd.f32 %v506_v16, %v2296_v12  ;;  %v675_v19 = vpop.f32.mrf.mxu1 }
 0x16d   :  { %v676_v20 = vadd.f32 %v675_v19, %v2298_v13  ;;  %v1123_v21 = vpop.f32.mrf.mxu2 }
 0x16e   :  { %v824_v23 = vmax.f32 %v507_v18, 0.0  ;;  %v1124_v24 = vadd.f32 %v2339_v27, %v1123_v21  ;;  %v1292_v25 = vpop.f32.mrf.mxu3 }
 0x16f   :  { %v825_v28 = vmax.f32 %v676_v20, 0.0  ;;  %v1867_v20 = vld [vmem:[#allocation2 + $0xb0] sm:$0xff] }
 0x170   :  { %v1293_v30 = vadd.f32 %v1292_v25, %v1124_v24  ;;  %v928_v31 = vpack.c.bf16 %v824_v23, %v822_v22 }
 0x171   :  { %v929_v32 = vpack.c.bf16 %v825_v28, %v823_v26 }
 0x172   :  { %v1922_v33 = vpack.c.bf16 %v1293_v30, %v1291_v29  ;;  %1165 = vmatmul.bf16.gmra.mxu2 %v928_v31 }
 0x173   :  { %1334 = vmatmul.bf16.gmra.mxu3 %v929_v32  ;;  %v509_v35 = vpop.f32.mrf.mxu0 }
 0x174   :  { %2070 = vst [vmem:[#allocation10 + $0x10] sm:$0xff] %v1922_v33   ;;  %v678_v36 = vpop.f32.mrf.mxu1  ;;  %v510_v39 = vadd.f32 %v509_v35, %v2296_v12 }
 0x175   :  { %v1126_v37 = vpop.f32.mrf.mxu2  ;;  %v679_v40 = vadd.f32 %v678_v36, %v2298_v13 }
 0x176   :  { %v1295_v38 = vpop.f32.mrf.mxu3  ;;  %548 = vmatmul.bf16.gmra.mxu0 %v1865_v34  ;;  %v1127_v42 = vadd.f32 %v2339_v27, %v1126_v37  ;;  %v826_v47 = vmax.f32 %v510_v39, 0.0 }
 0x177   :  { %717 = vmatmul.bf16.gmra.mxu1 %v1865_v34  ;;  %v827_v51 = vmax.f32 %v679_v40, 0.0 }
 0x178   :  { %v1296_v53 = vadd.f32 %v1295_v38, %v1127_v42 }
 0x17b   :  { %v511_v41 = vpop.f32.mrf.mxu0 }
 0x17c   :  { %v512_v43 = vadd.f32 %v511_v41, %v2296_v12  ;;  %v680_v44 = vpop.f32.mrf.mxu1 }
 0x17d   :  { %v681_v45 = vadd.f32 %v680_v44, %v2298_v13  ;;  %v1128_v46 = vpop.f32.mrf.mxu2 }
 0x17e   :  { %v828_v48 = vmax.f32 %v512_v43, 0.0  ;;  %v1129_v49 = vadd.f32 %v2339_v27, %v1128_v46  ;;  %v1297_v50 = vpop.f32.mrf.mxu3 }
 0x17f   :  { %v829_v52 = vmax.f32 %v681_v45, 0.0  ;;  %v1868_v45 = vld [vmem:[#allocation2 + $0xb8] sm:$0xff] }
 0x180   :  { %v1298_v54 = vadd.f32 %v1297_v50, %v1129_v49  ;;  %v930_v55 = vpack.c.bf16 %v828_v48, %v826_v47 }
 0x181   :  { %v931_v56 = vpack.c.bf16 %v829_v52, %v827_v51 }
 0x182   :  { %v1927_v57 = vpack.c.bf16 %v1298_v54, %v1296_v53  ;;  %1170 = vmatmul.bf16.gmra.mxu2 %v930_v55 }
 0x183   :  { %1339 = vmatmul.bf16.gmra.mxu3 %v931_v56  ;;  %v514_v59 = vpop.f32.mrf.mxu0 }
 0x184   :  { %2071 = vst [vmem:[#allocation10 + $0x18] sm:$0xff] %v1927_v57   ;;  %v683_v60 = vpop.f32.mrf.mxu1  ;;  %v515_v63 = vadd.f32 %v514_v59, %v2296_v12 }
 0x185   :  { %v1131_v61 = vpop.f32.mrf.mxu2  ;;  %v684_v0 = vadd.f32 %v683_v60, %v2298_v13 }
 0x186   :  { %v1300_v62 = vpop.f32.mrf.mxu3  ;;  %553 = vmatmul.bf16.gmra.mxu0 %v1866_v58  ;;  %v1132_v2 = vadd.f32 %v2339_v27, %v1131_v61  ;;  %v830_v7 = vmax.f32 %v515_v63, 0.0 }
 0x187   :  { %722 = vmatmul.bf16.gmra.mxu1 %v1866_v58  ;;  %v831_v11 = vmax.f32 %v684_v0, 0.0 }
 0x188   :  { %v1301_v15 = vadd.f32 %v1300_v62, %v1132_v2 }
 0x18b   :  { %v516_v1 = vpop.f32.mrf.mxu0 }
 0x18c   :  { %v517_v3 = vadd.f32 %v516_v1, %v2296_v12  ;;  %v685_v4 = vpop.f32.mrf.mxu1 }
 0x18d   :  { %v686_v5 = vadd.f32 %v685_v4, %v2298_v13  ;;  %v1133_v6 = vpop.f32.mrf.mxu2 }
 0x18e   :  { %v832_v8 = vmax.f32 %v517_v3, 0.0  ;;  %v1134_v9 = vadd.f32 %v2339_v27, %v1133_v6  ;;  %v1302_v10 = vpop.f32.mrf.mxu3 }
 0x18f   :  { %v833_v14 = vmax.f32 %v686_v5, 0.0  ;;  %v1869_v5 = vld [vmem:[#allocation2 + $0xc0] sm:$0xff] }
 0x190   :  { %v1303_v16 = vadd.f32 %v1302_v10, %v1134_v9  ;;  %v932_v17 = vpack.c.bf16 %v832_v8, %v830_v7 }
 0x191   :  { %v933_v18 = vpack.c.bf16 %v833_v14, %v831_v11 }
 0x192   :  { %v1932_v19 = vpack.c.bf16 %v1303_v16, %v1301_v15  ;;  %1175 = vmatmul.bf16.gmra.mxu2 %v932_v17 }
 0x193   :  { %1344 = vmatmul.bf16.gmra.mxu3 %v933_v18  ;;  %v519_v21 = vpop.f32.mrf.mxu0 }
 0x194   :  { %2072 = vst [vmem:[#allocation10 + $0x20] sm:$0xff] %v1932_v19   ;;  %v688_v22 = vpop.f32.mrf.mxu1  ;;  %v520_v25 = vadd.f32 %v519_v21, %v2296_v12 }
 0x195   :  { %v1136_v23 = vpop.f32.mrf.mxu2  ;;  %v689_v26 = vadd.f32 %v688_v22, %v2298_v13 }
 0x196   :  { %v1305_v24 = vpop.f32.mrf.mxu3  ;;  %558 = vmatmul.bf16.gmra.mxu0 %v1867_v20  ;;  %v1137_v29 = vadd.f32 %v2339_v27, %v1136_v23  ;;  %v834_v34 = vmax.f32 %v520_v25, 0.0 }
 0x197   :  { %727 = vmatmul.bf16.gmra.mxu1 %v1867_v20  ;;  %v835_v38 = vmax.f32 %v689_v26, 0.0 }
 0x198   :  { %v1306_v40 = vadd.f32 %v1305_v24, %v1137_v29 }
 0x19b   :  { %v521_v28 = vpop.f32.mrf.mxu0 }
 0x19c   :  { %v522_v30 = vadd.f32 %v521_v28, %v2296_v12  ;;  %v690_v31 = vpop.f32.mrf.mxu1 }
 0x19d   :  { %v691_v32 = vadd.f32 %v690_v31, %v2298_v13  ;;  %v1138_v33 = vpop.f32.mrf.mxu2 }
 0x19e   :  { %v836_v35 = vmax.f32 %v522_v30, 0.0  ;;  %v1139_v36 = vadd.f32 %v2339_v27, %v1138_v33  ;;  %v1307_v37 = vpop.f32.mrf.mxu3 }
 0x19f   :  { %v837_v39 = vmax.f32 %v691_v32, 0.0  ;;  %v1870_v32 = vld [vmem:[#allocation2 + $0xc8] sm:$0xff] }
 0x1a0   :  { %v1308_v41 = vadd.f32 %v1307_v37, %v1139_v36  ;;  %v934_v42 = vpack.c.bf16 %v836_v35, %v834_v34 }
 0x1a1   :  { %v935_v43 = vpack.c.bf16 %v837_v39, %v835_v38 }
 0x1a2   :  { %v1937_v44 = vpack.c.bf16 %v1308_v41, %v1306_v40  ;;  %1180 = vmatmul.bf16.gmra.mxu2 %v934_v42 }
 0x1a3   :  { %1349 = vmatmul.bf16.gmra.mxu3 %v935_v43  ;;  %v524_v46 = vpop.f32.mrf.mxu0 }
 0x1a4   :  { %2073 = vst [vmem:[#allocation10 + $0x28] sm:$0xff] %v1937_v44   ;;  %v693_v47 = vpop.f32.mrf.mxu1  ;;  %v525_v50 = vadd.f32 %v524_v46, %v2296_v12 }
 0x1a5   :  { %v1141_v48 = vpop.f32.mrf.mxu2  ;;  %v694_v51 = vadd.f32 %v693_v47, %v2298_v13 }
 0x1a6   :  { %v1310_v49 = vpop.f32.mrf.mxu3  ;;  %563 = vmatmul.bf16.gmra.mxu0 %v1868_v45  ;;  %v1142_v53 = vadd.f32 %v2339_v27, %v1141_v48  ;;  %v838_v58 = vmax.f32 %v525_v50, 0.0 }
 0x1a7   :  { %732 = vmatmul.bf16.gmra.mxu1 %v1868_v45  ;;  %v839_v62 = vmax.f32 %v694_v51, 0.0 }
 0x1a8   :  { %v1311_v0 = vadd.f32 %v1310_v49, %v1142_v53 }
 0x1ab   :  { %v526_v52 = vpop.f32.mrf.mxu0 }
 0x1ac   :  { %v527_v54 = vadd.f32 %v526_v52, %v2296_v12  ;;  %v695_v55 = vpop.f32.mrf.mxu1 }
 0x1ad   :  { %v696_v56 = vadd.f32 %v695_v55, %v2298_v13  ;;  %v1143_v57 = vpop.f32.mrf.mxu2 }
 0x1ae   :  { %v840_v59 = vmax.f32 %v527_v54, 0.0  ;;  %v1144_v60 = vadd.f32 %v2339_v27, %v1143_v57  ;;  %v1312_v61 = vpop.f32.mrf.mxu3 }
 0x1af   :  { %v841_v63 = vmax.f32 %v696_v56, 0.0  ;;  %v1871_v56 = vld [vmem:[#allocation2 + $0xd0] sm:$0xff] }
 0x1b0   :  { %v1313_v1 = vadd.f32 %v1312_v61, %v1144_v60  ;;  %v936_v2 = vpack.c.bf16 %v840_v59, %v838_v58 }
 0x1b1   :  { %v937_v3 = vpack.c.bf16 %v841_v63, %v839_v62 }
 0x1b2   :  { %v1942_v4 = vpack.c.bf16 %v1313_v1, %v1311_v0  ;;  %1185 = vmatmul.bf16.gmra.mxu2 %v936_v2 }
 0x1b3   :  { %1354 = vmatmul.bf16.gmra.mxu3 %v937_v3  ;;  %v529_v6 = vpop.f32.mrf.mxu0 }
 0x1b4   :  { %2074 = vst [vmem:[#allocation10 + $0x30] sm:$0xff] %v1942_v4   ;;  %v698_v7 = vpop.f32.mrf.mxu1  ;;  %v530_v10 = vadd.f32 %v529_v6, %v2296_v12 }
 0x1b5   :  { %v1146_v8 = vpop.f32.mrf.mxu2  ;;  %v699_v11 = vadd.f32 %v698_v7, %v2298_v13 }
 0x1b6   :  { %v1315_v9 = vpop.f32.mrf.mxu3  ;;  %568 = vmatmul.bf16.gmra.mxu0 %v1869_v5  ;;  %v1147_v15 = vadd.f32 %v2339_v27, %v1146_v8  ;;  %v842_v20 = vmax.f32 %v530_v10, 0.0 }
 0x1b7   :  { %737 = vmatmul.bf16.gmra.mxu1 %v1869_v5  ;;  %v843_v24 = vmax.f32 %v699_v11, 0.0 }
 0x1b8   :  { %v1316_v26 = vadd.f32 %v1315_v9, %v1147_v15 }
 0x1bb   :  { %v531_v14 = vpop.f32.mrf.mxu0 }
 0x1bc   :  { %v532_v16 = vadd.f32 %v531_v14, %v2296_v12  ;;  %v700_v17 = vpop.f32.mrf.mxu1 }
 0x1bd   :  { %v701_v18 = vadd.f32 %v700_v17, %v2298_v13  ;;  %v1148_v19 = vpop.f32.mrf.mxu2 }
 0x1be   :  { %v844_v21 = vmax.f32 %v532_v16, 0.0  ;;  %v1149_v22 = vadd.f32 %v2339_v27, %v1148_v19  ;;  %v1317_v23 = vpop.f32.mrf.mxu3 }
 0x1bf   :  { %v845_v25 = vmax.f32 %v701_v18, 0.0  ;;  %v1872_v18 = vld [vmem:[#allocation2 + $0xd8] sm:$0xff] }
 0x1c0   :  { %v1318_v28 = vadd.f32 %v1317_v23, %v1149_v22  ;;  %v938_v29 = vpack.c.bf16 %v844_v21, %v842_v20 }
 0x1c1   :  { %v939_v30 = vpack.c.bf16 %v845_v25, %v843_v24 }
 0x1c2   :  { %v1947_v31 = vpack.c.bf16 %v1318_v28, %v1316_v26  ;;  %1190 = vmatmul.bf16.gmra.mxu2 %v938_v29 }
 0x1c3   :  { %1359 = vmatmul.bf16.gmra.mxu3 %v939_v30  ;;  %v534_v33 = vpop.f32.mrf.mxu0 }
 0x1c4   :  { %2075 = vst [vmem:[#allocation10 + $0x38] sm:$0xff] %v1947_v31   ;;  %v703_v34 = vpop.f32.mrf.mxu1  ;;  %v535_v37 = vadd.f32 %v534_v33, %v2296_v12 }
 0x1c5   :  { %v1151_v35 = vpop.f32.mrf.mxu2  ;;  %v704_v38 = vadd.f32 %v703_v34, %v2298_v13 }
 0x1c6   :  { %v1320_v36 = vpop.f32.mrf.mxu3  ;;  %573 = vmatmul.bf16.gmra.mxu0 %v1870_v32  ;;  %v1152_v40 = vadd.f32 %v2339_v27, %v1151_v35  ;;  %v846_v45 = vmax.f32 %v535_v37, 0.0 }
 0x1c7   :  { %742 = vmatmul.bf16.gmra.mxu1 %v1870_v32  ;;  %v847_v49 = vmax.f32 %v704_v38, 0.0 }
 0x1c8   :  { %v1321_v51 = vadd.f32 %v1320_v36, %v1152_v40 }
 0x1cb   :  { %v536_v39 = vpop.f32.mrf.mxu0 }
 0x1cc   :  { %v537_v41 = vadd.f32 %v536_v39, %v2296_v12  ;;  %v705_v42 = vpop.f32.mrf.mxu1 }
 0x1cd   :  { %v706_v43 = vadd.f32 %v705_v42, %v2298_v13  ;;  %v1153_v44 = vpop.f32.mrf.mxu2 }
 0x1ce   :  { %v848_v46 = vmax.f32 %v537_v41, 0.0  ;;  %v1154_v47 = vadd.f32 %v2339_v27, %v1153_v44  ;;  %v1322_v48 = vpop.f32.mrf.mxu3 }
 0x1cf   :  { %v849_v50 = vmax.f32 %v706_v43, 0.0  ;;  %v1873_v43 = vld [vmem:[#allocation2 + $0xe0] sm:$0xff] }
 0x1d0   :  { %v1323_v52 = vadd.f32 %v1322_v48, %v1154_v47  ;;  %v940_v53 = vpack.c.bf16 %v848_v46, %v846_v45 }
 0x1d1   :  { %v941_v54 = vpack.c.bf16 %v849_v50, %v847_v49 }
 0x1d2   :  { %v1952_v55 = vpack.c.bf16 %v1323_v52, %v1321_v51  ;;  %1195 = vmatmul.bf16.gmra.mxu2 %v940_v53 }
 0x1d3   :  { %1364 = vmatmul.bf16.gmra.mxu3 %v941_v54  ;;  %v539_v57 = vpop.f32.mrf.mxu0 }
 0x1d4   :  { %2076 = vst [vmem:[#allocation10 + $0x40] sm:$0xff] %v1952_v55   ;;  %v708_v58 = vpop.f32.mrf.mxu1  ;;  %v540_v61 = vadd.f32 %v539_v57, %v2296_v12 }
 0x1d5   :  { %v1156_v59 = vpop.f32.mrf.mxu2  ;;  %v709_v62 = vadd.f32 %v708_v58, %v2298_v13 }
 0x1d6   :  { %v1325_v60 = vpop.f32.mrf.mxu3  ;;  %578 = vmatmul.bf16.gmra.mxu0 %v1871_v56  ;;  %v1157_v0 = vadd.f32 %v2339_v27, %v1156_v59  ;;  %v850_v5 = vmax.f32 %v540_v61, 0.0 }
 0x1d7   :  { %747 = vmatmul.bf16.gmra.mxu1 %v1871_v56  ;;  %v851_v9 = vmax.f32 %v709_v62, 0.0 }
 0x1d8   :  { %v1326_v11 = vadd.f32 %v1325_v60, %v1157_v0 }
 0x1db   :  { %v541_v63 = vpop.f32.mrf.mxu0 }
 0x1dc   :  { %v542_v1 = vadd.f32 %v541_v63, %v2296_v12  ;;  %v710_v2 = vpop.f32.mrf.mxu1 }
 0x1dd   :  { %v711_v3 = vadd.f32 %v710_v2, %v2298_v13  ;;  %v1158_v4 = vpop.f32.mrf.mxu2 }
 0x1de   :  { %v852_v6 = vmax.f32 %v542_v1, 0.0  ;;  %v1159_v7 = vadd.f32 %v2339_v27, %v1158_v4  ;;  %v1327_v8 = vpop.f32.mrf.mxu3 }
 0x1df   :  { %v853_v10 = vmax.f32 %v711_v3, 0.0  ;;  %v1874_v3 = vld [vmem:[#allocation2 + $0xe8] sm:$0xff] }
 0x1e0   :  { %v1328_v14 = vadd.f32 %v1327_v8, %v1159_v7  ;;  %v942_v15 = vpack.c.bf16 %v852_v6, %v850_v5 }
 0x1e1   :  { %v943_v16 = vpack.c.bf16 %v853_v10, %v851_v9 }
 0x1e2   :  { %v1957_v17 = vpack.c.bf16 %v1328_v14, %v1326_v11  ;;  %1200 = vmatmul.bf16.gmra.mxu2 %v942_v15 }
 0x1e3   :  { %1369 = vmatmul.bf16.gmra.mxu3 %v943_v16  ;;  %v544_v19 = vpop.f32.mrf.mxu0 }
 0x1e4   :  { %2077 = vst [vmem:[#allocation10 + $0x48] sm:$0xff] %v1957_v17   ;;  %v713_v20 = vpop.f32.mrf.mxu1  ;;  %v545_v23 = vadd.f32 %v544_v19, %v2296_v12 }
 0x1e5   :  { %v1161_v21 = vpop.f32.mrf.mxu2  ;;  %v714_v24 = vadd.f32 %v713_v20, %v2298_v13 }
 0x1e6   :  { %v1330_v22 = vpop.f32.mrf.mxu3  ;;  %583 = vmatmul.bf16.gmra.mxu0 %v1872_v18  ;;  %v1162_v26 = vadd.f32 %v2339_v27, %v1161_v21  ;;  %v854_v32 = vmax.f32 %v545_v23, 0.0 }
 0x1e7   :  { %752 = vmatmul.bf16.gmra.mxu1 %v1872_v18  ;;  %v855_v36 = vmax.f32 %v714_v24, 0.0 }
 0x1e8   :  { %v1331_v38 = vadd.f32 %v1330_v22, %v1162_v26 }
 0x1eb   :  { %v546_v25 = vpop.f32.mrf.mxu0 }
 0x1ec   :  { %v547_v28 = vadd.f32 %v546_v25, %v2296_v12  ;;  %v715_v29 = vpop.f32.mrf.mxu1 }
 0x1ed   :  { %v716_v30 = vadd.f32 %v715_v29, %v2298_v13  ;;  %v1163_v31 = vpop.f32.mrf.mxu2 }
 0x1ee   :  { %v856_v33 = vmax.f32 %v547_v28, 0.0  ;;  %v1164_v34 = vadd.f32 %v2339_v27, %v1163_v31  ;;  %v1332_v35 = vpop.f32.mrf.mxu3 }
 0x1ef   :  { %v857_v37 = vmax.f32 %v716_v30, 0.0  ;;  %v1875_v30 = vld [vmem:[#allocation2 + $0xf0] sm:$0xff] }
 0x1f0   :  { %v1333_v39 = vadd.f32 %v1332_v35, %v1164_v34  ;;  %v944_v40 = vpack.c.bf16 %v856_v33, %v854_v32 }
 0x1f1   :  { %v945_v41 = vpack.c.bf16 %v857_v37, %v855_v36 }
 0x1f2   :  { %v1962_v42 = vpack.c.bf16 %v1333_v39, %v1331_v38  ;;  %1205 = vmatmul.bf16.gmra.mxu2 %v944_v40 }
 0x1f3   :  { %1374 = vmatmul.bf16.gmra.mxu3 %v945_v41  ;;  %v549_v44 = vpop.f32.mrf.mxu0 }
 0x1f4   :  { %2078 = vst [vmem:[#allocation10 + $0x50] sm:$0xff] %v1962_v42   ;;  %v718_v45 = vpop.f32.mrf.mxu1  ;;  %v550_v48 = vadd.f32 %v549_v44, %v2296_v12 }
 0x1f5   :  { %v1166_v46 = vpop.f32.mrf.mxu2  ;;  %v719_v49 = vadd.f32 %v718_v45, %v2298_v13 }
 0x1f6   :  { %v1335_v47 = vpop.f32.mrf.mxu3  ;;  %588 = vmatmul.bf16.gmra.mxu0 %v1873_v43  ;;  %v1167_v51 = vadd.f32 %v2339_v27, %v1166_v46  ;;  %v858_v56 = vmax.f32 %v550_v48, 0.0 }
 0x1f7   :  { %757 = vmatmul.bf16.gmra.mxu1 %v1873_v43  ;;  %v859_v60 = vmax.f32 %v719_v49, 0.0 }
 0x1f8   :  { %v1336_v62 = vadd.f32 %v1335_v47, %v1167_v51 }
 0x1fb   :  { %v551_v50 = vpop.f32.mrf.mxu0 }
 0x1fc   :  { %v552_v52 = vadd.f32 %v551_v50, %v2296_v12  ;;  %v720_v53 = vpop.f32.mrf.mxu1 }
 0x1fd   :  { %v721_v54 = vadd.f32 %v720_v53, %v2298_v13  ;;  %v1168_v55 = vpop.f32.mrf.mxu2 }
 0x1fe   :  { %v860_v57 = vmax.f32 %v552_v52, 0.0  ;;  %v1169_v58 = vadd.f32 %v2339_v27, %v1168_v55  ;;  %v1337_v59 = vpop.f32.mrf.mxu3 }
 0x1ff   :  { %v861_v61 = vmax.f32 %v721_v54, 0.0  ;;  %v1876_v54 = vld [vmem:[#allocation2 + $0xf8] sm:$0xff] }
 0x200   :  { %v946_v63 = vpack.c.bf16 %v860_v57, %v858_v56  ;;  %v1338_v0 = vadd.f32 %v1337_v59, %v1169_v58 }
 0x201   :  { %v947_v1 = vpack.c.bf16 %v861_v61, %v859_v60 }
 0x202   :  { %v1967_v2 = vpack.c.bf16 %v1338_v0, %v1336_v62  ;;  %1210 = vmatmul.bf16.gmra.mxu2 %v946_v63 }
 0x203   :  { %1379 = vmatmul.bf16.gmra.mxu3 %v947_v1  ;;  %v554_v4 = vpop.f32.mrf.mxu0 }
 0x204   :  { %2079 = vst [vmem:[#allocation10 + $0x58] sm:$0xff] %v1967_v2   ;;  %v723_v5 = vpop.f32.mrf.mxu1  ;;  %v555_v8 = vadd.f32 %v554_v4, %v2296_v12 }
 0x205   :  { %v1171_v6 = vpop.f32.mrf.mxu2  ;;  %v724_v9 = vadd.f32 %v723_v5, %v2298_v13 }
 0x206   :  { %v1340_v7 = vpop.f32.mrf.mxu3  ;;  %593 = vmatmul.bf16.gmra.mxu0 %v1874_v3  ;;  %v1172_v11 = vadd.f32 %v2339_v27, %v1171_v6  ;;  %v862_v18 = vmax.f32 %v555_v8, 0.0 }
 0x207   :  { %762 = vmatmul.bf16.gmra.mxu1 %v1874_v3  ;;  %v863_v22 = vmax.f32 %v724_v9, 0.0 }
 0x208   :  { %v1341_v24 = vadd.f32 %v1340_v7, %v1172_v11 }
 0x20b   :  { %v556_v10 = vpop.f32.mrf.mxu0 }
 0x20c   :  { %v557_v14 = vadd.f32 %v556_v10, %v2296_v12  ;;  %v725_v15 = vpop.f32.mrf.mxu1 }
 0x20d   :  { %v726_v16 = vadd.f32 %v725_v15, %v2298_v13  ;;  %v1173_v17 = vpop.f32.mrf.mxu2 }
 0x20e   :  { %v864_v19 = vmax.f32 %v557_v14, 0.0  ;;  %v1174_v20 = vadd.f32 %v2339_v27, %v1173_v17  ;;  %v1342_v21 = vpop.f32.mrf.mxu3 }
 0x20f   :  { %v865_v23 = vmax.f32 %v726_v16, 0.0 }
 0x210   :  { %v948_v25 = vpack.c.bf16 %v864_v19, %v862_v18  ;;  %v1343_v26 = vadd.f32 %v1342_v21, %v1174_v20 }
 0x211   :  { %v949_v28 = vpack.c.bf16 %v865_v23, %v863_v22 }
 0x212   :  { %v1972_v29 = vpack.c.bf16 %v1343_v26, %v1341_v24  ;;  %1215 = vmatmul.bf16.gmra.mxu2 %v948_v25 }
 0x213   :  { %1384 = vmatmul.bf16.gmra.mxu3 %v949_v28  ;;  %v559_v31 = vpop.f32.mrf.mxu0 }
 0x214   :  { %2080 = vst [vmem:[#allocation10 + $0x60] sm:$0xff] %v1972_v29   ;;  %v728_v32 = vpop.f32.mrf.mxu1  ;;  %v560_v35 = vadd.f32 %v559_v31, %v2296_v12 }
 0x215   :  { %v1176_v33 = vpop.f32.mrf.mxu2  ;;  %v729_v36 = vadd.f32 %v728_v32, %v2298_v13 }
 0x216   :  { %v1345_v34 = vpop.f32.mrf.mxu3  ;;  %598 = vmatmul.bf16.gmra.mxu0 %v1875_v30  ;;  %v1177_v38 = vadd.f32 %v2339_v27, %v1176_v33  ;;  %v866_v43 = vmax.f32 %v560_v35, 0.0 }
 0x217   :  { %767 = vmatmul.bf16.gmra.mxu1 %v1875_v30  ;;  %v867_v47 = vmax.f32 %v729_v36, 0.0 }
 0x218   :  { %v1346_v49 = vadd.f32 %v1345_v34, %v1177_v38 }
 0x21b   :  { %v561_v37 = vpop.f32.mrf.mxu0 }
 0x21c   :  { %v562_v39 = vadd.f32 %v561_v37, %v2296_v12  ;;  %v730_v40 = vpop.f32.mrf.mxu1 }
 0x21d   :  { %v731_v41 = vadd.f32 %v730_v40, %v2298_v13  ;;  %v1178_v42 = vpop.f32.mrf.mxu2 }
 0x21e   :  { %v868_v44 = vmax.f32 %v562_v39, 0.0  ;;  %v1179_v45 = vadd.f32 %v2339_v27, %v1178_v42  ;;  %v1347_v46 = vpop.f32.mrf.mxu3 }
 0x21f   :  { %v869_v48 = vmax.f32 %v731_v41, 0.0 }
 0x220   :  { %v950_v50 = vpack.c.bf16 %v868_v44, %v866_v43  ;;  %v1348_v51 = vadd.f32 %v1347_v46, %v1179_v45 }
 0x221   :  { %v951_v52 = vpack.c.bf16 %v869_v48, %v867_v47 }
 0x222   :  { %v1977_v53 = vpack.c.bf16 %v1348_v51, %v1346_v49  ;;  %1220 = vmatmul.bf16.gmra.mxu2 %v950_v50 }
 0x223   :  { %1389 = vmatmul.bf16.gmra.mxu3 %v951_v52  ;;  %v564_v55 = vpop.f32.mrf.mxu0 }
 0x224   :  { %2081 = vst [vmem:[#allocation10 + $0x68] sm:$0xff] %v1977_v53   ;;  %v733_v56 = vpop.f32.mrf.mxu1  ;;  %v565_v59 = vadd.f32 %v564_v55, %v2296_v12 }
 0x225   :  { %v1181_v57 = vpop.f32.mrf.mxu2  ;;  %v734_v60 = vadd.f32 %v733_v56, %v2298_v13 }
 0x226   :  { %v1350_v58 = vpop.f32.mrf.mxu3  ;;  %603 = vmatmul.bf16.gmra.mxu0 %v1876_v54  ;;  %v1182_v62 = vadd.f32 %v2339_v27, %v1181_v57  ;;  %v870_v3 = vmax.f32 %v565_v59, 0.0 }
 0x227   :  { %772 = vmatmul.bf16.gmra.mxu1 %v1876_v54  ;;  %v871_v7 = vmax.f32 %v734_v60, 0.0 }
 0x228   :  { %v1351_v9 = vadd.f32 %v1350_v58, %v1182_v62 }
 0x22b   :  { %v566_v61 = vpop.f32.mrf.mxu0 }
 0x22c   :  { %v567_v63 = vadd.f32 %v566_v61, %v2296_v12  ;;  %v735_v0 = vpop.f32.mrf.mxu1 }
 0x22d   :  { %v736_v1 = vadd.f32 %v735_v0, %v2298_v13  ;;  %v1183_v2 = vpop.f32.mrf.mxu2 }
 0x22e   :  { %v872_v4 = vmax.f32 %v567_v63, 0.0  ;;  %v1184_v5 = vadd.f32 %v2339_v27, %v1183_v2  ;;  %v1352_v6 = vpop.f32.mrf.mxu3 }
 0x22f   :  { %v873_v8 = vmax.f32 %v736_v1, 0.0 }
 0x230   :  { %v952_v10 = vpack.c.bf16 %v872_v4, %v870_v3  ;;  %v1353_v11 = vadd.f32 %v1352_v6, %v1184_v5 }
 0x231   :  { %v953_v14 = vpack.c.bf16 %v873_v8, %v871_v7 }
 0x232   :  { %v1982_v15 = vpack.c.bf16 %v1353_v11, %v1351_v9  ;;  %1225 = vmatmul.bf16.gmra.mxu2 %v952_v10 }
 0x233   :  { %1394 = vmatmul.bf16.gmra.mxu3 %v953_v14  ;;  %v569_v16 = vpop.f32.mrf.mxu0 }
 0x234   :  { %2082 = vst [vmem:[#allocation10 + $0x70] sm:$0xff] %v1982_v15   ;;  %v738_v17 = vpop.f32.mrf.mxu1  ;;  %v570_v20 = vadd.f32 %v569_v16, %v2296_v12 }
 0x235   :  { %v1186_v18 = vpop.f32.mrf.mxu2  ;;  %v739_v21 = vadd.f32 %v738_v17, %v2298_v13 }
 0x236   :  { %v1355_v19 = vpop.f32.mrf.mxu3  ;;  %v1187_v23 = vadd.f32 %v2339_v27, %v1186_v18  ;;  %v874_v29 = vmax.f32 %v570_v20, 0.0 }
 0x237   :  { %v875_v33 = vmax.f32 %v739_v21, 0.0 }
 0x238   :  { %v1356_v35 = vadd.f32 %v1355_v19, %v1187_v23 }
 0x23b   :  { %v571_v22 = vpop.f32.mrf.mxu0 }
 0x23c   :  { %v572_v24 = vadd.f32 %v571_v22, %v2296_v12  ;;  %v740_v25 = vpop.f32.mrf.mxu1 }
 0x23d   :  { %v741_v26 = vadd.f32 %v740_v25, %v2298_v13  ;;  %v1188_v28 = vpop.f32.mrf.mxu2 }
 0x23e   :  { %v876_v30 = vmax.f32 %v572_v24, 0.0  ;;  %v1189_v31 = vadd.f32 %v2339_v27, %v1188_v28  ;;  %v1357_v32 = vpop.f32.mrf.mxu3 }
 0x23f   :  { %v877_v34 = vmax.f32 %v741_v26, 0.0 }
 0x240   :  { %v954_v36 = vpack.c.bf16 %v876_v30, %v874_v29  ;;  %v1358_v37 = vadd.f32 %v1357_v32, %v1189_v31  ;;  %v2454_v31 = vld [vmem:[%s2512_s4] ss:$0 sm:$0xff]  ;;  %s2247_s4 = smov [#allocation10]  }
 0x241   :  { %v955_v38 = vpack.c.bf16 %v877_v34, %v875_v33  ;;  %s1572_s17 = sshll.u32 %s2247_s4, 4  ;;  %s1573_s17 = int_to_ptr.vmem [resolvable:$true] %s1572_s17 }
 0x242   :  { %v1987_v39 = vpack.c.bf16 %v1358_v37, %v1356_v35  ;;  %1230 = vmatmul.bf16.gmra.mxu2 %v954_v36 }
 0x243   :  { %1399 = vmatmul.bf16.gmra.mxu3 %v955_v38  ;;  %v574_v40 = vpop.f32.mrf.mxu0 }
 0x244   :  { %2083 = vst [vmem:[#allocation10 + $0x78] sm:$0xff] %v1987_v39   ;;  %v743_v41 = vpop.f32.mrf.mxu1  ;;  %v575_v44 = vadd.f32 %v574_v40, %v2296_v12 }
 0x245   :  { %v1191_v42 = vpop.f32.mrf.mxu2  ;;  %v744_v45 = vadd.f32 %v743_v41, %v2298_v13 }
 0x246   :  { %v1360_v43 = vpop.f32.mrf.mxu3  ;;  %v1192_v47 = vadd.f32 %v2339_v27, %v1191_v42  ;;  %v878_v52 = vmax.f32 %v575_v44, 0.0 }
 0x247   :  { %v879_v56 = vmax.f32 %v744_v45, 0.0 }
 0x248   :  { %v1361_v58 = vadd.f32 %v1360_v43, %v1192_v47 }
 0x24b   :  { %v576_v46 = vpop.f32.mrf.mxu0 }
 0x24c   :  { %v577_v48 = vadd.f32 %v576_v46, %v2296_v12  ;;  %v745_v49 = vpop.f32.mrf.mxu1 }
 0x24d   :  { %v746_v50 = vadd.f32 %v745_v49, %v2298_v13  ;;  %v1193_v51 = vpop.f32.mrf.mxu2 }
 0x24e   :  { %v880_v53 = vmax.f32 %v577_v48, 0.0  ;;  %v1194_v54 = vadd.f32 %v2339_v27, %v1193_v51  ;;  %v1362_v55 = vpop.f32.mrf.mxu3 }
 0x24f   :  { %v881_v57 = vmax.f32 %v746_v50, 0.0 }
 0x250   :  { %v956_v59 = vpack.c.bf16 %v880_v53, %v878_v52  ;;  %v1363_v60 = vadd.f32 %v1362_v55, %v1194_v54 }
 0x251   :  { %v957_v61 = vpack.c.bf16 %v881_v57, %v879_v56 }
 0x252   :  { %v1992_v62 = vpack.c.bf16 %v1363_v60, %v1361_v58  ;;  %1235 = vmatmul.bf16.gmra.mxu2 %v956_v59 }
 0x253   :  { %1404 = vmatmul.bf16.gmra.mxu3 %v957_v61  ;;  %v579_v63 = vpop.f32.mrf.mxu0 }
 0x254   :  { %2084 = vst [vmem:[#allocation10 + $0x80] sm:$0xff] %v1992_v62   ;;  %v748_v0 = vpop.f32.mrf.mxu1  ;;  %v580_v3 = vadd.f32 %v579_v63, %v2296_v12 }
 0x255   :  { %v1196_v1 = vpop.f32.mrf.mxu2  ;;  %v749_v4 = vadd.f32 %v748_v0, %v2298_v13 }
 0x256   :  { %v1365_v2 = vpop.f32.mrf.mxu3  ;;  %v1197_v6 = vadd.f32 %v2339_v27, %v1196_v1  ;;  %v882_v11 = vmax.f32 %v580_v3, 0.0 }
 0x257   :  { %v883_v17 = vmax.f32 %v749_v4, 0.0 }
 0x258   :  { %v1366_v19 = vadd.f32 %v1365_v2, %v1197_v6 }
 0x25b   :  { %v581_v5 = vpop.f32.mrf.mxu0 }
 0x25c   :  { %v582_v7 = vadd.f32 %v581_v5, %v2296_v12  ;;  %v750_v8 = vpop.f32.mrf.mxu1 }
 0x25d   :  { %v751_v9 = vadd.f32 %v750_v8, %v2298_v13  ;;  %v1198_v10 = vpop.f32.mrf.mxu2 }
 0x25e   :  { %v884_v14 = vmax.f32 %v582_v7, 0.0  ;;  %v1199_v15 = vadd.f32 %v2339_v27, %v1198_v10  ;;  %v1367_v16 = vpop.f32.mrf.mxu3 }
 0x25f   :  { %v885_v18 = vmax.f32 %v751_v9, 0.0 }
 0x260   :  { %v958_v20 = vpack.c.bf16 %v884_v14, %v882_v11  ;;  %v1368_v21 = vadd.f32 %v1367_v16, %v1199_v15 }
 0x261   :  { %v959_v22 = vpack.c.bf16 %v885_v18, %v883_v17 }
 0x262   :  { %v1997_v23 = vpack.c.bf16 %v1368_v21, %v1366_v19  ;;  %1240 = vmatmul.bf16.gmra.mxu2 %v958_v20 }
 0x263   :  { %1409 = vmatmul.bf16.gmra.mxu3 %v959_v22  ;;  %v584_v24 = vpop.f32.mrf.mxu0 }
 0x264   :  { %2085 = vst [vmem:[#allocation10 + $0x88] sm:$0xff] %v1997_v23   ;;  %v753_v25 = vpop.f32.mrf.mxu1  ;;  %v585_v29 = vadd.f32 %v584_v24, %v2296_v12 }
 0x265   :  { %v1201_v26 = vpop.f32.mrf.mxu2  ;;  %v754_v30 = vadd.f32 %v753_v25, %v2298_v13 }
 0x266   :  { %v1370_v28 = vpop.f32.mrf.mxu3  ;;  %v1202_v32 = vadd.f32 %v2454_v31, %v1201_v26  ;;  %v886_v37 = vmax.f32 %v585_v29, 0.0 }
 0x267   :  { %v887_v41 = vmax.f32 %v754_v30, 0.0 }
 0x268   :  { %v1371_v43 = vadd.f32 %v1370_v28, %v1202_v32 }
 0x26b   :  { %v586_v27 = vpop.f32.mrf.mxu0 }
 0x26c   :  { %v587_v33 = vadd.f32 %v586_v27, %v2296_v12  ;;  %v755_v34 = vpop.f32.mrf.mxu1 }
 0x26d   :  { %v756_v35 = vadd.f32 %v755_v34, %v2298_v13  ;;  %v1203_v36 = vpop.f32.mrf.mxu2 }
 0x26e   :  { %v888_v38 = vmax.f32 %v587_v33, 0.0  ;;  %v1204_v39 = vadd.f32 %v2454_v31, %v1203_v36  ;;  %v1372_v40 = vpop.f32.mrf.mxu3 }
 0x26f   :  { %v889_v42 = vmax.f32 %v756_v35, 0.0 }
 0x270   :  { %v960_v44 = vpack.c.bf16 %v888_v38, %v886_v37  ;;  %v1373_v45 = vadd.f32 %v1372_v40, %v1204_v39 }
 0x271   :  { %v961_v46 = vpack.c.bf16 %v889_v42, %v887_v41 }
 0x272   :  { %v2002_v47 = vpack.c.bf16 %v1373_v45, %v1371_v43  ;;  %1245 = vmatmul.bf16.gmra.mxu2 %v960_v44 }
 0x273   :  { %1414 = vmatmul.bf16.gmra.mxu3 %v961_v46  ;;  %v589_v48 = vpop.f32.mrf.mxu0 }
 0x274   :  { %2086 = vst [vmem:[#allocation10 + $0x90] sm:$0xff] %v2002_v47   ;;  %v758_v49 = vpop.f32.mrf.mxu1  ;;  %v590_v52 = vadd.f32 %v589_v48, %v2296_v12 }
 0x275   :  { %v1206_v50 = vpop.f32.mrf.mxu2  ;;  %v759_v53 = vadd.f32 %v758_v49, %v2298_v13 }
 0x276   :  { %v1375_v51 = vpop.f32.mrf.mxu3  ;;  %v1207_v55 = vadd.f32 %v2454_v31, %v1206_v50  ;;  %v890_v60 = vmax.f32 %v590_v52, 0.0 }
 0x277   :  { %v891_v0 = vmax.f32 %v759_v53, 0.0 }
 0x278   :  { %v1376_v2 = vadd.f32 %v1375_v51, %v1207_v55 }
 0x27b   :  { %v591_v54 = vpop.f32.mrf.mxu0 }
 0x27c   :  { %v592_v56 = vadd.f32 %v591_v54, %v2296_v12  ;;  %v760_v57 = vpop.f32.mrf.mxu1 }
 0x27d   :  { %v761_v58 = vadd.f32 %v760_v57, %v2298_v13  ;;  %v1208_v59 = vpop.f32.mrf.mxu2 }
 0x27e   :  { %v892_v61 = vmax.f32 %v592_v56, 0.0  ;;  %v1209_v62 = vadd.f32 %v2454_v31, %v1208_v59  ;;  %v1377_v63 = vpop.f32.mrf.mxu3 }
 0x27f   :  { %v893_v1 = vmax.f32 %v761_v58, 0.0 }
 0x280   :  { %v962_v3 = vpack.c.bf16 %v892_v61, %v890_v60  ;;  %v1378_v4 = vadd.f32 %v1377_v63, %v1209_v62 }
 0x281   :  { %v963_v5 = vpack.c.bf16 %v893_v1, %v891_v0 }
 0x282   :  { %v2007_v6 = vpack.c.bf16 %v1378_v4, %v1376_v2  ;;  %1250 = vmatmul.bf16.gmra.mxu2 %v962_v3 }
 0x283   :  { %1419 = vmatmul.bf16.gmra.mxu3 %v963_v5  ;;  %v594_v7 = vpop.f32.mrf.mxu0 }
 0x284   :  { %2087 = vst [vmem:[#allocation10 + $0x98] sm:$0xff] %v2007_v6   ;;  %v763_v8 = vpop.f32.mrf.mxu1  ;;  %v595_v11 = vadd.f32 %v594_v7, %v2296_v12 }
 0x285   :  { %v1211_v9 = vpop.f32.mrf.mxu2  ;;  %v764_v14 = vadd.f32 %v763_v8, %v2298_v13 }
 0x286   :  { %v1380_v10 = vpop.f32.mrf.mxu3  ;;  %v1212_v16 = vadd.f32 %v2454_v31, %v1211_v9  ;;  %v894_v21 = vmax.f32 %v595_v11, 0.0 }
 0x287   :  { %v895_v25 = vmax.f32 %v764_v14, 0.0 }
 0x288   :  { %v1381_v28 = vadd.f32 %v1380_v10, %v1212_v16 }
 0x28b   :  { %v596_v15 = vpop.f32.mrf.mxu0 }
 0x28c   :  { %v597_v17 = vadd.f32 %v596_v15, %v2296_v12  ;;  %v765_v18 = vpop.f32.mrf.mxu1 }
 0x28d   :  { %v766_v19 = vadd.f32 %v765_v18, %v2298_v13  ;;  %v1213_v20 = vpop.f32.mrf.mxu2 }
 0x28e   :  { %v896_v22 = vmax.f32 %v597_v17, 0.0  ;;  %v1214_v23 = vadd.f32 %v2454_v31, %v1213_v20  ;;  %v1382_v24 = vpop.f32.mrf.mxu3 }
 0x28f   :  { %v897_v26 = vmax.f32 %v766_v19, 0.0 }
 0x290   :  { %v964_v29 = vpack.c.bf16 %v896_v22, %v894_v21  ;;  %v1383_v30 = vadd.f32 %v1382_v24, %v1214_v23 }
 0x291   :  { %v965_v27 = vpack.c.bf16 %v897_v26, %v895_v25 }
 0x292   :  { %v2012_v32 = vpack.c.bf16 %v1383_v30, %v1381_v28  ;;  %1255 = vmatmul.bf16.gmra.mxu2 %v964_v29 }
 0x293   :  { %1424 = vmatmul.bf16.gmra.mxu3 %v965_v27  ;;  %v599_v33 = vpop.f32.mrf.mxu0 }
 0x294   :  { %2088 = vst [vmem:[#allocation10 + $0xa0] sm:$0xff] %v2012_v32   ;;  %v768_v34 = vpop.f32.mrf.mxu1  ;;  %v600_v37 = vadd.f32 %v599_v33, %v2296_v12 }
 0x295   :  { %v1216_v35 = vpop.f32.mrf.mxu2  ;;  %v769_v38 = vadd.f32 %v768_v34, %v2298_v13 }
 0x296   :  { %v1385_v36 = vpop.f32.mrf.mxu3  ;;  %v1217_v40 = vadd.f32 %v2454_v31, %v1216_v35  ;;  %v898_v45 = vmax.f32 %v600_v37, 0.0 }
 0x297   :  { %v899_v49 = vmax.f32 %v769_v38, 0.0 }
 0x298   :  { %v1386_v51 = vadd.f32 %v1385_v36, %v1217_v40 }
 0x29b   :  { %v601_v39 = vpop.f32.mrf.mxu0 }
 0x29c   :  { %v602_v41 = vadd.f32 %v601_v39, %v2296_v12  ;;  %v770_v42 = vpop.f32.mrf.mxu1 }
 0x29d   :  { %v771_v43 = vadd.f32 %v770_v42, %v2298_v13  ;;  %v1218_v44 = vpop.f32.mrf.mxu2 }
 0x29e   :  { %v900_v46 = vmax.f32 %v602_v41, 0.0  ;;  %v1219_v47 = vadd.f32 %v2454_v31, %v1218_v44  ;;  %v1387_v48 = vpop.f32.mrf.mxu3 }
 0x29f   :  { %v901_v50 = vmax.f32 %v771_v43, 0.0 }
 0x2a0   :  { %v966_v52 = vpack.c.bf16 %v900_v46, %v898_v45  ;;  %v1388_v53 = vadd.f32 %v1387_v48, %v1219_v47 }
 0x2a1   :  { %v967_v54 = vpack.c.bf16 %v901_v50, %v899_v49 }
 0x2a2   :  { %v2017_v55 = vpack.c.bf16 %v1388_v53, %v1386_v51  ;;  %1260 = vmatmul.bf16.gmra.mxu2 %v966_v52 }
 0x2a3   :  { %1429 = vmatmul.bf16.gmra.mxu3 %v967_v54  ;;  %v604_v56 = vpop.f32.mrf.mxu0 }
 0x2a4   :  { %2089 = vst [vmem:[#allocation10 + $0xa8] sm:$0xff] %v2017_v55   ;;  %v773_v57 = vpop.f32.mrf.mxu1  ;;  %v605_v60 = vadd.f32 %v604_v56, %v2296_v12 }
 0x2a5   :  { %v1221_v58 = vpop.f32.mrf.mxu2  ;;  %v774_v61 = vadd.f32 %v773_v57, %v2298_v13 }
 0x2a6   :  { %v1390_v59 = vpop.f32.mrf.mxu3  ;;  %v1222_v63 = vadd.f32 %v2454_v31, %v1221_v58  ;;  %v902_v4 = vmax.f32 %v605_v60, 0.0 }
 0x2a7   :  { %v903_v8 = vmax.f32 %v774_v61, 0.0 }
 0x2a8   :  { %v1391_v10 = vadd.f32 %v1390_v59, %v1222_v63 }
 0x2ab   :  { %v606_v62 = vpop.f32.mrf.mxu0 }
 0x2ac   :  { %v607_v0 = vadd.f32 %v606_v62, %v2296_v12  ;;  %v775_v1 = vpop.f32.mrf.mxu1 }
 0x2ad   :  { %v776_v2 = vadd.f32 %v775_v1, %v2298_v13  ;;  %v1223_v3 = vpop.f32.mrf.mxu2 }
 0x2ae   :  { %v904_v5 = vmax.f32 %v607_v0, 0.0  ;;  %v1224_v6 = vadd.f32 %v2454_v31, %v1223_v3  ;;  %v1392_v7 = vpop.f32.mrf.mxu3 }
 0x2af   :  { %v905_v9 = vmax.f32 %v776_v2, 0.0 }
 0x2b0   :  { %v968_v11 = vpack.c.bf16 %v904_v5, %v902_v4  ;;  %v1393_v14 = vadd.f32 %v1392_v7, %v1224_v6 }
 0x2b1   :  { %v969_v15 = vpack.c.bf16 %v905_v9, %v903_v8 }
 0x2b2   :  { %v2022_v16 = vpack.c.bf16 %v1393_v14, %v1391_v10  ;;  %1265 = vmatmul.bf16.gmra.mxu2 %v968_v11 }
 0x2b3   :  { %1434 = vmatmul.bf16.gmra.mxu3 %v969_v15 }
 0x2b4   :  { %2090 = vst [vmem:[#allocation10 + $0xb0] sm:$0xff] %v2022_v16  }
 0x2b5   :  { %v1226_v12 = vpop.f32.mrf.mxu2 }
 0x2b6   :  { %v1395_v17 = vpop.f32.mrf.mxu3  ;;  %v1227_v13 = vadd.f32 %v2454_v31, %v1226_v12 }
 0x2b8   :  { %v1396_v21 = vadd.f32 %v1395_v17, %v1227_v13 }
 0x2bd   :  { %v1228_v18 = vpop.f32.mrf.mxu2 }
 0x2be   :  { %v1229_v19 = vadd.f32 %v2454_v31, %v1228_v18  ;;  %v1397_v20 = vpop.f32.mrf.mxu3 }
 0x2c0   :  { %v1398_v22 = vadd.f32 %v1397_v20, %v1229_v19 }
 0x2c2   :  { %v2027_v23 = vpack.c.bf16 %v1398_v22, %v1396_v21 }
 0x2c4   :  { %2091 = vst [vmem:[#allocation10 + $0xb8] sm:$0xff] %v2027_v23  }
 0x2c5   :  { %v1231_v24 = vpop.f32.mrf.mxu2 }
 0x2c6   :  { %v1400_v25 = vpop.f32.mrf.mxu3  ;;  %v1232_v26 = vadd.f32 %v2454_v31, %v1231_v24 }
 0x2c8   :  { %v1401_v27 = vadd.f32 %v1400_v25, %v1232_v26 }
 0x2cd   :  { %v1233_v28 = vpop.f32.mrf.mxu2 }
 0x2ce   :  { %v1234_v29 = vadd.f32 %v2454_v31, %v1233_v28  ;;  %v1402_v30 = vpop.f32.mrf.mxu3 }
 0x2d0   :  { %v1403_v32 = vadd.f32 %v1402_v30, %v1234_v29 }
 0x2d2   :  { %v2032_v33 = vpack.c.bf16 %v1403_v32, %v1401_v27 }
 0x2d4   :  { %2092 = vst [vmem:[#allocation10 + $0xc0] sm:$0xff] %v2032_v33  }
 0x2d5   :  { %v1236_v34 = vpop.f32.mrf.mxu2 }
 0x2d6   :  { %v1405_v35 = vpop.f32.mrf.mxu3  ;;  %v1237_v36 = vadd.f32 %v2454_v31, %v1236_v34 }
 0x2d8   :  { %v1406_v40 = vadd.f32 %v1405_v35, %v1237_v36 }
 0x2dd   :  { %v1238_v37 = vpop.f32.mrf.mxu2 }
 0x2de   :  { %v1239_v38 = vadd.f32 %v2454_v31, %v1238_v37  ;;  %v1407_v39 = vpop.f32.mrf.mxu3 }
 0x2e0   :  { %v1408_v41 = vadd.f32 %v1407_v39, %v1239_v38 }
 0x2e2   :  { %v2037_v42 = vpack.c.bf16 %v1408_v41, %v1406_v40 }
 0x2e4   :  { %2093 = vst [vmem:[#allocation10 + $0xc8] sm:$0xff] %v2037_v42  }
 0x2e5   :  { %v1241_v43 = vpop.f32.mrf.mxu2 }
 0x2e6   :  { %v1410_v44 = vpop.f32.mrf.mxu3  ;;  %v1242_v45 = vadd.f32 %v2454_v31, %v1241_v43 }
 0x2e8   :  { %v1411_v49 = vadd.f32 %v1410_v44, %v1242_v45 }
 0x2ed   :  { %v1243_v46 = vpop.f32.mrf.mxu2 }
 0x2ee   :  { %v1244_v47 = vadd.f32 %v2454_v31, %v1243_v46  ;;  %v1412_v48 = vpop.f32.mrf.mxu3 }
 0x2f0   :  { %v1413_v50 = vadd.f32 %v1412_v48, %v1244_v47 }
 0x2f2   :  { %v2042_v51 = vpack.c.bf16 %v1413_v50, %v1411_v49 }
 0x2f4   :  { %2094 = vst [vmem:[#allocation10 + $0xd0] sm:$0xff] %v2042_v51  }
 0x2f5   :  { %v1246_v52 = vpop.f32.mrf.mxu2 }
 0x2f6   :  { %v1415_v53 = vpop.f32.mrf.mxu3  ;;  %v1247_v54 = vadd.f32 %v2454_v31, %v1246_v52 }
 0x2f8   :  { %v1416_v58 = vadd.f32 %v1415_v53, %v1247_v54 }
 0x2fd   :  { %v1248_v55 = vpop.f32.mrf.mxu2 }
 0x2fe   :  { %v1249_v56 = vadd.f32 %v2454_v31, %v1248_v55  ;;  %v1417_v57 = vpop.f32.mrf.mxu3 }
 0x300   :  { %v1418_v59 = vadd.f32 %v1417_v57, %v1249_v56 }
 0x302   :  { %v2047_v60 = vpack.c.bf16 %v1418_v59, %v1416_v58 }
 0x304   :  { %2095 = vst [vmem:[#allocation10 + $0xd8] sm:$0xff] %v2047_v60  }
 0x305   :  { %v1251_v61 = vpop.f32.mrf.mxu2 }
 0x306   :  { %v1420_v62 = vpop.f32.mrf.mxu3  ;;  %v1252_v63 = vadd.f32 %v2454_v31, %v1251_v61 }
 0x308   :  { %v1421_v3 = vadd.f32 %v1420_v62, %v1252_v63 }
 0x30d   :  { %v1253_v0 = vpop.f32.mrf.mxu2 }
 0x30e   :  { %v1254_v1 = vadd.f32 %v2454_v31, %v1253_v0  ;;  %v1422_v2 = vpop.f32.mrf.mxu3 }
 0x310   :  { %v1423_v4 = vadd.f32 %v1422_v2, %v1254_v1 }
 0x312   :  { %v2052_v5 = vpack.c.bf16 %v1423_v4, %v1421_v3 }
 0x314   :  { %2096 = vst [vmem:[#allocation10 + $0xe0] sm:$0xff] %v2052_v5  }
 0x315   :  { %v1256_v6 = vpop.f32.mrf.mxu2 }
 0x316   :  { %v1425_v7 = vpop.f32.mrf.mxu3  ;;  %v1257_v8 = vadd.f32 %v2454_v31, %v1256_v6 }
 0x318   :  { %v1426_v14 = vadd.f32 %v1425_v7, %v1257_v8 }
 0x31d   :  { %v1258_v9 = vpop.f32.mrf.mxu2 }
 0x31e   :  { %v1259_v10 = vadd.f32 %v2454_v31, %v1258_v9  ;;  %v1427_v11 = vpop.f32.mrf.mxu3 }
 0x320   :  { %v1428_v15 = vadd.f32 %v1427_v11, %v1259_v10 }
 0x322   :  { %v2057_v16 = vpack.c.bf16 %v1428_v15, %v1426_v14 }
 0x324   :  { %2097 = vst [vmem:[#allocation10 + $0xe8] sm:$0xff] %v2057_v16  }
 0x325   :  { %v1261_v12 = vpop.f32.mrf.mxu2 }
 0x326   :  { %v1430_v17 = vpop.f32.mrf.mxu3  ;;  %v1262_v13 = vadd.f32 %v2454_v31, %v1261_v12 }
 0x328   :  { %v1431_v21 = vadd.f32 %v1430_v17, %v1262_v13 }
 0x32d   :  { %v1263_v18 = vpop.f32.mrf.mxu2 }
 0x32e   :  { %v1264_v19 = vadd.f32 %v2454_v31, %v1263_v18  ;;  %v1432_v20 = vpop.f32.mrf.mxu3 }
 0x330   :  { %v1433_v22 = vadd.f32 %v1432_v20, %v1264_v19 }
 0x332   :  { %v2062_v23 = vpack.c.bf16 %v1433_v22, %v1431_v21 }
 0x334   :  { %2098 = vst [vmem:[#allocation10 + $0xf0] sm:$0xff] %v2062_v23  }
 0x335   :  { %v1266_v24 = vpop.f32.mrf.mxu2 }
 0x336   :  { %v1435_v25 = vpop.f32.mrf.mxu3  ;;  %v1267_v26 = vadd.f32 %v2454_v31, %v1266_v24 }
 0x338   :  { %v1436_v27 = vadd.f32 %v1435_v25, %v1267_v26 }
 0x33d   :  { %v1268_v28 = vpop.f32.mrf.mxu2 }
 0x33e   :  { %v1269_v29 = vadd.f32 %v2454_v31, %v1268_v28  ;;  %v1437_v30 = vpop.f32.mrf.mxu3 }
 0x340   :  { %v1438_v32 = vadd.f32 %v1437_v30, %v1269_v29 }
 0x342   :  { %v2067_v33 = vpack.c.bf16 %v1438_v32, %v1436_v27 }
 0x344   :  { %2099 = vst [vmem:[#allocation10 + $0xf8] sm:$0xff] %v2067_v33  }
 0x345   :  { %1580 = dma.vmem_to_hbm [thread:$0]  %s1573_s17, 4096, %s1575_s20, [#allocation4], %s2243_s30, %s2243_s30, %s2244_s6  }
 0x346   :  { %2237 = dma.done.wait [#allocation4], 4096  }
 0x347   :  { %2238 = vsyncadd [#allocation4], 4294963200 }
 0x348   :  { %1585 = vsyncpa [#allocation3], 1 }
 0x349   :  { %1586 = vsyncpa [#allocation6], 1 }
 0x34a   :  { %1587 = vsyncpa [#allocation9], 1 }
 0x34b   :  { %1588 = vsyncpa [#allocation4], 1 }

</bundles_post_ra>
